<compile_context>
chip_gen: v6e
topology: v6e:2x2x1
jax: 0.10.0
libtpu: 0.0.40
codegen_flags: <defaults>
</compile_context>

<pallas_src>
import jax
import jax.numpy as jnp
from jax.experimental import pallas as pl
from jax.experimental.pallas import tpu as pltpu


# ----------------------------------------------------------------------------
# Kernel: whole recurrent forward in one invocation (no grid).
# ----------------------------------------------------------------------------
def decoder_kernel(
    x_enc_ref,     # (B, Tm1, E)   encoder outputs
    y_fc_ref,      # (Tm1, B, 1)   precomputed y_prev*fc_wy + fc_b
    mats_ref,      # (2D+E, 4D+E)  packed: fused recurrent RHS + W1_x block
    rows_ref,      # (8, row_w)    packed (1,N) row vectors
    fcf_b_ref,     # (1, 1)        SMEM scalar: fc_final bias
    y_pred_ref,    # out: (B, 1)
    dc_ref,        # scratch: (B, 2D)  assembled [d | c] hidden/cell state
):
    x_enc = x_enc_ref[...]                      # (B, Tm1, E)
    B, Tm1, E = x_enc.shape
    D = (mats_ref.shape[0] - E) // 2
    G = mats_ref.shape[1] - E                   # = 4*D, lane-aligned gate block

    # ---- unpack weight slabs once (static slices, hoisted VMEM loads) -------
    w_fused = mats_ref[0:2 * D, :]              # (2D, 4D+E): [[Whh|W1d],[0|W1c]]
    w1x_t = mats_ref[2 * D:2 * D + E, 0:E]      # (E, E)

    b1 = rows_ref[0:1, 0:E]                     # (1, E)
    w2_row = rows_ref[1:2, 0:E]                 # (1, E)
    wih_t = rows_ref[2:3, 0:G]                  # (1, 4D)  gate order [i,f,o,g]
    lstm_b = rows_ref[3:4, 0:G]                 # (1, 4D)  gate order [i,f,o,g]
    fc_wc = rows_ref[4:5, 0:E]                  # (1, E)
    fcf_wd = rows_ref[5:6, 0:D]                 # (1, D)
    fcf_we = rows_ref[6:7, 0:E]                 # (1, E)

    # ---- hoisted, time-invariant part of the attention query ----------------
    #   x_part[b, s, :] = X_encoded[b, s, :] @ W1_x^T + b1
    x_part = jax.lax.dot_general(
        x_enc, w1x_t,
        dimension_numbers=(((2,), (0,)), ((), ())),
        preferred_element_type=jnp.float32) + b1            # (B, Tm1, E)

    dc_ref[...] = jnp.zeros_like(dc_ref)                    # d = c = 0
    context = jnp.zeros((B, E), jnp.float32)

    # Fully unrolled time recurrence (Tm1 small & static, indices static).
    for t in range(Tm1):
        dc = dc_ref[...]                                     # (B, 2D) = [d | c]

        # one fused MXU matmul per step:
        #   [0:4D]    = d @ Whh^T   (LSTM hidden gates, permuted [i,f,o,g])
        #   [4D:4D+E] = d @ W1_d^T + c @ W1_c^T   (attention query part)
        m = jnp.dot(dc, w_fused, preferred_element_type=jnp.float32)
        gates_h = m[:, 0:G]                                  # (B, 4D)
        dc_part = m[:, G:G + E]                              # (B, E)

        # ---- attention over the T-1 encoder states (VPU mul + lane reduce) --
        z = jnp.tanh(x_part + dc_part[:, None, :])           # (B, Tm1, E)
        score = jnp.sum(z * w2_row, axis=-1, keepdims=True)  # (B, Tm1, 1); b2 dropped
        mx = jnp.max(score, axis=1, keepdims=True)
        e = jnp.exp(score - mx)
        beta = e / jnp.sum(e, axis=1, keepdims=True)         # exact softmax
        context = jnp.sum(beta * x_enc, axis=1)              # (B, E)

        # ---- y_tilde = fc([context, y_prev[:, t]]) (y affine pre-hoisted) ---
        y_tilde = (jnp.sum(context * fc_wc, axis=-1, keepdims=True)
                   + y_fc_ref[t])                            # (B, 1)

        # ---- single-step LSTM (input size 1), gate layout [i, f, o, g] ------
        gates = y_tilde * wih_t + gates_h + lstm_b           # (B, 4D)
        sg = jax.nn.sigmoid(gates[:, 0:3 * D])               # i | f | o
        g_g = jnp.tanh(gates[:, 3 * D:G])                    # g
        c_prev = dc[:, D:2 * D]
        c_new = sg[:, D:2 * D] * c_prev + sg[:, 0:D] * g_g   # (B, D)
        d_new = sg[:, 2 * D:3 * D] * jnp.tanh(c_new)         # (B, D)

        # re-assemble [d | c] with two static sub-slice stores (no lane concat
        # feeding the matmul; the matmul reads the already-assembled scratch).
        dc_ref[:, 0:D] = d_new
        dc_ref[:, D:2 * D] = c_new

    # ---- final projection on (d_n, last context): VPU mul + lane reduce -----
    d_fin = dc_ref[:, 0:D]
    y_pred_ref[...] = (
        jnp.sum(d_fin * fcf_wd, axis=-1, keepdims=True)
        + jnp.sum(context * fcf_we, axis=-1, keepdims=True)
        + fcf_b_ref[0, 0])


# ----------------------------------------------------------------------------
# Wrapper: pack weights into slabs, permute gates, hoist y affine.
# ----------------------------------------------------------------------------
def decoder_forward(X_encoded, y_prev, params):
    B, Tm1, E = X_encoded.shape
    D = params["whh_t"].shape[0]
    G = 4 * D

    # gate-column permutation: PyTorch [i, f, g, o] -> kernel [i, f, o, g]
    perm = jnp.concatenate([jnp.arange(0, 2 * D),
                            jnp.arange(3 * D, 4 * D),
                            jnp.arange(2 * D, 3 * D)])
    whh_p = params["whh_t"][:, perm]
    wih_p = params["wih_t"][:, perm]
    lstm_b_p = params["lstm_b"][:, perm]

    # split attention first-layer weight into d / c / x sub-matrices
    w1t = params["w1t"]                      # (2D+E, E)
    w1d_t = w1t[:D, :]
    w1c_t = w1t[D:2 * D, :]
    w1x_t = w1t[2 * D:, :]
    # b2 intentionally dropped: adding a constant before softmax is a no-op.

    # slab A: fused recurrent RHS [[Whh|W1d],[0|W1c]] plus W1_x block
    mats = jnp.zeros((2 * D + E, G + E), jnp.float32)
    mats = mats.at[:D, :G].set(whh_p)
    mats = mats.at[:D, G:].set(w1d_t)
    mats = mats.at[D:2 * D, G:].set(w1c_t)
    mats = mats.at[2 * D:, :E].set(w1x_t)

    # slab B: all (1, N) row vectors, one per sublane row, zero padded
    row_w = ((max(G, E, D) + 127) // 128) * 128
    rows = jnp.zeros((8, row_w), jnp.float32)
    rows = rows.at[0, :E].set(params["b1"][0])
    rows = rows.at[1, :E].set(params["w2t"][:, 0])
    rows = rows.at[2, :G].set(wih_p[0])
    rows = rows.at[3, :G].set(lstm_b_p[0])
    rows = rows.at[4, :E].set(params["fc_wc_t"][:, 0])
    rows = rows.at[5, :D].set(params["fcf_wd_t"][:, 0])
    rows = rows.at[6, :E].set(params["fcf_we_t"][:, 0])

    # hoisted y_prev affine: y_fc[t] = y_prev[:, t] * fc_wy + fc_b, (Tm1, B, 1)
    y_fc = (jnp.transpose(y_prev) * params["fc_wy"][0, 0]
            + params["fc_b"][0, 0])[:, :, None].astype(jnp.float32)

    fcf_b = params["fcf_b"].astype(jnp.float32)              # (1, 1) -> SMEM

    vmem = pl.BlockSpec(memory_space=pltpu.MemorySpace.VMEM)
    smem = pl.BlockSpec(memory_space=pltpu.MemorySpace.SMEM)
    return pl.pallas_call(
        decoder_kernel,
        out_shape=jax.ShapeDtypeStruct((B, 1), jnp.float32),
        in_specs=[vmem, vmem, vmem, vmem, smem],
        out_specs=vmem,
        scratch_shapes=[pltpu.VMEM((B, 2 * D), jnp.float32)],
    )(X_encoded.astype(jnp.float32), y_fc, mats, rows, fcf_b)


# ----------------------------------------------------------------------------
# Pure-JAX reference (mirrors the PyTorch forward exactly, incl. b2)
# ----------------------------------------------------------------------------
def decoder_reference(X, y_prev, p):
    B, Tm1, E = X.shape
    D = p["whh_t"].shape[0]
    d = jnp.zeros((B, D), jnp.float32)
    c = jnp.zeros((B, D), jnp.float32)
    context = jnp.zeros((B, E), jnp.float32)
    for t in range(Tm1):
        x = jnp.concatenate(
            [jnp.tile(d[:, None, :], (1, Tm1, 1)),
             jnp.tile(c[:, None, :], (1, Tm1, 1)),
             X], axis=2)                                        # (B, Tm1, 2D+E)
        z = jnp.tanh(x.reshape(-1, 2 * D + E) @ p["w1t"] + p["b1"])
        score = (z @ p["w2t"] + p["b2"]).reshape(B, Tm1)
        beta = jax.nn.softmax(score, axis=-1)
        context = jnp.einsum("bs,bse->be", beta, X)
        y_tilde = (context @ p["fc_wc_t"]
                   + y_prev[:, t:t + 1] * p["fc_wy"] + p["fc_b"])
        gates = y_tilde * p["wih_t"] + d @ p["whh_t"] + p["lstm_b"]
        i = jax.nn.sigmoid(gates[:, 0:D])
        f = jax.nn.sigmoid(gates[:, D:2 * D])
        g = jnp.tanh(gates[:, 2 * D:3 * D])
        o = jax.nn.sigmoid(gates[:, 3 * D:4 * D])
        c = f * c + i * g
        d = o * jnp.tanh(c)
    return d @ p["fcf_wd_t"] + context @ p["fcf_we_t"] + p["fcf_b"]


# ----------------------------------------------------------------------------
# Deterministic parameter init (shapes from Decoder.__init__)
# ----------------------------------------------------------------------------
def init_params(key, T, D, E):
    ks = jax.random.split(key, 12)
    n = lambda k, s, sc=0.1: sc * jax.random.normal(k, s, jnp.float32)
    return {
        # attn_layer: Linear(2D+E -> E), Tanh, Linear(E -> 1)
        "w1t": n(ks[0], (2 * D + E, E)),
        "b1": n(ks[1], (1, E)),
        "w2t": n(ks[2], (E, 1)),
        "b2": n(ks[3], (1, 1)),
        # lstm_layer: LSTM(input_size=1, hidden_size=D); b = b_ih + b_hh
        "wih_t": n(ks[4], (1, 4 * D)),
        "whh_t": n(ks[5], (D, 4 * D)),
        "lstm_b": n(ks[6], (1, 4 * D)),
        # fc: Linear(E+1 -> 1) (weight split into context / y_prev parts)
        "fc_wc_t": n(ks[7], (E, 1), 1.0),   # fc.weight.data.normal_()
        "fc_wy": n(ks[8], (1, 1), 1.0),
        "fc_b": n(ks[9], (1, 1)),
        # fc_final: Linear(D+E -> 1) (weight split into d_n / context parts)
        "fcf_wd_t": n(ks[10], (D, 1)),
        "fcf_we_t": n(ks[11], (E, 1)),
        "fcf_b": jnp.zeros((1, 1), jnp.float32),
    }


if __name__ == "__main__":
    T = 8                 # decoder window -> T-1 = 7 time steps
    B = 4                 # batch
    D = 32                # decoder_num_hidden
    E = 32                # encoder_num_hidden

    key = jax.random.PRNGKey(0)
    k_x, k_y, k_p = jax.random.split(key, 3)

    X_encoded = jax.random.normal(k_x, (B, T - 1, E), jnp.float32)
    y_prev = jax.random.normal(k_y, (B, T - 1), jnp.float32)
    params = init_params(k_p, T, D, E)

    y_pred = decoder_forward(X_encoded, y_prev, params)
    y_pred = jax.block_until_ready(y_pred)

    y_ref = decoder_reference(X_encoded, y_prev, params)
    assert y_pred.shape == (B, 1)
    # Exact softmax normalization restored -> tight tolerance again.
    assert jnp.allclose(y_pred, y_ref, rtol=1e-4, atol=1e-4), (y_pred, y_ref)

    print("KERNEL_OK")
</pallas_src>

<mosaic_0001>
module attributes {stable_mosaic.version = 11 : i64} {
  func.func @decoder_kernel(%arg0: memref<4x7x32xf32, #tpu.memory_space<vmem>>, %arg1: memref<7x4x1xf32, #tpu.memory_space<vmem>>, %arg2: memref<96x160xf32, #tpu.memory_space<vmem>>, %arg3: memref<8x128xf32, #tpu.memory_space<vmem>>, %arg4: memref<1x1xf32, #tpu.memory_space<smem>>, %arg5: memref<4x1xf32, #tpu.memory_space<vmem>>, %arg6: memref<4x64xf32, #tpu.memory_space<vmem>>) attributes {dimension_semantics = [], scalar_prefetch = 0 : i64, scratch_operands = 1 : i64, tpu.core_type = #tpu.core_type<tc>} {
    %c0 = arith.constant 0 : index
    %c0_0 = arith.constant 0 : index
    %c0_1 = arith.constant 0 : index
    %0 = vector.load %arg0[%c0, %c0_0, %c0_1] : memref<4x7x32xf32, #tpu.memory_space<vmem>>, vector<4x7x32xf32>
    %c0_2 = arith.constant 0 : index
    %c0_3 = arith.constant 0 : index
    %1 = vector.load %arg2[%c0_2, %c0_3] : memref<96x160xf32, #tpu.memory_space<vmem>>, vector<64x160xf32>
    %c64 = arith.constant 64 : index
    %c0_4 = arith.constant 0 : index
    %2 = vector.load %arg2[%c64, %c0_4] : memref<96x160xf32, #tpu.memory_space<vmem>>, vector<32x32xf32>
    %c0_5 = arith.constant 0 : index
    %c0_6 = arith.constant 0 : index
    %3 = vector.load %arg3[%c0_5, %c0_6] : memref<8x128xf32, #tpu.memory_space<vmem>>, vector<1x32xf32>
    %c1 = arith.constant 1 : index
    %c0_7 = arith.constant 0 : index
    %4 = vector.load %arg3[%c1, %c0_7] : memref<8x128xf32, #tpu.memory_space<vmem>>, vector<1x32xf32>
    %c2 = arith.constant 2 : index
    %c0_8 = arith.constant 0 : index
    %5 = vector.load %arg3[%c2, %c0_8] : memref<8x128xf32, #tpu.memory_space<vmem>>, vector<1x128xf32>
    %c3 = arith.constant 3 : index
    %c0_9 = arith.constant 0 : index
    %6 = vector.load %arg3[%c3, %c0_9] : memref<8x128xf32, #tpu.memory_space<vmem>>, vector<1x128xf32>
    %c4 = arith.constant 4 : index
    %c0_10 = arith.constant 0 : index
    %7 = vector.load %arg3[%c4, %c0_10] : memref<8x128xf32, #tpu.memory_space<vmem>>, vector<1x32xf32>
    %c5 = arith.constant 5 : index
    %c0_11 = arith.constant 0 : index
    %8 = vector.load %arg3[%c5, %c0_11] : memref<8x128xf32, #tpu.memory_space<vmem>>, vector<1x32xf32>
    %c6 = arith.constant 6 : index
    %c0_12 = arith.constant 0 : index
    %9 = vector.load %arg3[%c6, %c0_12] : memref<8x128xf32, #tpu.memory_space<vmem>>, vector<1x32xf32>
    %cst = arith.constant dense<0.000000e+00> : vector<4x7x32xf32>
    %10 = tpu.matmul %0, %2, %cst {dimension_numbers = #tpu.dot_dimension_numbers<[2], [0], [0, 1], [1], [0, 0, 0, 1, 1, 1], [], []>} : vector<4x7x32xf32>, vector<32x32xf32>, vector<4x7x32xf32> -> vector<4x7x32xf32>
    %11 = vector.shape_cast %3 : vector<1x32xf32> to vector<1x1x32xf32>
    %12 = vector.broadcast %11 : vector<1x1x32xf32> to vector<4x7x32xf32>
    %13 = arith.addf %10, %12 : vector<4x7x32xf32>
    %cst_13 = arith.constant 0.000000e+00 : f32
    %14 = vector.broadcast %cst_13 : f32 to vector<4x64xf32>
    %c0_14 = arith.constant 0 : index
    %c0_15 = arith.constant 0 : index
    %15 = vector.load %arg6[%c0_14, %c0_15] : memref<4x64xf32, #tpu.memory_space<vmem>>, vector<4x64xf32>
    tpu.vector_store %arg6[%c0_14, %c0_15], %14 {strides = array<i32>} : memref<4x64xf32, #tpu.memory_space<vmem>>, vector<4x64xf32>,
    %c0_16 = arith.constant 0 : index
    %c0_17 = arith.constant 0 : index
    %16 = vector.load %arg6[%c0_16, %c0_17] : memref<4x64xf32, #tpu.memory_space<vmem>>, vector<4x64xf32>
    %cst_18 = arith.constant dense<0.000000e+00> : vector<4x160xf32>
    %17 = tpu.matmul %16, %1, %cst_18 {dimension_numbers = #tpu.dot_dimension_numbers<[1], [0], [0], [1], [0, 0, 1, 1], [], []>} : vector<4x64xf32>, vector<64x160xf32>, vector<4x160xf32> -> vector<4x160xf32>
    %18 = vector.extract_strided_slice %17 {offsets = [0, 0], sizes = [4, 128], strides = [1, 1]} : vector<4x160xf32> to vector<4x128xf32>
    %19 = vector.extract_strided_slice %17 {offsets = [0, 128], sizes = [4, 32], strides = [1, 1]} : vector<4x160xf32> to vector<4x32xf32>
    %20 = vector.shape_cast %19 : vector<4x32xf32> to vector<4x1x32xf32>
    %21 = vector.broadcast %20 : vector<4x1x32xf32> to vector<4x7x32xf32>
    %22 = arith.addf %13, %21 : vector<4x7x32xf32>
    %23 = math.tanh %22 : vector<4x7x32xf32>
    %24 = vector.shape_cast %4 : vector<1x32xf32> to vector<1x1x32xf32>
    %25 = vector.broadcast %24 : vector<1x1x32xf32> to vector<4x7x32xf32>
    %26 = arith.mulf %23, %25 : vector<4x7x32xf32>
    %cst_19 = arith.constant dense<0.000000e+00> : vector<4x7xf32>
    %27 = vector.multi_reduction <add>, %26, %cst_19 [2] : vector<4x7x32xf32> to vector<4x7xf32>
    %28 = vector.shape_cast %27 : vector<4x7xf32> to vector<4x7x1xf32>
    %cst_20 = arith.constant dense<0xFF800000> : vector<4x1xf32>
    %29 = vector.multi_reduction <maximumf>, %28, %cst_20 [1] : vector<4x7x1xf32> to vector<4x1xf32>
    %30 = vector.shape_cast %29 : vector<4x1xf32> to vector<4x1x1xf32>
    %31 = vector.broadcast %30 : vector<4x1x1xf32> to vector<4x7x1xf32>
    %32 = arith.subf %28, %31 : vector<4x7x1xf32>
    %33 = math.exp %32 : vector<4x7x1xf32>
    %cst_21 = arith.constant dense<0.000000e+00> : vector<4x1xf32>
    %34 = vector.multi_reduction <add>, %33, %cst_21 [1] : vector<4x7x1xf32> to vector<4x1xf32>
    %35 = vector.shape_cast %34 : vector<4x1xf32> to vector<4x1x1xf32>
    %36 = vector.broadcast %35 : vector<4x1x1xf32> to vector<4x7x1xf32>
    %37 = arith.divf %33, %36 : vector<4x7x1xf32>
    %38 = vector.broadcast %37 : vector<4x7x1xf32> to vector<4x7x32xf32>
    %39 = arith.mulf %38, %0 : vector<4x7x32xf32>
    %cst_22 = arith.constant dense<0.000000e+00> : vector<4x32xf32>
    %40 = vector.multi_reduction <add>, %39, %cst_22 [1] : vector<4x7x32xf32> to vector<4x32xf32>
    %41 = vector.broadcast %7 : vector<1x32xf32> to vector<4x32xf32>
    %42 = arith.mulf %40, %41 : vector<4x32xf32>
    %cst_23 = arith.constant dense<0.000000e+00> : vector<4xf32>
    %43 = vector.multi_reduction <add>, %42, %cst_23 [1] : vector<4x32xf32> to vector<4xf32>
    %44 = vector.shape_cast %43 : vector<4xf32> to vector<4x1xf32>
    %c0_24 = arith.constant 0 : index
    %c0_25 = arith.constant 0 : index
    %c0_26 = arith.constant 0 : index
    %45 = vector.load %arg1[%c0_24, %c0_25, %c0_26] : memref<7x4x1xf32, #tpu.memory_space<vmem>>, vector<1x4x1xf32>
    %46 = vector.shape_cast %45 : vector<1x4x1xf32> to vector<4x1xf32>
    %47 = arith.addf %44, %46 : vector<4x1xf32>
    %48 = vector.broadcast %47 : vector<4x1xf32> to vector<4x128xf32>
    %49 = vector.broadcast %5 : vector<1x128xf32> to vector<4x128xf32>
    %50 = arith.mulf %48, %49 : vector<4x128xf32>
    %51 = arith.addf %50, %18 : vector<4x128xf32>
    %52 = vector.broadcast %6 : vector<1x128xf32> to vector<4x128xf32>
    %53 = arith.addf %51, %52 : vector<4x128xf32>
    %54 = vector.extract_strided_slice %53 {offsets = [0, 0], sizes = [4, 96], strides = [1, 1]} : vector<4x128xf32> to vector<4x96xf32>
    %55 = arith.negf %54 : vector<4x96xf32>
    %56 = math.exp %55 : vector<4x96xf32>
    %cst_27 = arith.constant 1.000000e+00 : f32
    %57 = vector.broadcast %cst_27 : f32 to vector<4x96xf32>
    %58 = arith.addf %57, %56 : vector<4x96xf32>
    %59 = arith.divf %57, %58 : vector<4x96xf32>
    %60 = vector.extract_strided_slice %53 {offsets = [0, 96], sizes = [4, 32], strides = [1, 1]} : vector<4x128xf32> to vector<4x32xf32>
    %61 = math.tanh %60 : vector<4x32xf32>
    %62 = vector.extract_strided_slice %16 {offsets = [0, 32], sizes = [4, 32], strides = [1, 1]} : vector<4x64xf32> to vector<4x32xf32>
    %63 = vector.extract_strided_slice %59 {offsets = [0, 32], sizes = [4, 32], strides = [1, 1]} : vector<4x96xf32> to vector<4x32xf32>
    %64 = arith.mulf %63, %62 : vector<4x32xf32>
    %65 = vector.extract_strided_slice %59 {offsets = [0, 0], sizes = [4, 32], strides = [1, 1]} : vector<4x96xf32> to vector<4x32xf32>
    %66 = arith.mulf %65, %61 : vector<4x32xf32>
    %67 = arith.addf %64, %66 : vector<4x32xf32>
    %68 = vector.extract_strided_slice %59 {offsets = [0, 64], sizes = [4, 32], strides = [1, 1]} : vector<4x96xf32> to vector<4x32xf32>
    %69 = math.tanh %67 : vector<4x32xf32>
    %70 = arith.mulf %68, %69 : vector<4x32xf32>
    %c0_28 = arith.constant 0 : index
    %c0_29 = arith.constant 0 : index
    %71 = vector.load %arg6[%c0_28, %c0_29] : memref<4x64xf32, #tpu.memory_space<vmem>>, vector<4x32xf32>
    tpu.vector_store %arg6[%c0_28, %c0_29], %70 {strides = array<i32>} : memref<4x64xf32, #tpu.memory_space<vmem>>, vector<4x32xf32>,
    %c0_30 = arith.constant 0 : index
    %c32 = arith.constant 32 : index
    %72 = vector.load %arg6[%c0_30, %c32] : memref<4x64xf32, #tpu.memory_space<vmem>>, vector<4x32xf32>
    tpu.vector_store %arg6[%c0_30, %c32], %67 {strides = array<i32>} : memref<4x64xf32, #tpu.memory_space<vmem>>, vector<4x32xf32>,
    %c0_31 = arith.constant 0 : index
    %c0_32 = arith.constant 0 : index
    %73 = vector.load %arg6[%c0_31, %c0_32] : memref<4x64xf32, #tpu.memory_space<vmem>>, vector<4x64xf32>
    %cst_33 = arith.constant dense<0.000000e+00> : vector<4x160xf32>
    %74 = tpu.matmul %73, %1, %cst_33 {dimension_numbers = #tpu.dot_dimension_numbers<[1], [0], [0], [1], [0, 0, 1, 1], [], []>} : vector<4x64xf32>, vector<64x160xf32>, vector<4x160xf32> -> vector<4x160xf32>
    %75 = vector.extract_strided_slice %74 {offsets = [0, 0], sizes = [4, 128], strides = [1, 1]} : vector<4x160xf32> to vector<4x128xf32>
    %76 = vector.extract_strided_slice %74 {offsets = [0, 128], sizes = [4, 32], strides = [1, 1]} : vector<4x160xf32> to vector<4x32xf32>
    %77 = vector.shape_cast %76 : vector<4x32xf32> to vector<4x1x32xf32>
    %78 = vector.broadcast %77 : vector<4x1x32xf32> to vector<4x7x32xf32>
    %79 = arith.addf %13, %78 : vector<4x7x32xf32>
    %80 = math.tanh %79 : vector<4x7x32xf32>
    %81 = vector.shape_cast %4 : vector<1x32xf32> to vector<1x1x32xf32>
    %82 = vector.broadcast %81 : vector<1x1x32xf32> to vector<4x7x32xf32>
    %83 = arith.mulf %80, %82 : vector<4x7x32xf32>
    %cst_34 = arith.constant dense<0.000000e+00> : vector<4x7xf32>
    %84 = vector.multi_reduction <add>, %83, %cst_34 [2] : vector<4x7x32xf32> to vector<4x7xf32>
    %85 = vector.shape_cast %84 : vector<4x7xf32> to vector<4x7x1xf32>
    %cst_35 = arith.constant dense<0xFF800000> : vector<4x1xf32>
    %86 = vector.multi_reduction <maximumf>, %85, %cst_35 [1] : vector<4x7x1xf32> to vector<4x1xf32>
    %87 = vector.shape_cast %86 : vector<4x1xf32> to vector<4x1x1xf32>
    %88 = vector.broadcast %87 : vector<4x1x1xf32> to vector<4x7x1xf32>
    %89 = arith.subf %85, %88 : vector<4x7x1xf32>
    %90 = math.exp %89 : vector<4x7x1xf32>
    %cst_36 = arith.constant dense<0.000000e+00> : vector<4x1xf32>
    %91 = vector.multi_reduction <add>, %90, %cst_36 [1] : vector<4x7x1xf32> to vector<4x1xf32>
    %92 = vector.shape_cast %91 : vector<4x1xf32> to vector<4x1x1xf32>
    %93 = vector.broadcast %92 : vector<4x1x1xf32> to vector<4x7x1xf32>
    %94 = arith.divf %90, %93 : vector<4x7x1xf32>
    %95 = vector.broadcast %94 : vector<4x7x1xf32> to vector<4x7x32xf32>
    %96 = arith.mulf %95, %0 : vector<4x7x32xf32>
    %cst_37 = arith.constant dense<0.000000e+00> : vector<4x32xf32>
    %97 = vector.multi_reduction <add>, %96, %cst_37 [1] : vector<4x7x32xf32> to vector<4x32xf32>
    %98 = vector.broadcast %7 : vector<1x32xf32> to vector<4x32xf32>
    %99 = arith.mulf %97, %98 : vector<4x32xf32>
    %cst_38 = arith.constant dense<0.000000e+00> : vector<4xf32>
    %100 = vector.multi_reduction <add>, %99, %cst_38 [1] : vector<4x32xf32> to vector<4xf32>
    %101 = vector.shape_cast %100 : vector<4xf32> to vector<4x1xf32>
    %c1_39 = arith.constant 1 : index
    %c0_40 = arith.constant 0 : index
    %c0_41 = arith.constant 0 : index
    %102 = vector.load %arg1[%c1_39, %c0_40, %c0_41] : memref<7x4x1xf32, #tpu.memory_space<vmem>>, vector<1x4x1xf32>
    %103 = vector.shape_cast %102 : vector<1x4x1xf32> to vector<4x1xf32>
    %104 = arith.addf %101, %103 : vector<4x1xf32>
    %105 = vector.broadcast %104 : vector<4x1xf32> to vector<4x128xf32>
    %106 = vector.broadcast %5 : vector<1x128xf32> to vector<4x128xf32>
    %107 = arith.mulf %105, %106 : vector<4x128xf32>
    %108 = arith.addf %107, %75 : vector<4x128xf32>
    %109 = vector.broadcast %6 : vector<1x128xf32> to vector<4x128xf32>
    %110 = arith.addf %108, %109 : vector<4x128xf32>
    %111 = vector.extract_strided_slice %110 {offsets = [0, 0], sizes = [4, 96], strides = [1, 1]} : vector<4x128xf32> to vector<4x96xf32>
    %112 = arith.negf %111 : vector<4x96xf32>
    %113 = math.exp %112 : vector<4x96xf32>
    %cst_42 = arith.constant 1.000000e+00 : f32
    %114 = vector.broadcast %cst_42 : f32 to vector<4x96xf32>
    %115 = arith.addf %114, %113 : vector<4x96xf32>
    %116 = arith.divf %114, %115 : vector<4x96xf32>
    %117 = vector.extract_strided_slice %110 {offsets = [0, 96], sizes = [4, 32], strides = [1, 1]} : vector<4x128xf32> to vector<4x32xf32>
    %118 = math.tanh %117 : vector<4x32xf32>
    %119 = vector.extract_strided_slice %73 {offsets = [0, 32], sizes = [4, 32], strides = [1, 1]} : vector<4x64xf32> to vector<4x32xf32>
    %120 = vector.extract_strided_slice %116 {offsets = [0, 32], sizes = [4, 32], strides = [1, 1]} : vector<4x96xf32> to vector<4x32xf32>
    %121 = arith.mulf %120, %119 : vector<4x32xf32>
    %122 = vector.extract_strided_slice %116 {offsets = [0, 0], sizes = [4, 32], strides = [1, 1]} : vector<4x96xf32> to vector<4x32xf32>
    %123 = arith.mulf %122, %118 : vector<4x32xf32>
    %124 = arith.addf %121, %123 : vector<4x32xf32>
    %125 = vector.extract_strided_slice %116 {offsets = [0, 64], sizes = [4, 32], strides = [1, 1]} : vector<4x96xf32> to vector<4x32xf32>
    %126 = math.tanh %124 : vector<4x32xf32>
    %127 = arith.mulf %125, %126 : vector<4x32xf32>
    %c0_43 = arith.constant 0 : index
    %c0_44 = arith.constant 0 : index
    %128 = vector.load %arg6[%c0_43, %c0_44] : memref<4x64xf32, #tpu.memory_space<vmem>>, vector<4x32xf32>
    tpu.vector_store %arg6[%c0_43, %c0_44], %127 {strides = array<i32>} : memref<4x64xf32, #tpu.memory_space<vmem>>, vector<4x32xf32>,
    %c0_45 = arith.constant 0 : index
    %c32_46 = arith.constant 32 : index
    %129 = vector.load %arg6[%c0_45, %c32_46] : memref<4x64xf32, #tpu.memory_space<vmem>>, vector<4x32xf32>
    tpu.vector_store %arg6[%c0_45, %c32_46], %124 {strides = array<i32>} : memref<4x64xf32, #tpu.memory_space<vmem>>, vector<4x32xf32>,
    %c0_47 = arith.constant 0 : index
    %c0_48 = arith.constant 0 : index
    %130 = vector.load %arg6[%c0_47, %c0_48] : memref<4x64xf32, #tpu.memory_space<vmem>>, vector<4x64xf32>
    %cst_49 = arith.constant dense<0.000000e+00> : vector<4x160xf32>
    %131 = tpu.matmul %130, %1, %cst_49 {dimension_numbers = #tpu.dot_dimension_numbers<[1], [0], [0], [1], [0, 0, 1, 1], [], []>} : vector<4x64xf32>, vector<64x160xf32>, vector<4x160xf32> -> vector<4x160xf32>
    %132 = vector.extract_strided_slice %131 {offsets = [0, 0], sizes = [4, 128], strides = [1, 1]} : vector<4x160xf32> to vector<4x128xf32>
    %133 = vector.extract_strided_slice %131 {offsets = [0, 128], sizes = [4, 32], strides = [1, 1]} : vector<4x160xf32> to vector<4x32xf32>
    %134 = vector.shape_cast %133 : vector<4x32xf32> to vector<4x1x32xf32>
    %135 = vector.broadcast %134 : vector<4x1x32xf32> to vector<4x7x32xf32>
    %136 = arith.addf %13, %135 : vector<4x7x32xf32>
    %137 = math.tanh %136 : vector<4x7x32xf32>
    %138 = vector.shape_cast %4 : vector<1x32xf32> to vector<1x1x32xf32>
    %139 = vector.broadcast %138 : vector<1x1x32xf32> to vector<4x7x32xf32>
    %140 = arith.mulf %137, %139 : vector<4x7x32xf32>
    %cst_50 = arith.constant dense<0.000000e+00> : vector<4x7xf32>
    %141 = vector.multi_reduction <add>, %140, %cst_50 [2] : vector<4x7x32xf32> to vector<4x7xf32>
    %142 = vector.shape_cast %141 : vector<4x7xf32> to vector<4x7x1xf32>
    %cst_51 = arith.constant dense<0xFF800000> : vector<4x1xf32>
    %143 = vector.multi_reduction <maximumf>, %142, %cst_51 [1] : vector<4x7x1xf32> to vector<4x1xf32>
    %144 = vector.shape_cast %143 : vector<4x1xf32> to vector<4x1x1xf32>
    %145 = vector.broadcast %144 : vector<4x1x1xf32> to vector<4x7x1xf32>
    %146 = arith.subf %142, %145 : vector<4x7x1xf32>
    %147 = math.exp %146 : vector<4x7x1xf32>
    %cst_52 = arith.constant dense<0.000000e+00> : vector<4x1xf32>
    %148 = vector.multi_reduction <add>, %147, %cst_52 [1] : vector<4x7x1xf32> to vector<4x1xf32>
    %149 = vector.shape_cast %148 : vector<4x1xf32> to vector<4x1x1xf32>
    %150 = vector.broadcast %149 : vector<4x1x1xf32> to vector<4x7x1xf32>
    %151 = arith.divf %147, %150 : vector<4x7x1xf32>
    %152 = vector.broadcast %151 : vector<4x7x1xf32> to vector<4x7x32xf32>
    %153 = arith.mulf %152, %0 : vector<4x7x32xf32>
    %cst_53 = arith.constant dense<0.000000e+00> : vector<4x32xf32>
    %154 = vector.multi_reduction <add>, %153, %cst_53 [1] : vector<4x7x32xf32> to vector<4x32xf32>
    %155 = vector.broadcast %7 : vector<1x32xf32> to vector<4x32xf32>
    %156 = arith.mulf %154, %155 : vector<4x32xf32>
    %cst_54 = arith.constant dense<0.000000e+00> : vector<4xf32>
    %157 = vector.multi_reduction <add>, %156, %cst_54 [1] : vector<4x32xf32> to vector<4xf32>
    %158 = vector.shape_cast %157 : vector<4xf32> to vector<4x1xf32>
    %c2_55 = arith.constant 2 : index
    %c0_56 = arith.constant 0 : index
    %c0_57 = arith.constant 0 : index
    %159 = vector.load %arg1[%c2_55, %c0_56, %c0_57] : memref<7x4x1xf32, #tpu.memory_space<vmem>>, vector<1x4x1xf32>
    %160 = vector.shape_cast %159 : vector<1x4x1xf32> to vector<4x1xf32>
    %161 = arith.addf %158, %160 : vector<4x1xf32>
    %162 = vector.broadcast %161 : vector<4x1xf32> to vector<4x128xf32>
    %163 = vector.broadcast %5 : vector<1x128xf32> to vector<4x128xf32>
    %164 = arith.mulf %162, %163 : vector<4x128xf32>
    %165 = arith.addf %164, %132 : vector<4x128xf32>
    %166 = vector.broadcast %6 : vector<1x128xf32> to vector<4x128xf32>
    %167 = arith.addf %165, %166 : vector<4x128xf32>
    %168 = vector.extract_strided_slice %167 {offsets = [0, 0], sizes = [4, 96], strides = [1, 1]} : vector<4x128xf32> to vector<4x96xf32>
    %169 = arith.negf %168 : vector<4x96xf32>
    %170 = math.exp %169 : vector<4x96xf32>
    %cst_58 = arith.constant 1.000000e+00 : f32
    %171 = vector.broadcast %cst_58 : f32 to vector<4x96xf32>
    %172 = arith.addf %171, %170 : vector<4x96xf32>
    %173 = arith.divf %171, %172 : vector<4x96xf32>
    %174 = vector.extract_strided_slice %167 {offsets = [0, 96], sizes = [4, 32], strides = [1, 1]} : vector<4x128xf32> to vector<4x32xf32>
    %175 = math.tanh %174 : vector<4x32xf32>
    %176 = vector.extract_strided_slice %130 {offsets = [0, 32], sizes = [4, 32], strides = [1, 1]} : vector<4x64xf32> to vector<4x32xf32>
    %177 = vector.extract_strided_slice %173 {offsets = [0, 32], sizes = [4, 32], strides = [1, 1]} : vector<4x96xf32> to vector<4x32xf32>
    %178 = arith.mulf %177, %176 : vector<4x32xf32>
    %179 = vector.extract_strided_slice %173 {offsets = [0, 0], sizes = [4, 32], strides = [1, 1]} : vector<4x96xf32> to vector<4x32xf32>
    %180 = arith.mulf %179, %175 : vector<4x32xf32>
    %181 = arith.addf %178, %180 : vector<4x32xf32>
    %182 = vector.extract_strided_slice %173 {offsets = [0, 64], sizes = [4, 32], strides = [1, 1]} : vector<4x96xf32> to vector<4x32xf32>
    %183 = math.tanh %181 : vector<4x32xf32>
    %184 = arith.mulf %182, %183 : vector<4x32xf32>
    %c0_59 = arith.constant 0 : index
    %c0_60 = arith.constant 0 : index
    %185 = vector.load %arg6[%c0_59, %c0_60] : memref<4x64xf32, #tpu.memory_space<vmem>>, vector<4x32xf32>
    tpu.vector_store %arg6[%c0_59, %c0_60], %184 {strides = array<i32>} : memref<4x64xf32, #tpu.memory_space<vmem>>, vector<4x32xf32>,
    %c0_61 = arith.constant 0 : index
    %c32_62 = arith.constant 32 : index
    %186 = vector.load %arg6[%c0_61, %c32_62] : memref<4x64xf32, #tpu.memory_space<vmem>>, vector<4x32xf32>
    tpu.vector_store %arg6[%c0_61, %c32_62], %181 {strides = array<i32>} : memref<4x64xf32, #tpu.memory_space<vmem>>, vector<4x32xf32>,
    %c0_63 = arith.constant 0 : index
    %c0_64 = arith.constant 0 : index
    %187 = vector.load %arg6[%c0_63, %c0_64] : memref<4x64xf32, #tpu.memory_space<vmem>>, vector<4x64xf32>
    %cst_65 = arith.constant dense<0.000000e+00> : vector<4x160xf32>
    %188 = tpu.matmul %187, %1, %cst_65 {dimension_numbers = #tpu.dot_dimension_numbers<[1], [0], [0], [1], [0, 0, 1, 1], [], []>} : vector<4x64xf32>, vector<64x160xf32>, vector<4x160xf32> -> vector<4x160xf32>
    %189 = vector.extract_strided_slice %188 {offsets = [0, 0], sizes = [4, 128], strides = [1, 1]} : vector<4x160xf32> to vector<4x128xf32>
    %190 = vector.extract_strided_slice %188 {offsets = [0, 128], sizes = [4, 32], strides = [1, 1]} : vector<4x160xf32> to vector<4x32xf32>
    %191 = vector.shape_cast %190 : vector<4x32xf32> to vector<4x1x32xf32>
    %192 = vector.broadcast %191 : vector<4x1x32xf32> to vector<4x7x32xf32>
    %193 = arith.addf %13, %192 : vector<4x7x32xf32>
    %194 = math.tanh %193 : vector<4x7x32xf32>
    %195 = vector.shape_cast %4 : vector<1x32xf32> to vector<1x1x32xf32>
    %196 = vector.broadcast %195 : vector<1x1x32xf32> to vector<4x7x32xf32>
    %197 = arith.mulf %194, %196 : vector<4x7x32xf32>
    %cst_66 = arith.constant dense<0.000000e+00> : vector<4x7xf32>
    %198 = vector.multi_reduction <add>, %197, %cst_66 [2] : vector<4x7x32xf32> to vector<4x7xf32>
    %199 = vector.shape_cast %198 : vector<4x7xf32> to vector<4x7x1xf32>
    %cst_67 = arith.constant dense<0xFF800000> : vector<4x1xf32>
    %200 = vector.multi_reduction <maximumf>, %199, %cst_67 [1] : vector<4x7x1xf32> to vector<4x1xf32>
    %201 = vector.shape_cast %200 : vector<4x1xf32> to vector<4x1x1xf32>
    %202 = vector.broadcast %201 : vector<4x1x1xf32> to vector<4x7x1xf32>
    %203 = arith.subf %199, %202 : vector<4x7x1xf32>
    %204 = math.exp %203 : vector<4x7x1xf32>
    %cst_68 = arith.constant dense<0.000000e+00> : vector<4x1xf32>
    %205 = vector.multi_reduction <add>, %204, %cst_68 [1] : vector<4x7x1xf32> to vector<4x1xf32>
    %206 = vector.shape_cast %205 : vector<4x1xf32> to vector<4x1x1xf32>
    %207 = vector.broadcast %206 : vector<4x1x1xf32> to vector<4x7x1xf32>
    %208 = arith.divf %204, %207 : vector<4x7x1xf32>
    %209 = vector.broadcast %208 : vector<4x7x1xf32> to vector<4x7x32xf32>
    %210 = arith.mulf %209, %0 : vector<4x7x32xf32>
    %cst_69 = arith.constant dense<0.000000e+00> : vector<4x32xf32>
    %211 = vector.multi_reduction <add>, %210, %cst_69 [1] : vector<4x7x32xf32> to vector<4x32xf32>
    %212 = vector.broadcast %7 : vector<1x32xf32> to vector<4x32xf32>
    %213 = arith.mulf %211, %212 : vector<4x32xf32>
    %cst_70 = arith.constant dense<0.000000e+00> : vector<4xf32>
    %214 = vector.multi_reduction <add>, %213, %cst_70 [1] : vector<4x32xf32> to vector<4xf32>
    %215 = vector.shape_cast %214 : vector<4xf32> to vector<4x1xf32>
    %c3_71 = arith.constant 3 : index
    %c0_72 = arith.constant 0 : index
    %c0_73 = arith.constant 0 : index
    %216 = vector.load %arg1[%c3_71, %c0_72, %c0_73] : memref<7x4x1xf32, #tpu.memory_space<vmem>>, vector<1x4x1xf32>
    %217 = vector.shape_cast %216 : vector<1x4x1xf32> to vector<4x1xf32>
    %218 = arith.addf %215, %217 : vector<4x1xf32>
    %219 = vector.broadcast %218 : vector<4x1xf32> to vector<4x128xf32>
    %220 = vector.broadcast %5 : vector<1x128xf32> to vector<4x128xf32>
    %221 = arith.mulf %219, %220 : vector<4x128xf32>
    %222 = arith.addf %221, %189 : vector<4x128xf32>
    %223 = vector.broadcast %6 : vector<1x128xf32> to vector<4x128xf32>
    %224 = arith.addf %222, %223 : vector<4x128xf32>
    %225 = vector.extract_strided_slice %224 {offsets = [0, 0], sizes = [4, 96], strides = [1, 1]} : vector<4x128xf32> to vector<4x96xf32>
    %226 = arith.negf %225 : vector<4x96xf32>
    %227 = math.exp %226 : vector<4x96xf32>
    %cst_74 = arith.constant 1.000000e+00 : f32
    %228 = vector.broadcast %cst_74 : f32 to vector<4x96xf32>
    %229 = arith.addf %228, %227 : vector<4x96xf32>
    %230 = arith.divf %228, %229 : vector<4x96xf32>
    %231 = vector.extract_strided_slice %224 {offsets = [0, 96], sizes = [4, 32], strides = [1, 1]} : vector<4x128xf32> to vector<4x32xf32>
    %232 = math.tanh %231 : vector<4x32xf32>
    %233 = vector.extract_strided_slice %187 {offsets = [0, 32], sizes = [4, 32], strides = [1, 1]} : vector<4x64xf32> to vector<4x32xf32>
    %234 = vector.extract_strided_slice %230 {offsets = [0, 32], sizes = [4, 32], strides = [1, 1]} : vector<4x96xf32> to vector<4x32xf32>
    %235 = arith.mulf %234, %233 : vector<4x32xf32>
    %236 = vector.extract_strided_slice %230 {offsets = [0, 0], sizes = [4, 32], strides = [1, 1]} : vector<4x96xf32> to vector<4x32xf32>
    %237 = arith.mulf %236, %232 : vector<4x32xf32>
    %238 = arith.addf %235, %237 : vector<4x32xf32>
    %239 = vector.extract_strided_slice %230 {offsets = [0, 64], sizes = [4, 32], strides = [1, 1]} : vector<4x96xf32> to vector<4x32xf32>
    %240 = math.tanh %238 : vector<4x32xf32>
    %241 = arith.mulf %239, %240 : vector<4x32xf32>
    %c0_75 = arith.constant 0 : index
    %c0_76 = arith.constant 0 : index
    %242 = vector.load %arg6[%c0_75, %c0_76] : memref<4x64xf32, #tpu.memory_space<vmem>>, vector<4x32xf32>
    tpu.vector_store %arg6[%c0_75, %c0_76], %241 {strides = array<i32>} : memref<4x64xf32, #tpu.memory_space<vmem>>, vector<4x32xf32>,
    %c0_77 = arith.constant 0 : index
    %c32_78 = arith.constant 32 : index
    %243 = vector.load %arg6[%c0_77, %c32_78] : memref<4x64xf32, #tpu.memory_space<vmem>>, vector<4x32xf32>
    tpu.vector_store %arg6[%c0_77, %c32_78], %238 {strides = array<i32>} : memref<4x64xf32, #tpu.memory_space<vmem>>, vector<4x32xf32>,
    %c0_79 = arith.constant 0 : index
    %c0_80 = arith.constant 0 : index
    %244 = vector.load %arg6[%c0_79, %c0_80] : memref<4x64xf32, #tpu.memory_space<vmem>>, vector<4x64xf32>
    %cst_81 = arith.constant dense<0.000000e+00> : vector<4x160xf32>
    %245 = tpu.matmul %244, %1, %cst_81 {dimension_numbers = #tpu.dot_dimension_numbers<[1], [0], [0], [1], [0, 0, 1, 1], [], []>} : vector<4x64xf32>, vector<64x160xf32>, vector<4x160xf32> -> vector<4x160xf32>
    %246 = vector.extract_strided_slice %245 {offsets = [0, 0], sizes = [4, 128], strides = [1, 1]} : vector<4x160xf32> to vector<4x128xf32>
    %247 = vector.extract_strided_slice %245 {offsets = [0, 128], sizes = [4, 32], strides = [1, 1]} : vector<4x160xf32> to vector<4x32xf32>
    %248 = vector.shape_cast %247 : vector<4x32xf32> to vector<4x1x32xf32>
    %249 = vector.broadcast %248 : vector<4x1x32xf32> to vector<4x7x32xf32>
    %250 = arith.addf %13, %249 : vector<4x7x32xf32>
    %251 = math.tanh %250 : vector<4x7x32xf32>
    %252 = vector.shape_cast %4 : vector<1x32xf32> to vector<1x1x32xf32>
    %253 = vector.broadcast %252 : vector<1x1x32xf32> to vector<4x7x32xf32>
    %254 = arith.mulf %251, %253 : vector<4x7x32xf32>
    %cst_82 = arith.constant dense<0.000000e+00> : vector<4x7xf32>
    %255 = vector.multi_reduction <add>, %254, %cst_82 [2] : vector<4x7x32xf32> to vector<4x7xf32>
    %256 = vector.shape_cast %255 : vector<4x7xf32> to vector<4x7x1xf32>
    %cst_83 = arith.constant dense<0xFF800000> : vector<4x1xf32>
    %257 = vector.multi_reduction <maximumf>, %256, %cst_83 [1] : vector<4x7x1xf32> to vector<4x1xf32>
    %258 = vector.shape_cast %257 : vector<4x1xf32> to vector<4x1x1xf32>
    %259 = vector.broadcast %258 : vector<4x1x1xf32> to vector<4x7x1xf32>
    %260 = arith.subf %256, %259 : vector<4x7x1xf32>
    %261 = math.exp %260 : vector<4x7x1xf32>
    %cst_84 = arith.constant dense<0.000000e+00> : vector<4x1xf32>
    %262 = vector.multi_reduction <add>, %261, %cst_84 [1] : vector<4x7x1xf32> to vector<4x1xf32>
    %263 = vector.shape_cast %262 : vector<4x1xf32> to vector<4x1x1xf32>
    %264 = vector.broadcast %263 : vector<4x1x1xf32> to vector<4x7x1xf32>
    %265 = arith.divf %261, %264 : vector<4x7x1xf32>
    %266 = vector.broadcast %265 : vector<4x7x1xf32> to vector<4x7x32xf32>
    %267 = arith.mulf %266, %0 : vector<4x7x32xf32>
    %cst_85 = arith.constant dense<0.000000e+00> : vector<4x32xf32>
    %268 = vector.multi_reduction <add>, %267, %cst_85 [1] : vector<4x7x32xf32> to vector<4x32xf32>
    %269 = vector.broadcast %7 : vector<1x32xf32> to vector<4x32xf32>
    %270 = arith.mulf %268, %269 : vector<4x32xf32>
    %cst_86 = arith.constant dense<0.000000e+00> : vector<4xf32>
    %271 = vector.multi_reduction <add>, %270, %cst_86 [1] : vector<4x32xf32> to vector<4xf32>
    %272 = vector.shape_cast %271 : vector<4xf32> to vector<4x1xf32>
    %c4_87 = arith.constant 4 : index
    %c0_88 = arith.constant 0 : index
    %c0_89 = arith.constant 0 : index
    %273 = vector.load %arg1[%c4_87, %c0_88, %c0_89] : memref<7x4x1xf32, #tpu.memory_space<vmem>>, vector<1x4x1xf32>
    %274 = vector.shape_cast %273 : vector<1x4x1xf32> to vector<4x1xf32>
    %275 = arith.addf %272, %274 : vector<4x1xf32>
    %276 = vector.broadcast %275 : vector<4x1xf32> to vector<4x128xf32>
    %277 = vector.broadcast %5 : vector<1x128xf32> to vector<4x128xf32>
    %278 = arith.mulf %276, %277 : vector<4x128xf32>
    %279 = arith.addf %278, %246 : vector<4x128xf32>
    %280 = vector.broadcast %6 : vector<1x128xf32> to vector<4x128xf32>
    %281 = arith.addf %279, %280 : vector<4x128xf32>
    %282 = vector.extract_strided_slice %281 {offsets = [0, 0], sizes = [4, 96], strides = [1, 1]} : vector<4x128xf32> to vector<4x96xf32>
    %283 = arith.negf %282 : vector<4x96xf32>
    %284 = math.exp %283 : vector<4x96xf32>
    %cst_90 = arith.constant 1.000000e+00 : f32
    %285 = vector.broadcast %cst_90 : f32 to vector<4x96xf32>
    %286 = arith.addf %285, %284 : vector<4x96xf32>
    %287 = arith.divf %285, %286 : vector<4x96xf32>
    %288 = vector.extract_strided_slice %281 {offsets = [0, 96], sizes = [4, 32], strides = [1, 1]} : vector<4x128xf32> to vector<4x32xf32>
    %289 = math.tanh %288 : vector<4x32xf32>
    %290 = vector.extract_strided_slice %244 {offsets = [0, 32], sizes = [4, 32], strides = [1, 1]} : vector<4x64xf32> to vector<4x32xf32>
    %291 = vector.extract_strided_slice %287 {offsets = [0, 32], sizes = [4, 32], strides = [1, 1]} : vector<4x96xf32> to vector<4x32xf32>
    %292 = arith.mulf %291, %290 : vector<4x32xf32>
    %293 = vector.extract_strided_slice %287 {offsets = [0, 0], sizes = [4, 32], strides = [1, 1]} : vector<4x96xf32> to vector<4x32xf32>
    %294 = arith.mulf %293, %289 : vector<4x32xf32>
    %295 = arith.addf %292, %294 : vector<4x32xf32>
    %296 = vector.extract_strided_slice %287 {offsets = [0, 64], sizes = [4, 32], strides = [1, 1]} : vector<4x96xf32> to vector<4x32xf32>
    %297 = math.tanh %295 : vector<4x32xf32>
    %298 = arith.mulf %296, %297 : vector<4x32xf32>
    %c0_91 = arith.constant 0 : index
    %c0_92 = arith.constant 0 : index
    %299 = vector.load %arg6[%c0_91, %c0_92] : memref<4x64xf32, #tpu.memory_space<vmem>>, vector<4x32xf32>
    tpu.vector_store %arg6[%c0_91, %c0_92], %298 {strides = array<i32>} : memref<4x64xf32, #tpu.memory_space<vmem>>, vector<4x32xf32>,
    %c0_93 = arith.constant 0 : index
    %c32_94 = arith.constant 32 : index
    %300 = vector.load %arg6[%c0_93, %c32_94] : memref<4x64xf32, #tpu.memory_space<vmem>>, vector<4x32xf32>
    tpu.vector_store %arg6[%c0_93, %c32_94], %295 {strides = array<i32>} : memref<4x64xf32, #tpu.memory_space<vmem>>, vector<4x32xf32>,
    %c0_95 = arith.constant 0 : index
    %c0_96 = arith.constant 0 : index
    %301 = vector.load %arg6[%c0_95, %c0_96] : memref<4x64xf32, #tpu.memory_space<vmem>>, vector<4x64xf32>
    %cst_97 = arith.constant dense<0.000000e+00> : vector<4x160xf32>
    %302 = tpu.matmul %301, %1, %cst_97 {dimension_numbers = #tpu.dot_dimension_numbers<[1], [0], [0], [1], [0, 0, 1, 1], [], []>} : vector<4x64xf32>, vector<64x160xf32>, vector<4x160xf32> -> vector<4x160xf32>
    %303 = vector.extract_strided_slice %302 {offsets = [0, 0], sizes = [4, 128], strides = [1, 1]} : vector<4x160xf32> to vector<4x128xf32>
    %304 = vector.extract_strided_slice %302 {offsets = [0, 128], sizes = [4, 32], strides = [1, 1]} : vector<4x160xf32> to vector<4x32xf32>
    %305 = vector.shape_cast %304 : vector<4x32xf32> to vector<4x1x32xf32>
    %306 = vector.broadcast %305 : vector<4x1x32xf32> to vector<4x7x32xf32>
    %307 = arith.addf %13, %306 : vector<4x7x32xf32>
    %308 = math.tanh %307 : vector<4x7x32xf32>
    %309 = vector.shape_cast %4 : vector<1x32xf32> to vector<1x1x32xf32>
    %310 = vector.broadcast %309 : vector<1x1x32xf32> to vector<4x7x32xf32>
    %311 = arith.mulf %308, %310 : vector<4x7x32xf32>
    %cst_98 = arith.constant dense<0.000000e+00> : vector<4x7xf32>
    %312 = vector.multi_reduction <add>, %311, %cst_98 [2] : vector<4x7x32xf32> to vector<4x7xf32>
    %313 = vector.shape_cast %312 : vector<4x7xf32> to vector<4x7x1xf32>
    %cst_99 = arith.constant dense<0xFF800000> : vector<4x1xf32>
    %314 = vector.multi_reduction <maximumf>, %313, %cst_99 [1] : vector<4x7x1xf32> to vector<4x1xf32>
    %315 = vector.shape_cast %314 : vector<4x1xf32> to vector<4x1x1xf32>
    %316 = vector.broadcast %315 : vector<4x1x1xf32> to vector<4x7x1xf32>
    %317 = arith.subf %313, %316 : vector<4x7x1xf32>
    %318 = math.exp %317 : vector<4x7x1xf32>
    %cst_100 = arith.constant dense<0.000000e+00> : vector<4x1xf32>
    %319 = vector.multi_reduction <add>, %318, %cst_100 [1] : vector<4x7x1xf32> to vector<4x1xf32>
    %320 = vector.shape_cast %319 : vector<4x1xf32> to vector<4x1x1xf32>
    %321 = vector.broadcast %320 : vector<4x1x1xf32> to vector<4x7x1xf32>
    %322 = arith.divf %318, %321 : vector<4x7x1xf32>
    %323 = vector.broadcast %322 : vector<4x7x1xf32> to vector<4x7x32xf32>
    %324 = arith.mulf %323, %0 : vector<4x7x32xf32>
    %cst_101 = arith.constant dense<0.000000e+00> : vector<4x32xf32>
    %325 = vector.multi_reduction <add>, %324, %cst_101 [1] : vector<4x7x32xf32> to vector<4x32xf32>
    %326 = vector.broadcast %7 : vector<1x32xf32> to vector<4x32xf32>
    %327 = arith.mulf %325, %326 : vector<4x32xf32>
    %cst_102 = arith.constant dense<0.000000e+00> : vector<4xf32>
    %328 = vector.multi_reduction <add>, %327, %cst_102 [1] : vector<4x32xf32> to vector<4xf32>
    %329 = vector.shape_cast %328 : vector<4xf32> to vector<4x1xf32>
    %c5_103 = arith.constant 5 : index
    %c0_104 = arith.constant 0 : index
    %c0_105 = arith.constant 0 : index
    %330 = vector.load %arg1[%c5_103, %c0_104, %c0_105] : memref<7x4x1xf32, #tpu.memory_space<vmem>>, vector<1x4x1xf32>
    %331 = vector.shape_cast %330 : vector<1x4x1xf32> to vector<4x1xf32>
    %332 = arith.addf %329, %331 : vector<4x1xf32>
    %333 = vector.broadcast %332 : vector<4x1xf32> to vector<4x128xf32>
    %334 = vector.broadcast %5 : vector<1x128xf32> to vector<4x128xf32>
    %335 = arith.mulf %333, %334 : vector<4x128xf32>
    %336 = arith.addf %335, %303 : vector<4x128xf32>
    %337 = vector.broadcast %6 : vector<1x128xf32> to vector<4x128xf32>
    %338 = arith.addf %336, %337 : vector<4x128xf32>
    %339 = vector.extract_strided_slice %338 {offsets = [0, 0], sizes = [4, 96], strides = [1, 1]} : vector<4x128xf32> to vector<4x96xf32>
    %340 = arith.negf %339 : vector<4x96xf32>
    %341 = math.exp %340 : vector<4x96xf32>
    %cst_106 = arith.constant 1.000000e+00 : f32
    %342 = vector.broadcast %cst_106 : f32 to vector<4x96xf32>
    %343 = arith.addf %342, %341 : vector<4x96xf32>
    %344 = arith.divf %342, %343 : vector<4x96xf32>
    %345 = vector.extract_strided_slice %338 {offsets = [0, 96], sizes = [4, 32], strides = [1, 1]} : vector<4x128xf32> to vector<4x32xf32>
    %346 = math.tanh %345 : vector<4x32xf32>
    %347 = vector.extract_strided_slice %301 {offsets = [0, 32], sizes = [4, 32], strides = [1, 1]} : vector<4x64xf32> to vector<4x32xf32>
    %348 = vector.extract_strided_slice %344 {offsets = [0, 32], sizes = [4, 32], strides = [1, 1]} : vector<4x96xf32> to vector<4x32xf32>
    %349 = arith.mulf %348, %347 : vector<4x32xf32>
    %350 = vector.extract_strided_slice %344 {offsets = [0, 0], sizes = [4, 32], strides = [1, 1]} : vector<4x96xf32> to vector<4x32xf32>
    %351 = arith.mulf %350, %346 : vector<4x32xf32>
    %352 = arith.addf %349, %351 : vector<4x32xf32>
    %353 = vector.extract_strided_slice %344 {offsets = [0, 64], sizes = [4, 32], strides = [1, 1]} : vector<4x96xf32> to vector<4x32xf32>
    %354 = math.tanh %352 : vector<4x32xf32>
    %355 = arith.mulf %353, %354 : vector<4x32xf32>
    %c0_107 = arith.constant 0 : index
    %c0_108 = arith.constant 0 : index
    %356 = vector.load %arg6[%c0_107, %c0_108] : memref<4x64xf32, #tpu.memory_space<vmem>>, vector<4x32xf32>
    tpu.vector_store %arg6[%c0_107, %c0_108], %355 {strides = array<i32>} : memref<4x64xf32, #tpu.memory_space<vmem>>, vector<4x32xf32>,
    %c0_109 = arith.constant 0 : index
    %c32_110 = arith.constant 32 : index
    %357 = vector.load %arg6[%c0_109, %c32_110] : memref<4x64xf32, #tpu.memory_space<vmem>>, vector<4x32xf32>
    tpu.vector_store %arg6[%c0_109, %c32_110], %352 {strides = array<i32>} : memref<4x64xf32, #tpu.memory_space<vmem>>, vector<4x32xf32>,
    %c0_111 = arith.constant 0 : index
    %c0_112 = arith.constant 0 : index
    %358 = vector.load %arg6[%c0_111, %c0_112] : memref<4x64xf32, #tpu.memory_space<vmem>>, vector<4x64xf32>
    %cst_113 = arith.constant dense<0.000000e+00> : vector<4x160xf32>
    %359 = tpu.matmul %358, %1, %cst_113 {dimension_numbers = #tpu.dot_dimension_numbers<[1], [0], [0], [1], [0, 0, 1, 1], [], []>} : vector<4x64xf32>, vector<64x160xf32>, vector<4x160xf32> -> vector<4x160xf32>
    %360 = vector.extract_strided_slice %359 {offsets = [0, 0], sizes = [4, 128], strides = [1, 1]} : vector<4x160xf32> to vector<4x128xf32>
    %361 = vector.extract_strided_slice %359 {offsets = [0, 128], sizes = [4, 32], strides = [1, 1]} : vector<4x160xf32> to vector<4x32xf32>
    %362 = vector.shape_cast %361 : vector<4x32xf32> to vector<4x1x32xf32>
    %363 = vector.broadcast %362 : vector<4x1x32xf32> to vector<4x7x32xf32>
    %364 = arith.addf %13, %363 : vector<4x7x32xf32>
    %365 = math.tanh %364 : vector<4x7x32xf32>
    %366 = vector.shape_cast %4 : vector<1x32xf32> to vector<1x1x32xf32>
    %367 = vector.broadcast %366 : vector<1x1x32xf32> to vector<4x7x32xf32>
    %368 = arith.mulf %365, %367 : vector<4x7x32xf32>
    %cst_114 = arith.constant dense<0.000000e+00> : vector<4x7xf32>
    %369 = vector.multi_reduction <add>, %368, %cst_114 [2] : vector<4x7x32xf32> to vector<4x7xf32>
    %370 = vector.shape_cast %369 : vector<4x7xf32> to vector<4x7x1xf32>
    %cst_115 = arith.constant dense<0xFF800000> : vector<4x1xf32>
    %371 = vector.multi_reduction <maximumf>, %370, %cst_115 [1] : vector<4x7x1xf32> to vector<4x1xf32>
    %372 = vector.shape_cast %371 : vector<4x1xf32> to vector<4x1x1xf32>
    %373 = vector.broadcast %372 : vector<4x1x1xf32> to vector<4x7x1xf32>
    %374 = arith.subf %370, %373 : vector<4x7x1xf32>
    %375 = math.exp %374 : vector<4x7x1xf32>
    %cst_116 = arith.constant dense<0.000000e+00> : vector<4x1xf32>
    %376 = vector.multi_reduction <add>, %375, %cst_116 [1] : vector<4x7x1xf32> to vector<4x1xf32>
    %377 = vector.shape_cast %376 : vector<4x1xf32> to vector<4x1x1xf32>
    %378 = vector.broadcast %377 : vector<4x1x1xf32> to vector<4x7x1xf32>
    %379 = arith.divf %375, %378 : vector<4x7x1xf32>
    %380 = vector.broadcast %379 : vector<4x7x1xf32> to vector<4x7x32xf32>
    %381 = arith.mulf %380, %0 : vector<4x7x32xf32>
    %cst_117 = arith.constant dense<0.000000e+00> : vector<4x32xf32>
    %382 = vector.multi_reduction <add>, %381, %cst_117 [1] : vector<4x7x32xf32> to vector<4x32xf32>
    %383 = vector.broadcast %7 : vector<1x32xf32> to vector<4x32xf32>
    %384 = arith.mulf %382, %383 : vector<4x32xf32>
    %cst_118 = arith.constant dense<0.000000e+00> : vector<4xf32>
    %385 = vector.multi_reduction <add>, %384, %cst_118 [1] : vector<4x32xf32> to vector<4xf32>
    %386 = vector.shape_cast %385 : vector<4xf32> to vector<4x1xf32>
    %c6_119 = arith.constant 6 : index
    %c0_120 = arith.constant 0 : index
    %c0_121 = arith.constant 0 : index
    %387 = vector.load %arg1[%c6_119, %c0_120, %c0_121] : memref<7x4x1xf32, #tpu.memory_space<vmem>>, vector<1x4x1xf32>
    %388 = vector.shape_cast %387 : vector<1x4x1xf32> to vector<4x1xf32>
    %389 = arith.addf %386, %388 : vector<4x1xf32>
    %390 = vector.broadcast %389 : vector<4x1xf32> to vector<4x128xf32>
    %391 = vector.broadcast %5 : vector<1x128xf32> to vector<4x128xf32>
    %392 = arith.mulf %390, %391 : vector<4x128xf32>
    %393 = arith.addf %392, %360 : vector<4x128xf32>
    %394 = vector.broadcast %6 : vector<1x128xf32> to vector<4x128xf32>
    %395 = arith.addf %393, %394 : vector<4x128xf32>
    %396 = vector.extract_strided_slice %395 {offsets = [0, 0], sizes = [4, 96], strides = [1, 1]} : vector<4x128xf32> to vector<4x96xf32>
    %397 = arith.negf %396 : vector<4x96xf32>
    %398 = math.exp %397 : vector<4x96xf32>
    %cst_122 = arith.constant 1.000000e+00 : f32
    %399 = vector.broadcast %cst_122 : f32 to vector<4x96xf32>
    %400 = arith.addf %399, %398 : vector<4x96xf32>
    %401 = arith.divf %399, %400 : vector<4x96xf32>
    %402 = vector.extract_strided_slice %395 {offsets = [0, 96], sizes = [4, 32], strides = [1, 1]} : vector<4x128xf32> to vector<4x32xf32>
    %403 = math.tanh %402 : vector<4x32xf32>
    %404 = vector.extract_strided_slice %358 {offsets = [0, 32], sizes = [4, 32], strides = [1, 1]} : vector<4x64xf32> to vector<4x32xf32>
    %405 = vector.extract_strided_slice %401 {offsets = [0, 32], sizes = [4, 32], strides = [1, 1]} : vector<4x96xf32> to vector<4x32xf32>
    %406 = arith.mulf %405, %404 : vector<4x32xf32>
    %407 = vector.extract_strided_slice %401 {offsets = [0, 0], sizes = [4, 32], strides = [1, 1]} : vector<4x96xf32> to vector<4x32xf32>
    %408 = arith.mulf %407, %403 : vector<4x32xf32>
    %409 = arith.addf %406, %408 : vector<4x32xf32>
    %410 = vector.extract_strided_slice %401 {offsets = [0, 64], sizes = [4, 32], strides = [1, 1]} : vector<4x96xf32> to vector<4x32xf32>
    %411 = math.tanh %409 : vector<4x32xf32>
    %412 = arith.mulf %410, %411 : vector<4x32xf32>
    %c0_123 = arith.constant 0 : index
    %c0_124 = arith.constant 0 : index
    %413 = vector.load %arg6[%c0_123, %c0_124] : memref<4x64xf32, #tpu.memory_space<vmem>>, vector<4x32xf32>
    tpu.vector_store %arg6[%c0_123, %c0_124], %412 {strides = array<i32>} : memref<4x64xf32, #tpu.memory_space<vmem>>, vector<4x32xf32>,
    %c0_125 = arith.constant 0 : index
    %c32_126 = arith.constant 32 : index
    %414 = vector.load %arg6[%c0_125, %c32_126] : memref<4x64xf32, #tpu.memory_space<vmem>>, vector<4x32xf32>
    tpu.vector_store %arg6[%c0_125, %c32_126], %409 {strides = array<i32>} : memref<4x64xf32, #tpu.memory_space<vmem>>, vector<4x32xf32>,
    %c0_127 = arith.constant 0 : index
    %c0_128 = arith.constant 0 : index
    %415 = vector.load %arg6[%c0_127, %c0_128] : memref<4x64xf32, #tpu.memory_space<vmem>>, vector<4x32xf32>
    %416 = vector.broadcast %8 : vector<1x32xf32> to vector<4x32xf32>
    %417 = arith.mulf %415, %416 : vector<4x32xf32>
    %cst_129 = arith.constant dense<0.000000e+00> : vector<4xf32>
    %418 = vector.multi_reduction <add>, %417, %cst_129 [1] : vector<4x32xf32> to vector<4xf32>
    %419 = vector.shape_cast %418 : vector<4xf32> to vector<4x1xf32>
    %420 = vector.broadcast %9 : vector<1x32xf32> to vector<4x32xf32>
    %421 = arith.mulf %382, %420 : vector<4x32xf32>
    %cst_130 = arith.constant dense<0.000000e+00> : vector<4xf32>
    %422 = vector.multi_reduction <add>, %421, %cst_130 [1] : vector<4x32xf32> to vector<4xf32>
    %423 = vector.shape_cast %422 : vector<4xf32> to vector<4x1xf32>
    %424 = arith.addf %419, %423 : vector<4x1xf32>
    %c0_131 = arith.constant 0 : index
    %c0_132 = arith.constant 0 : index
    %425 = memref.load %arg4[%c0_131, %c0_132] : memref<1x1xf32, #tpu.memory_space<smem>>
    %426 = vector.broadcast %425 : f32 to vector<4x1xf32>
    %427 = arith.addf %424, %426 : vector<4x1xf32>
    %c0_133 = arith.constant 0 : index
    %c0_134 = arith.constant 0 : index
    %428 = vector.load %arg5[%c0_133, %c0_134] : memref<4x1xf32, #tpu.memory_space<vmem>>, vector<4x1xf32>
    tpu.vector_store %arg5[%c0_133, %c0_134], %427 {strides = array<i32>} : memref<4x1xf32, #tpu.memory_space<vmem>>, vector<4x1xf32>,
    return
  }
}

</mosaic_0001>

<bundles_post_ra>
// kernel: tpu_custom_call.1
= control target key start
LH: loop header
LB: loop body
LE: loop exit
PB: predicated region body
PF: predicated region fallthrough
CT: control target
= control target key end

     0   :  { %vm888_vm0 = vcmask 519168   ;;  %v9395_v3 = vmov 0.0   ;;  %v7456_v4 = vmov 1966171168   ;;  %v64_v6 = vlaneseq  ;;  %s7458_s11 = smov 32   ;;  %s7459_s12 = smov 64   ;;  %s9389_s2 = inlined_call_operand.vmem [shape: f32[96,160], index: 2, kind: input, shape index: {}]   ;;  %s9390_s0 = inlined_call_operand.vmem [shape: f32[4,7,32], index: 0, kind: input, shape index: {}]   ;;  %s9391_s3 = inlined_call_operand.vmem [shape: f32[8,128], index: 3, kind: input, shape index: {}]   ;;  %s9392_s1 = inlined_call_operand.vmem [shape: f32[7,4,1], index: 1, kind: input, shape index: {}]   ;;  %s9393_s4 = inlined_call_operand.<no memory space> [shape: f32[1,1], index: 4, kind: input, shape index: {}]   ;;  %s9394_s5 = inlined_call_operand.vmem [shape: f32[4,1], index: 5, kind: output, shape index: {}]  }
   0x1   :  { %v7493_v0 = vld [vmem:[%s9389_s2 + $0x78] sm:$0xff]  ;;  %v7498_v1 = vld [vmem:[%s9389_s2 + $0x70] sm:$0xff]  ;;  %v7503_v2 = vld [vmem:[%s9389_s2 + $0x68] sm:$0xff]  ;;  %889 = vst.msk [vmem:[#allocation2] sm:$0xf] %vm888_vm0, %v9395_v3  ;;  %959 = vmatprep.mubr.f32.mxu1 %v9395_v3  ;;  %v62_v5 = vunpack.c.l.s4 %v7456_v4  ;;  %vm891_vm1 = vcmask 523264  }
   0x2   :  { %911 = vmatprep.subr.mxu1 %v7493_v0  ;;  %v7511_v7 = vld [vmem:[%s9389_s2 + $0x60] sm:$0xff]  ;;  %v7517_v8 = vld [vmem:[%s9389_s2 + $0x58] sm:$0xff]  ;;  %v7519_v10 = vshrl.u32 %v64_v6, 7  ;;  %v7525_v11 = vld [vmem:[%s9389_s2 + $0x50] sm:$0xff]  ;;  %vm591_vm2 = vcmask 261120   ;;  %vm1595_vm3 = vcmask 260096  }
   0x3   :  { %912 = vmatpush1.msra.mxu1 %v7498_v1  ;;  %v63_v9 = vunpack.c.0.s8 %v62_v5  ;;  %v7531_v12 = vld [vmem:[%s9389_s2 + $0x48] sm:$0xff]  ;;  %v7540_v14 = vld [vmem:[%s9389_s2 + $0x40] sm:$0xff]  ;;  %v44_v15 = vld [vmem:[%s9389_s2 + $0xb0] sm:$0xff]  ;;  %vm1608_vm4 = vcmask 1046528   ;;  %vm1730_vm5 = vcmask 1041409   ;;  %vm1733_vm6 = vcmask 1042434  }
   0x4   :  { %913 = vmatprep.subr.mxu1 %v7503_v2  ;;  %v43_v16 = vld [vmem:[%s9389_s2 + $0xa0] sm:$0xff]  ;;  %v7552_v17 = vld [vmem:[%s9389_s2 + $0x38] sm:$0xff]  ;;  %v7557_v18 = vld [vmem:[%s9389_s2 + $0x30] sm:$0xff]  ;;  %6813 = vmatprep.subr.mxu0 %v44_v15  ;;  %vm1736_vm7 = vcmask 1043459   ;;  %vm1739_vm8 = vcmask 257024   ;;  %vm1790_vm9 = vcmask 519424  }
   0x5   :  { %914 = vmatpush1.msra.mxu1 %v7511_v7  ;;  %v7534_v13 = vsub.s32 %v63_v9, %v7519_v10  ;;  %v21_v19 = vld [vmem:[%s9390_s0] sm:$0x7f]  ;;  %6814 = vmatpush3.msra.mxu0 %v44_v15  ;;  %v42_v20 = vld [vmem:[%s9389_s2 + $0x90] sm:$0xff]  ;;  %v22_v21 = vld [vmem:[%s9390_s0 + $0x8] sm:$0x7f]  ;;  %vm6765_vm10 = vcmask 3072  }
   0x6   :  { %915 = vmatprep.subr.mxu1 %v7517_v8  ;;  %v60_v22 = vcombine.high %v21_v19, %v21_v19  ;;  %v7573_v24 = vld [vmem:[%s9390_s0 + $0x10] sm:$0x7f]  ;;  %v7579_v25 = vld [vmem:[%s9389_s2 + $0x28] sm:$0xff]  ;;  %6815 = vmatprep.subr.mxu0 %v43_v16  ;;  %v108_v27 = vcombine.high %v22_v21, %v22_v21  ;;  %v7588_v29 = vld [vmem:[%s9389_s2 + $0x20] sm:$0xff] }
   0x7   :  { %916 = vmatpush1.msra.mxu1 %v7525_v11  ;;  %v67_v23 = vrot.slane %v21_v19, %v7534_v13  ;;  %v115_v26 = vrot.slane %v22_v21, %v7534_v13  ;;  %v163_v28 = vrot.slane %v7573_v24, %v7534_v13  ;;  %6816 = vmatpush3.msra.mxu0 %v43_v16  ;;  %v41_v30 = vld [vmem:[%s9389_s2 + $0x80] sm:$0xff]  ;;  %v7599_v34 = vld [vmem:[%s9389_s2 + $0x18] sm:$0xff]  ;;  %v7607_v38 = vld [vmem:[%s9389_s2 + $0x10] sm:$0xff] }
   0x8   :  { %917 = vmatprep.subr.mxu1 %v7531_v12  ;;  %v74_v31 = vrot.slane %v60_v22, %v7534_v13  ;;  %6817 = vmatprep.subr.mxu0 %v42_v20  ;;  %v122_v37 = vrot.slane %v108_v27, %v7534_v13  ;;  %v7615_v42 = vld [vmem:[%s9389_s2 + $0x8] sm:$0xff]  ;;  %v7622_v46 = vld [vmem:[%s9389_s2] sm:$0xff]  ;;  %v24_v63 = vld [vmem:[%s9390_s0 + $0x18] sm:$0x7f] }
   0x9   :  { %918 = vmatpush1.msra.mxu1 %v7540_v14  ;;  %v75_v32 = vcombine.high %v67_v23, %v67_v23  ;;  %v83_v33 = vrot.slane %v67_v23, %v7534_v13  ;;  %v123_v35 = vcombine.high %v115_v26, %v115_v26  ;;  %v131_v36 = vrot.slane %v115_v26, %v7534_v13  ;;  %v890_v50 = vld [vmem:[#allocation2] sm:$0xf] }
   0xa   :  { %919 = vmatprep.subr.mxu1 %v7552_v17  ;;  %6818 = vmatpush3.msra.mxu0 %v42_v20  ;;  %v76_v39 = vcombine.high %v74_v31, %v74_v31  ;;  %v90_v40 = vrot.slane %v74_v31, %v7534_v13  ;;  %v124_v44 = vcombine.high %v122_v37, %v122_v37 }
   0xb   :  { %920 = vmatpush1.msra.mxu1 %v7557_v18  ;;  %v97_v41 = vrot.slane %v75_v32, %v7534_v13  ;;  %6819 = vmatprep.subr.mxu0 %v41_v30  ;;  %v153_v43 = vcombine.high %v131_v36, %v131_v36  ;;  %v138_v45 = vrot.slane %v122_v37, %v7534_v13 }
   0xc   :  { %921 = vmatprep.subr.mxu1 %v7579_v25  ;;  %6820 = vmatpush3.msra.mxu0 %v41_v30  ;;  %v104_v47 = vrot.slane %v76_v39, %v7534_v13  ;;  %v106_v48 = vcombine.high %v90_v40, %v90_v40  ;;  %v145_v52 = vrot.slane %v123_v35, %v7534_v13 }
   0xd   :  { %922 = vmatpush1.msra.mxu1 %v7588_v29  ;;  %v301_v49 = vcombine.low %v83_v33, %v97_v41  ;;  %v6772_v51 = vcombine.high %v83_v33, %v97_v41  ;;  %v152_v53 = vrot.slane %v124_v44, %v7534_v13  ;;  %v154_v54 = vcombine.high %v138_v45, %v138_v45 }
   0xe   :  { %923 = vmatprep.subr.mxu1 %v7599_v34  ;;  %v303_v55 = vcombine.low %v90_v40, %v104_v47  ;;  %v304_v56 = vcombine.low %v106_v48, %v131_v36  ;;  %v171_v58 = vcombine.high %v163_v28, %v163_v28  ;;  %v155_v60 = vcombine.high %v145_v52, %v145_v52 }
   0xf   :  { %924 = vmatpush1.msra.mxu1 %v7607_v38  ;;  %v311_v57 = vrot.slane %v301_v49, %v7534_v13  ;;  %v318_v59 = vrot.slane %v6772_v51, %v7534_v13  ;;  %v179_v61 = vrot.slane %v163_v28, %v7534_v13  ;;  %v350_v62 = vcombine.low %v145_v52, %v153_v43 }
  0x10   :  { %925 = vmatprep.subr.mxu1 %v7615_v42  ;;  %v325_v4 = vrot.slane %v303_v55, %v7534_v13  ;;  %v332_v5 = vrot.slane %v304_v56, %v7534_v13  ;;  %v193_v6 = vrot.slane %v171_v58, %v7534_v13  ;;  %v352_v9 = vcombine.low %v152_v53, %v154_v54 }
  0x11   :  { %926 = vmatpush1.msra.mxu1 %v7622_v46  ;;  %v333_v15 = vcombine.low %v311_v57, %v318_v59  ;;  %v351_v16 = vcombine.low %v155_v60, %v138_v45  ;;  %v360_v19 = vrot.slane %v350_v62, %v7534_v13  ;;  %v156_v20 = vcombine.high %v7573_v24, %v7573_v24 }
  0x12   :  { %6779 = vmatmul.mubr.msk.f32.vlgmr.msra.gmra.mxu1 %vm891_vm1, %v890_v50  ;;  %1812 = vmatprep.subr.mxu0 %v7493_v0  ;;  %v334_v21 = vcombine.low %v325_v4, %v332_v5  ;;  %v353_v22 = vcombine.low %v179_v61, %v193_v6  ;;  %v374_v23 = vrot.slane %v352_v9, %v7534_v13 }
  0x13   :  { %v211_v26 = vrot.slane %v24_v63, %v7534_v13  ;;  %2635 = vmatprep.subr.mxu1 %v7493_v0  ;;  %v341_v27 = vrot.slane %v333_v15, %v7534_v13  ;;  %v367_v28 = vrot.slane %v351_v16, %v7534_v13  ;;  %v170_v30 = vrot.slane %v156_v20, %v7534_v13 }
  0x14   :  { %v6773_v31 = vcombine.high %v179_v61, %v193_v6  ;;  %2636 = vmatpush1.msra.mxu1 %v7498_v1  ;;  %v348_v24 = vrot.slane %v334_v21, %v7534_v13  ;;  %v381_v32 = vrot.slane %v353_v22, %v7534_v13  ;;  %v204_v49 = vcombine.high %v24_v63, %v24_v63 }
  0x15   :  { %v219_v33 = vcombine.high %v211_v26, %v211_v26  ;;  %v227_v35 = vrot.slane %v211_v26, %v7534_v13  ;;  %2637 = vmatprep.subr.mxu1 %v7503_v2  ;;  %v382_v36 = vcombine.low %v360_v19, %v367_v28  ;;  %v172_v37 = vcombine.high %v170_v30, %v170_v30 }
  0x16   :  { %v186_v39 = vrot.slane %v170_v30, %v7534_v13  ;;  %2638 = vmatpush1.msra.mxu1 %v7511_v7  ;;  %v349_v40 = vcombine.low %v341_v27, %v348_v24  ;;  %v383_v41 = vcombine.low %v374_v23, %v381_v32  ;;  %v409_v52 = vrot.slane %v6773_v31, %v7534_v13 }
  0x17   :  { %v241_v43 = vrot.slane %v219_v33, %v7534_v13  ;;  %v249_v44 = vcombine.high %v227_v35, %v227_v35  ;;  %2639 = vmatprep.subr.mxu1 %v7517_v8  ;;  %v390_v45 = vrot.slane %v382_v36, %v7534_v13  ;;  %v200_v47 = vrot.slane %v172_v37, %v7534_v13 }
  0x18   :  { %v202_v48 = vcombine.high %v186_v39, %v186_v39  ;;  %2640 = vmatpush1.msra.mxu1 %v7525_v11  ;;  %6821 = vmatprep.mubr.msk.f32.mxu0 %vm591_vm2, %v349_v40  ;;  %v397_v50 = vrot.slane %v383_v41, %v7534_v13  ;;  %v218_v55 = vrot.slane %v204_v49, %v7534_v13  ;;  %v7720_v33 = vsub.s32 0, %v7519_v10 }
  0x19   :  { %v402_v51 = vcombine.low %v241_v43, %v249_v44  ;;  %2641 = vmatprep.subr.mxu1 %v7531_v12  ;;  %v400_v53 = vcombine.low %v186_v39, %v200_v47  ;;  %2683 = vmatprep.mubr.f32.mxu1 %v9395_v3  ;;  %v251_v58 = vcombine.high %v241_v43, %v241_v43  ;;  %v6780_v39 = vld [vmem:[%s9391_s3 + $0x1] ss:$0 sm:$0xff] }
  0x1a   :  { %v401_v54 = vcombine.low %v202_v48, %v227_v35  ;;  %2642 = vmatpush1.msra.mxu1 %v7540_v14  ;;  %v398_v56 = vcombine.low %v390_v45, %v397_v50  ;;  %v220_v61 = vcombine.high %v218_v55, %v218_v55  ;;  %v234_v62 = vrot.slane %v218_v55, %v7534_v13 }
  0x1b   :  { %v430_v57 = vrot.slane %v402_v51, %v7534_v13  ;;  %2643 = vmatprep.subr.mxu1 %v7552_v17  ;;  %v416_v59 = vrot.slane %v400_v53, %v7534_v13  ;;  %v1288_v49 = vcombine.high %v6780_v39, %v6780_v39 }
  0x1c   :  { %v423_v60 = vrot.slane %v401_v54, %v7534_v13  ;;  %2644 = vmatpush1.msra.mxu1 %v7557_v18  ;;  %6822 = vmatmul.mubr.msk.f32.vlgmr.msra.gmra.mxu0 %vm591_vm2, %v398_v56  ;;  %v248_v5 = vrot.slane %v220_v61, %v7534_v13  ;;  %v250_v6 = vcombine.high %v234_v62, %v234_v62 }
  0x1d   :  { %2645 = vmatprep.subr.mxu1 %v7579_v25  ;;  %v431_v63 = vcombine.low %v409_v52, %v416_v59  ;;  %1813 = vmatpush1.msra.mxu0 %v7498_v1  ;;  %v448_v9 = vcombine.low %v251_v58, %v234_v62 }
  0x1e   :  { %v432_v4 = vcombine.low %v423_v60, %v430_v57  ;;  %1814 = vmatprep.subr.mxu0 %v7503_v2  ;;  %2646 = vmatpush1.msra.mxu1 %v7588_v29  ;;  %v449_v19 = vcombine.low %v248_v5, %v250_v6  ;;  %v1295_v57 = vrot.slane %v6780_v39, %v7534_v13 }
  0x1f   :  { %v439_v15 = vrot.slane %v431_v63, %v7534_v13  ;;  %1815 = vmatpush1.msra.mxu0 %v7511_v7  ;;  %2647 = vmatprep.subr.mxu1 %v7599_v34  ;;  %v456_v20 = vrot.slane %v448_v9, %v7534_v13  ;;  %v1302_v60 = vrot.slane %v1288_v49, %v7534_v13 }
  0x20   :  { %v446_v16 = vrot.slane %v432_v4, %v7534_v13  ;;  %1816 = vmatprep.subr.mxu0 %v7517_v8  ;;  %2648 = vmatpush1.msra.mxu1 %v7607_v38  ;;  %v463_v2 = vrot.slane %v449_v19, %v7534_v13 }
  0x21   :  { %1817 = vmatpush1.msra.mxu0 %v7525_v11  ;;  %2649 = vmatprep.subr.mxu1 %v7615_v42  ;;  %v6771_v11 = vld [vmem:[%s9391_s3] ss:$0 sm:$0xff] }
  0x22   :  { %v447_v1 = vcombine.low %v439_v15, %v446_v16  ;;  %1818 = vmatprep.subr.mxu0 %v7531_v12  ;;  %2650 = vmatpush1.msra.mxu1 %v7622_v46  ;;  %v464_v7 = vcombine.low %v456_v20, %v463_v2  ;;  %v260_v12 = vrot.slane %v6771_v11, %v7534_v13 }
  0x23   :  { %1819 = vmatpush1.msra.mxu0 %v7540_v14  ;;  %4281 = vmatprep.subr.mxu1 %v7493_v0  ;;  %v253_v14 = vcombine.high %v6771_v11, %v6771_v11  ;;  %v1303_v20 = vcombine.high %v1295_v57, %v1295_v57  ;;  %v7755_v11 = vrot.slane %v1302_v60, %v7534_v13 }
  0x24   :  { %6824 = vmatprep.mubr.msk.f32.mxu0 %vm591_vm2, %v447_v1  ;;  %1820 = vmatprep.subr.mxu0 %v7552_v17  ;;  %v471_v8 = vrot.slane %v464_v7, %v7534_v13  ;;  %v268_v17 = vcombine.high %v260_v12, %v260_v12  ;;  %v1304_v7 = vcombine.high %v1302_v60, %v1302_v60 }
  0x25   :  { %1821 = vmatpush1.msra.mxu0 %v7557_v18  ;;  %v267_v18 = vrot.slane %v253_v14, %v7534_v13 }
  0x26   :  { %1822 = vmatprep.subr.mxu0 %v7579_v25  ;;  %6825 = vmatmul.mubr.msk.f32.gmra.mxu0 %vm591_vm2, %v471_v8  ;;  %v276_v25 = vrot.slane %v260_v12, %v7534_v13  ;;  %v7752_v8 = vrot.slane %v1295_v57, %v7534_v13 }
  0x27   :  { %1823 = vmatpush1.msra.mxu0 %v7588_v29  ;;  %1860 = vmatprep.mubr.f32.mxu0 %v9395_v3  ;;  %v290_v29 = vrot.slane %v268_v17, %v7534_v13 }
  0x28   :  { %1824 = vmatprep.subr.mxu0 %v7599_v34  ;;  %v269_v34 = vcombine.high %v267_v18, %v267_v18 }
  0x29   :  { %1825 = vmatpush1.msra.mxu0 %v7607_v38  ;;  %v283_v38 = vrot.slane %v267_v18, %v7534_v13  ;;  %v472_v26 = vcombine.low %v276_v25, %v290_v29  ;;  %v6774_v28 = vcombine.high %v276_v25, %v290_v29 }
  0x2a   :  { %1826 = vmatprep.subr.mxu0 %v7615_v42  ;;  %v298_v42 = vcombine.high %v276_v25, %v276_v25 }
  0x2b   :  { %1827 = vmatpush1.msra.mxu0 %v7622_v46  ;;  %v300_v46 = vcombine.high %v290_v29, %v290_v29  ;;  %v299_v21 = vcombine.high %v283_v38, %v283_v38  ;;  %v482_v40 = vrot.slane %v472_v26, %v7534_v13  ;;  %v489_v43 = vrot.slane %v6774_v28, %v7534_v13 }
  0x2c   :  { %3458 = vmatprep.subr.mxu0 %v7493_v0  ;;  %v297_v0 = vrot.slane %v269_v34, %v7534_v13  ;;  %v521_v22 = vcombine.low %v290_v29, %v298_v42  ;;  %v7775_v26 = vcombine.high %v7755_v11, %v7755_v11 }
  0x2d   :  { %v522_v23 = vcombine.low %v300_v46, %v283_v38  ;;  %v475_v24 = vcombine.low %v299_v21, %v276_v25  ;;  %v504_v53 = vcombine.low %v482_v40, %v489_v43 }
  0x2e   :  { %v523_v27 = vcombine.low %v297_v0, %v299_v21  ;;  %v474_v31 = vcombine.low %v283_v38, %v297_v0  ;;  %v530_v35 = vrot.slane %v521_v22, %v7534_v13  ;;  %v7761_v38 = vrot.slane %v1303_v20, %v7534_v13 }
  0x2f   :  { %v537_v36 = vrot.slane %v522_v23, %v7534_v13  ;;  %v503_v10 = vrot.slane %v475_v24, %v7534_v13  ;;  %v512_v4 = vrot.slane %v504_v53, %v7534_v13  ;;  %v7767_v22 = vrot.slane %v1304_v7, %v7534_v13 }
  0x30   :  { %v544_v41 = vrot.slane %v523_v27, %v7534_v13  ;;  %v496_v44 = vrot.slane %v474_v31, %v7534_v13  ;;  %v7771_v23 = vcombine.high %v7752_v8, %v7752_v8 }
  0x31   :  { %v545_v48 = vcombine.low %v530_v35, %v537_v36  ;;  %v563_v59 = vcombine.low %v503_v10, %v530_v35 }
  0x32   :  { %v546_v52 = vcombine.low %v544_v41, %v482_v40  ;;  %v505_v55 = vcombine.low %v496_v44, %v503_v10  ;;  %v562_v58 = vcombine.low %v489_v43, %v496_v44  ;;  %v579_v15 = vcombine.low %v537_v36, %v544_v41 }
  0x33   :  { %v553_v62 = vrot.slane %v545_v48, %v7534_v13  ;;  %v7749_v2 = vrot.slane %v563_v59, %v7534_v13 }
  0x34   :  { %v560_v63 = vrot.slane %v546_v52, %v7534_v13  ;;  %v519_v9 = vrot.slane %v505_v55, %v7534_v13  ;;  %v7746_v1 = vrot.slane %v562_v58, %v7534_v13  ;;  %v586_v46 = vrot.slane %v579_v15, %v7534_v13 }
  0x36   :  { %v561_v25 = vcombine.low %v553_v62, %v560_v63  ;;  %v520_v29 = vcombine.low %v512_v4, %v519_v9  ;;  %v578_v0 = vcombine.low %v7746_v1, %v7749_v2 }
  0xd2   :  { %v7717_v30 = vpop.f32.mrf.mxu1 }
  0xd4   :  { %v963_v32 = vpop.f32.mrf.mxu1 }
  0xd5   :  { %v973_v37 = vrot.slane %v963_v32, %v7534_v13 }
  0xd7   :  { %v974_v45 = vcombine.high %v973_v37, %v973_v37  ;;  %v981_v47 = vrot.slane %v973_v37, %v7534_v13 }
  0xd9   :  { %v988_v50 = vrot.slane %v974_v45, %v7534_v13  ;;  %v994_v51 = vrot.slane %v981_v47, %v7720_v33  ;;  %v989_v54 = vcombine.high %v981_v47, %v981_v47  ;;  %v7794_v47 = vcombine.high %v7761_v38, %v7761_v38 }
  0xdb   :  { %v998_v56 = vrot.slane %v988_v50, %v7720_v33  ;;  %v1007_v61 = vcombine.high %v994_v51, %v994_v51  ;;  %v1002_v5 = vrot.slane %v989_v54, %v7720_v33  ;;  %v1014_v6 = vrot.slane %v994_v51, %v7534_v13 }
  0xdc   :  { %v6823_v19 = vpop.f32.mrf.mxu0  ;;  %v990_v21 = vcombine.high %v988_v50, %v988_v50 }
  0xdd   :  { %v1055_v16 = vcombine.high %v998_v56, %v998_v56  ;;  %v1021_v12 = vrot.slane %v1007_v61, %v7534_v13  ;;  %v1062_v14 = vrot.slane %v998_v56, %v7534_v13  ;;  %v1022_v17 = vcombine.high %v1014_v6, %v1014_v6 }
  0xde   :  { %v1103_v18 = vcombine.high %v1002_v5, %v1002_v5  ;;  %v666_v42 = vpop.f32.mrf.mxu0  ;;  %v1030_v28 = vrot.slane %v1014_v6, %v7534_v13  ;;  %v1110_v35 = vrot.slane %v1002_v5, %v7534_v13  ;;  %v672_v43 = vadd.f32 %v6823_v19, %v561_v25 }
  0xdf   :  { %v1069_v34 = vrot.slane %v1055_v16, %v7534_v13  ;;  %v1023_v27 = vcombine.high %v1021_v12, %v1021_v12  ;;  %v7779_v31 = vrot.slane %v1021_v12, %v7534_v13  ;;  %v1070_v24 = vcombine.high %v1062_v14, %v1062_v14 }
  0xe0   :  { %v1044_v32 = vrot.slane %v1022_v17, %v7534_v13  ;;  %v1117_v36 = vrot.slane %v1103_v18, %v7534_v13  ;;  %v667_v37 = vadd.f32 %v666_v42, %v520_v29  ;;  %v7785_v40 = vrot.slane %v1062_v14, %v7534_v13 }
  0xe1   :  { %v1071_v39 = vcombine.high %v1069_v34, %v1069_v34  ;;  %v7788_v41 = vrot.slane %v1069_v34, %v7534_v13  ;;  %v1006_v44 = vrot.slane %v990_v21, %v7720_v33  ;;  %v1051_v48 = vrot.slane %v1023_v27, %v7534_v13 }
  0xe2   :  { %v689_v10 = vcombine.high %v667_v37, %v667_v37  ;;  %v696_v45 = vrot.slane %v667_v37, %v7534_v13  ;;  %v1052_v49 = vcombine.high %v1030_v28, %v1030_v28  ;;  %v1053_v50 = vcombine.high %v7779_v31, %v7779_v31 }
  0xe3   :  { %v7800_v51 = vrot.slane %v1070_v24, %v7534_v13  ;;  %v1054_v53 = vcombine.high %v1044_v32, %v1044_v32  ;;  %v1118_v54 = vcombine.high %v1110_v35, %v1110_v35  ;;  %v1119_v55 = vcombine.high %v1117_v36, %v1117_v36 }
  0xe4   :  { %v703_v56 = vrot.slane %v689_v10, %v7534_v13  ;;  %v7804_v57 = vrot.slane %v1071_v39, %v7534_v13  ;;  %v1100_v58 = vcombine.high %v7785_v40, %v7785_v40  ;;  %v1101_v59 = vcombine.high %v7788_v41, %v7788_v41 }
  0xe5   :  { %v745_v60 = vrot.slane %v672_v43, %v7534_v13  ;;  %v1151_v61 = vcombine.high %v1006_v44, %v1006_v44  ;;  %v704_v62 = vcombine.high %v696_v45, %v696_v45  ;;  %v7812_v4 = vrot.slane %v696_v45, %v7534_v13 }
  0xe6   :  { %v6826_v52 = vpop.f32.mrf.mxu0  ;;  %v705_v63 = vcombine.high %v703_v56, %v703_v56  ;;  %v1102_v6 = vcombine.high %v7800_v51, %v7800_v51  ;;  %v7817_v9 = vrot.slane %v1110_v35, %v7534_v13  ;;  %v7820_v15 = vrot.slane %v1117_v36, %v7534_v13 }
  0xe7   :  { %9458 = vst [vmem:[#allocation4_spill] sm:$0xff] %v7812_v4  ;;  %v1158_v16 = vrot.slane %v1006_v44, %v7534_v13  ;;  %v7824_v19 = vrot.slane %v1118_v54, %v7534_v13  ;;  %v7827_v20 = vrot.slane %v1119_v55, %v7534_v13  ;;  %v738_v1 = vcombine.high %v672_v43, %v672_v43 }
  0xe8   :  { %v676_v5 = vpop.f32.mrf.mxu0  ;;  %v7830_v2 = vrot.slane %v704_v62, %v7534_v13  ;;  %v753_v7 = vcombine.high %v745_v60, %v745_v60  ;;  %v7833_v12 = vrot.slane %v703_v56, %v7534_v13  ;;  %v7837_v14 = vcombine.high %v7812_v4, %v7812_v4 }
  0xe9   :  { %v677_v17 = vadd.f32 %v676_v5, %v578_v0  ;;  %v1165_v18 = vrot.slane %v1151_v61, %v7534_v13  ;;  %v7841_v25 = vrot.slane %v705_v63, %v7534_v13  ;;  %v1227_v34 = vadd.f32 %v1030_v28, %v7812_v4 }
  0xea   :  { %9459 = vst [vmem:[#allocation5_spill] sm:$0xff] %v7830_v2  ;;  %v7845_v29 = vcombine.high %v7830_v2, %v7830_v2  ;;  %v1148_v42 = vcombine.high %v7817_v9, %v7817_v9  ;;  %v1166_v21 = vcombine.high %v1158_v16, %v1158_v16  ;;  %v682_v27 = vadd.f32 %v6826_v52, %v586_v46 }
  0xeb   :  { %v787_v24 = vcombine.high %v677_v17, %v677_v17  ;;  %v7851_v35 = vrot.slane %v1158_v16, %v7534_v13  ;;  %v752_v0 = vrot.slane %v738_v1, %v7534_v13  ;;  %v7855_v36 = vrot.slane %v745_v60, %v7534_v13 }
  0xec   :  { %v1228_v37 = vadd.f32 %v1044_v32, %v7830_v2  ;;  %v7859_v39 = vrot.slane %v753_v7, %v7534_v13  ;;  %v7863_v28 = vcombine.high %v7833_v12, %v7833_v12  ;;  %v1229_v43 = vadd.f32 %v1052_v49, %v7837_v14 }
  0xed   :  { %v801_v46 = vrot.slane %v787_v24, %v7534_v13  ;;  %v1167_v44 = vcombine.high %v1165_v18, %v1165_v18  ;;  %v7869_v10 = vcombine.high %v7841_v25, %v7841_v25  ;;  %v1230_v45 = vadd.f32 %v1054_v53, %v7845_v29 }
  0xee   :  { %6838 = vtanh.f32 %v1227_v34  ;;  %v7873_v32 = vrot.slane %v1165_v18, %v7534_v13  ;;  %v842_v52 = vrot.slane %v682_v27, %v7534_v13  ;;  %v1231_v55 = vadd.f32 %v7779_v31, %v7833_v12 }
  0xef   :  { %v803_v54 = vcombine.high %v801_v46, %v801_v46  ;;  %v1188_v56 = vrot.slane %v1166_v21, %v7534_v13  ;;  %v754_v49 = vcombine.high %v752_v0, %v752_v0  ;;  %v1232_v60 = vadd.f32 %v1051_v48, %v7841_v25 }
  0xf0   :  { %6840 = vtanh.f32 %v1228_v37  ;;  %v7882_v61 = vcombine.high %v7855_v36, %v7855_v36  ;;  %v7886_v53 = vcombine.high %v7859_v39, %v7859_v39  ;;  %v1233_v62 = vadd.f32 %v1053_v50, %v7863_v28 }
  0xf1   :  { %6842 = vtanh.f32 %v1229_v43  ;;  %v794_v63 = vrot.slane %v677_v17, %v7534_v13  ;;  %v7891_v31 = vrot.slane %v801_v46, %v7534_v13  ;;  %v1234_v48 = vadd.f32 %v7785_v40, %v7869_v10 }
  0xf2   :  { %6844 = vtanh.f32 %v1230_v45  ;;  %v843_v5 = vcombine.high %v842_v52, %v842_v52  ;;  %v7896_v16 = vrot.slane %v803_v54, %v7534_v13  ;;  %v1235_v1 = vadd.f32 %v7800_v51, %v7855_v36 }
  0xf3   :  { %6846 = vtanh.f32 %v1231_v55  ;;  %v1196_v50 = vcombine.high %v7851_v35, %v7851_v35  ;;  %v7903_v7 = vrot.slane %v754_v49, %v7534_v13  ;;  %v1236_v17 = vadd.f32 %v1100_v58, %v7859_v39 }
  0xf4   :  { %9460 = vst [vmem:[#allocation6_spill] sm:$0xff] %v7896_v16  ;;  %6848 = vtanh.f32 %v1232_v60  ;;  %v7910_v18 = vrot.slane %v752_v0, %v7534_v13  ;;  %v7913_v34 = vrot.slane %v842_v52, %v7534_v13  ;;  %v1237_v51 = vadd.f32 %v1102_v6, %v7882_v61 }
  0xf5   :  { %6850 = vtanh.f32 %v1233_v62  ;;  %v802_v21 = vcombine.high %v794_v63, %v794_v63  ;;  %v7918_v27 = vcombine.high %v7891_v31, %v7891_v31  ;;  %v1238_v24 = vadd.f32 %v7788_v41, %v7886_v53 }
  0xf6   :  { %6852 = vtanh.f32 %v1234_v48  ;;  %v7923_v40 = vrot.slane %v843_v5, %v7534_v13  ;;  %v7927_v58 = vcombine.high %v7896_v16, %v7896_v16  ;;  %v1239_v0 = vadd.f32 %v7804_v57, %v7910_v18 }
  0xf7   :  { %6854 = vtanh.f32 %v1235_v1  ;;  %v1195_v6 = vrot.slane %v1167_v44, %v7534_v13  ;;  %v1198_v37 = vcombine.high %v1188_v56, %v1188_v56  ;;  %v1240_v46 = vadd.f32 %v1101_v59, %v7903_v7 }
  0xf8   :  { %6856 = vtanh.f32 %v1236_v17  ;;  %v1197_v43 = vcombine.high %v7873_v32, %v7873_v32  ;;  %v7939_v45 = vrot.slane %v794_v63, %v7534_v13  ;;  %v1248_v57 = vadd.f32 %v7851_v35, %v7896_v16 }
  0xf9   :  { %6858 = vtanh.f32 %v1237_v51  ;;  %v7945_v44 = vcombine.high %v7910_v18, %v7910_v18  ;;  %v7949_v52 = vcombine.high %v7913_v34, %v7913_v34  ;;  %v1249_v41 = vadd.f32 %v1188_v56, %v7918_v27 }
  0xfa   :  { %9461 = vst [vmem:[#allocation7_spill] sm:$0xff] %v7939_v45  ;;  %6860 = vtanh.f32 %v1238_v24  ;;  %v7954_v54 = vcombine.high %v7923_v40, %v7923_v40  ;;  %v7957_v55 = vrot.slane %v802_v21, %v7534_v13  ;;  %v1250_v35 = vadd.f32 %v1196_v50, %v7927_v58 }
  0xfb   :  { %9462 = vst [vmem:[#allocation8_spill] sm:$0xff] %v7945_v44  ;;  %v6839_v59 = vpop.eup %6838  ;;  %6862 = vtanh.f32 %v1239_v0  ;;  %v1149_v49 = vcombine.high %v7820_v15, %v7820_v15  ;;  %v1150_v60 = vcombine.high %v7824_v19, %v7824_v19  ;;  %v1251_v56 = vadd.f32 %v1198_v37, %v7913_v34 }
  0xfc   :  { %6864 = vtanh.f32 %v1240_v46  ;;  %v7967_v63 = vcombine.high %v7903_v7, %v7903_v7  ;;  %v7971_v48 = vcombine.high %v7939_v45, %v7939_v45  ;;  %v1252_v5 = vadd.f32 %v7873_v32, %v7923_v40 }
  0xfd   :  { %v6841_v62 = vpop.eup %6840  ;;  %6866 = vtanh.f32 %v1248_v57  ;;  %v1343_v50 = vmul.f32 %v6839_v59, %v7752_v8  ;;  %v1253_v51 = vadd.f32 %v1195_v6, %v7949_v52  ;;  %v7980_v24 = vcombine.high %v7957_v55, %v7957_v55 }
  0xfe   :  { %9463 = vst [vmem:[#allocation9_spill] sm:$0xff] %v7967_v63  ;;  %9464 = vst [vmem:[#allocation10_spill] sm:$0xff] %v7971_v48  ;;  %v6843_v1 = vpop.eup %6842  ;;  %v1344_v17 = vmul.f32 %v6841_v62, %v7761_v38  ;;  %6868 = vtanh.f32 %v1249_v41  ;;  %v1254_v0 = vadd.f32 %v1197_v43, %v7954_v54  ;;  %v1241_v32 = vadd.f32 %v7817_v9, %v7945_v44 }
  0xff   :  { %v6845_v21 = vpop.eup %6844  ;;  %6870 = vtanh.f32 %v1250_v35  ;;  %v1345_v46 = vmul.f32 %v6843_v1, %v7771_v23  ;;  %v1242_v41 = vadd.f32 %v7824_v19, %v7967_v63  ;;  %v1243_v43 = vadd.f32 %v1148_v42, %v7939_v45 }
 0x100   :  { %v6847_v37 = vpop.eup %6846  ;;  %v1346_v57 = vmul.f32 %v6845_v21, %v7794_v47  ;;  %v1399_v59 = vcombine.low %v1343_v50, %v1344_v17  ;;  %6872 = vtanh.f32 %v1251_v56  ;;  %v1244_v35 = vadd.f32 %v1150_v60, %v7957_v55 }
 0x101   :  { %v6849_v6 = vpop.eup %6848  ;;  %6874 = vtanh.f32 %v1252_v5  ;;  %v1347_v3 = vmul.f32 %v6847_v37, %v7755_v11  ;;  %v1245_v19 = vadd.f32 %v7820_v15, %v7971_v48 }
 0x102   :  { %v6851_v62 = vpop.eup %6850  ;;  %v1348_v1 = vmul.f32 %v6849_v6, %v7767_v22  ;;  %v1400_v21 = vcombine.low %v1345_v46, %v1346_v57  ;;  %6876 = vtanh.f32 %v1253_v51  ;;  %v1408_v50 = vrot.slane %v1399_v59, %v7534_v13 }
 0x103   :  { %v6853_v56 = vpop.eup %6852  ;;  %v1349_v5 = vmul.f32 %v6851_v62, %v7775_v26  ;;  %6878 = vtanh.f32 %v1254_v0  ;;  %v1246_v51 = vadd.f32 %v7827_v20, %v7980_v24  ;;  %v1247_v57 = vadd.f32 %v1149_v49, %v7891_v31 }
 0x104   :  { %v6855_v9 = vpop.eup %6854  ;;  %v1401_v42 = vcombine.low %v1347_v3, %v1348_v1  ;;  %v1415_v60 = vrot.slane %v1400_v21, %v7534_v13  ;;  %v1350_v17 = vmul.f32 %v6853_v56, %v7752_v8  ;;  %6880 = vtanh.f32 %v1241_v32 }
 0x105   :  { %v6857_v37 = vpop.eup %6856  ;;  %v1351_v46 = vmul.f32 %v6855_v9, %v7761_v38  ;;  %6882 = vtanh.f32 %v1242_v41  ;;  %v1429_v15 = vrot.slane %v1349_v5, %v7534_v13 }
 0x106   :  { %v6859_v0 = vpop.eup %6858  ;;  %v1422_v59 = vrot.slane %v1401_v42, %v7534_v13  ;;  %v1430_v3 = vcombine.low %v1408_v50, %v1415_v60  ;;  %6884 = vtanh.f32 %v1243_v43  ;;  %v1352_v62 = vmul.f32 %v6857_v37, %v7771_v23 }
 0x107   :  { %v6861_v6 = vpop.eup %6860  ;;  %v1353_v32 = vmul.f32 %v6859_v0, %v7794_v47  ;;  %v1447_v1 = vcombine.low %v1350_v17, %v1351_v46  ;;  %6886 = vtanh.f32 %v1244_v35 }
 0x108   :  { %v6863_v21 = vpop.eup %6862  ;;  %v1431_v56 = vcombine.low %v1422_v59, %v1429_v15  ;;  %v1438_v20 = vrot.slane %v1430_v3, %v7534_v13  ;;  %v1354_v49 = vmul.f32 %v6861_v6, %v7755_v11  ;;  %6888 = vtanh.f32 %v1245_v19 }
 0x109   :  { %v6865_v41 = vpop.eup %6864  ;;  %v1355_v9 = vmul.f32 %v6863_v21, %v7767_v22  ;;  %v1448_v5 = vcombine.low %v1352_v62, %v1353_v32  ;;  %v1456_v43 = vrot.slane %v1447_v1, %v7534_v13  ;;  %6890 = vtanh.f32 %v1246_v51 }
 0x10a   :  { %v6867_v50 = vpop.eup %6866  ;;  %v1445_v42 = vrot.slane %v1431_v56, %v7534_v13  ;;  %v1356_v60 = vmul.f32 %v6865_v41, %v7775_v26  ;;  %6892 = vtanh.f32 %v1247_v57 }
 0x10b   :  { %v6869_v35 = vpop.eup %6868  ;;  %v1449_v17 = vcombine.low %v1354_v49, %v1355_v9  ;;  %v1463_v37 = vrot.slane %v1448_v5, %v7534_v13  ;;  %v1364_v19 = vmul.f32 %v6867_v50, %v7752_v8 }
 0x10c   :  { %v6871_v46 = vpop.eup %6870  ;;  %v1446_v0 = vcombine.low %v1438_v20, %v1445_v42  ;;  %v1365_v59 = vmul.f32 %v6869_v35, %v7761_v38  ;;  %v1477_v3 = vrot.slane %v1356_v60, %v7534_v13 }
 0x10d   :  { %v6873_v15 = vpop.eup %6872  ;;  %v1470_v51 = vrot.slane %v1449_v17, %v7534_v13  ;;  %v1478_v6 = vcombine.low %v1456_v43, %v1463_v37  ;;  %v1366_v62 = vmul.f32 %v6871_v46, %v7771_v23 }
 0x10e   :  { %v6875_v57 = vpop.eup %6874  ;;  %v1596_v32 = vsel %vm1595_vm3, %v1446_v0, 0.0  ;;  %v1367_v1 = vmul.f32 %v6873_v15, %v7794_v47  ;;  %v1543_v21 = vcombine.low %v1364_v19, %v1365_v59 }
 0x10f   :  { %v6877_v56 = vpop.eup %6876  ;;  %1597 = vadd.xlane.f32.xlu1 %v1596_v32  ;;  %v1479_v49 = vcombine.low %v1470_v51, %v1477_v3  ;;  %v1486_v20 = vrot.slane %v1478_v6, %v7534_v13  ;;  %v1368_v41 = vmul.f32 %v6875_v57, %v7755_v11 }
 0x110   :  { %v6879_v9 = vpop.eup %6878  ;;  %v1369_v5 = vmul.f32 %v6877_v56, %v7767_v22  ;;  %v1544_v50 = vcombine.low %v1366_v62, %v1367_v1  ;;  %v1552_v37 = vrot.slane %v1543_v21, %v7534_v13 }
 0x111   :  { %v6881_v43 = vpop.eup %6880  ;;  %v1493_v42 = vrot.slane %v1479_v49, %v7534_v13  ;;  %v1370_v60 = vmul.f32 %v6879_v9, %v7775_v26 }
 0x112   :  { %v6883_v35 = vpop.eup %6882  ;;  %v1545_v17 = vcombine.low %v1368_v41, %v1369_v5  ;;  %v1559_v19 = vrot.slane %v1544_v50, %v7534_v13  ;;  %v1357_v15 = vmul.f32 %v6881_v43, %v7752_v8 }
 0x113   :  { %v6885_v46 = vpop.eup %6884  ;;  %v1494_v0 = vcombine.low %v1486_v20, %v1493_v42  ;;  %v1573_v59 = vrot.slane %v1370_v60, %v7534_v13  ;;  %v1358_v51 = vmul.f32 %v6883_v35, %v7761_v38 }
 0x114   :  { %v6887_v3 = vpop.eup %6886  ;;  %v1566_v6 = vrot.slane %v1545_v17, %v7534_v13  ;;  %v1574_v62 = vcombine.low %v1552_v37, %v1559_v19  ;;  %v1359_v1 = vmul.f32 %v6885_v46, %v7771_v23 }
 0x115   :  { %v6889_v57 = vpop.eup %6888  ;;  %v1599_v32 = vsel %vm1595_vm3, %v1494_v0, 0.0  ;;  %v1360_v21 = vmul.f32 %v6887_v3, %v7794_v47  ;;  %v1495_v56 = vcombine.low %v1357_v15, %v1358_v51 }
 0x116   :  { %v6891_v49 = vpop.eup %6890  ;;  %1600 = vadd.xlane.f32.xlu0 %v1599_v32  ;;  %v1575_v20 = vcombine.low %v1566_v6, %v1573_v59  ;;  %v1582_v41 = vrot.slane %v1574_v62, %v7534_v13  ;;  %v1361_v5 = vmul.f32 %v6889_v57, %v7755_v11 }
 0x117   :  { %v6893_v9 = vpop.eup %6892  ;;  %v1362_v50 = vmul.f32 %v6891_v49, %v7767_v22  ;;  %v1496_v43 = vcombine.low %v1359_v1, %v1360_v21  ;;  %v1504_v17 = vrot.slane %v1495_v56, %v7534_v13 }
 0x118   :  { %v1589_v42 = vrot.slane %v1575_v20, %v7534_v13  ;;  %v1363_v60 = vmul.f32 %v6893_v9, %v7775_v26 }
 0x119   :  { %v1497_v35 = vcombine.low %v1361_v5, %v1362_v50  ;;  %v1511_v37 = vrot.slane %v1496_v43, %v7534_v13 }
 0x11a   :  { %v1590_v19 = vcombine.low %v1582_v41, %v1589_v42  ;;  %v1525_v0 = vrot.slane %v1363_v60, %v7534_v13 }
 0x11b   :  { %v1518_v46 = vrot.slane %v1497_v35, %v7534_v13  ;;  %v1526_v59 = vcombine.low %v1504_v17, %v1511_v37 }
 0x11c   :  { %v1605_v15 = vsel %vm1595_vm3, %v1590_v19, 0.0 }
 0x11d   :  { %1606 = vadd.xlane.f32.xlu1 %v1605_v15  ;;  %v1527_v51 = vcombine.low %v1518_v46, %v1525_v0  ;;  %v1534_v3 = vrot.slane %v1526_v59, %v7534_v13 }
 0x11f   :  { %v1541_v6 = vrot.slane %v1527_v51, %v7534_v13 }
 0x121   :  { %v1542_v62 = vcombine.low %v1534_v3, %v1541_v6 }
 0x123   :  { %v1602_v57 = vsel %vm1595_vm3, %v1542_v62, 0.0 }
 0x124   :  { %1603 = vadd.xlane.f32.xlu0 %v1602_v57 }
 0x198   :  { %v1598_v32 = vpop.xlane.xlu1 %1597 }
 0x199   :  { %v1609_v1 = vsel %vm1608_vm4, %v1598_v32, -inf }
 0x19a   :  { %v1610_v21 = vrot.slane %v1609_v1, 4 }
 0x19c   :  { %v1611_v56 = vmax.f32 %v1609_v1, %v1610_v21 }
 0x19e   :  { %v1612_v49 = vrot.slane %v1611_v56, 2 }
 0x19f   :  { %v1601_v20 = vpop.xlane.xlu0 %1600 }
 0x1a0   :  { %v1613_v41 = vmax.f32 %v1611_v56, %v1612_v49  ;;  %v1616_v9 = vsel %vm1608_vm4, %v1601_v20, -inf }
 0x1a1   :  { %v1617_v5 = vrot.slane %v1616_v9, 4 }
 0x1a2   :  { %v1614_v50 = vrot.slane %v1613_v41, 1 }
 0x1a3   :  { %v1618_v43 = vmax.f32 %v1616_v9, %v1617_v5 }
 0x1a4   :  { %v1615_v42 = vmax.f32 %v1613_v41, %v1614_v50 }
 0x1a5   :  { %v1619_v60 = vrot.slane %v1618_v43, 2 }
 0x1a6   :  { %v1637_v35 = vsub.f32 %v1598_v32, %v1615_v42  ;;  %v1607_v17 = vpop.xlane.xlu1 %1606 }
 0x1a7   :  { %v1620_v37 = vmax.f32 %v1618_v43, %v1619_v60  ;;  %v1630_v19 = vsel %vm1608_vm4, %v1607_v17, -inf }
 0x1a8   :  { %v1641_v46 = vmul.f32 1.442695, %v1637_v35  ;;  %v1631_v0 = vrot.slane %v1630_v19, 4 }
 0x1a9   :  { %v1621_v59 = vrot.slane %v1620_v37, 1 }
 0x1aa   :  { %6894 = vpow2.f32 %v1641_v46  ;;  %v1632_v15 = vmax.f32 %v1630_v19, %v1631_v0 }
 0x1ab   :  { %v1622_v51 = vmax.f32 %v1620_v37, %v1621_v59 }
 0x1ac   :  { %v1633_v3 = vrot.slane %v1632_v15, 2 }
 0x1ad   :  { %v1638_v6 = vsub.f32 %v1601_v20, %v1622_v51  ;;  %v1604_v62 = vpop.xlane.xlu0 %1603 }
 0x1ae   :  { %v1634_v57 = vmax.f32 %v1632_v15, %v1633_v3  ;;  %v1623_v1 = vsel %vm1608_vm4, %v1604_v62, -inf }
 0x1af   :  { %v1643_v21 = vmul.f32 1.442695, %v1638_v6  ;;  %v1624_v56 = vrot.slane %v1623_v1, 4 }
 0x1b0   :  { %v1635_v49 = vrot.slane %v1634_v57, 1 }
 0x1b1   :  { %6896 = vpow2.f32 %v1643_v21  ;;  %v1625_v32 = vmax.f32 %v1623_v1, %v1624_v56 }
 0x1b2   :  { %v1636_v41 = vmax.f32 %v1634_v57, %v1635_v49 }
 0x1b3   :  { %v1626_v9 = vrot.slane %v1625_v32, 2 }
 0x1b4   :  { %v1640_v5 = vsub.f32 %v1607_v17, %v1636_v41 }
 0x1b5   :  { %v1627_v50 = vmax.f32 %v1625_v32, %v1626_v9 }
 0x1b6   :  { %v1647_v43 = vmul.f32 1.442695, %v1640_v5 }
 0x1b7   :  { %v6895_v42 = vpop.eup %6894  ;;  %v1628_v60 = vrot.slane %v1627_v50, 1 }
 0x1b8   :  { %v1649_v35 = vsel %vm1608_vm4, %v6895_v42, 0.0  ;;  %6898 = vpow2.f32 %v1647_v43 }
 0x1b9   :  { %v1650_v20 = vrot.slane %v1649_v35, 4  ;;  %v1629_v37 = vmax.f32 %v1627_v50, %v1628_v60 }
 0x1bb   :  { %v1651_v19 = vadd.f32 %v1650_v20, %v1649_v35  ;;  %v1639_v46 = vsub.f32 %v1604_v62, %v1629_v37 }
 0x1bd   :  { %v1652_v0 = vrot.slane %v1651_v19, 2  ;;  %v1645_v59 = vmul.f32 1.442695, %v1639_v46 }
 0x1be   :  { %v6897_v15 = vpop.eup %6896 }
 0x1bf   :  { %v1653_v51 = vadd.f32 %v1652_v0, %v1651_v19  ;;  %v1656_v3 = vsel %vm1608_vm4, %v6897_v15, 0.0  ;;  %6900 = vpow2.f32 %v1645_v59 }
 0x1c0   :  { %v1657_v6 = vrot.slane %v1656_v3, 4 }
 0x1c1   :  { %v1654_v17 = vrot.slane %v1653_v51, 1 }
 0x1c2   :  { %v1658_v57 = vadd.f32 %v1657_v6, %v1656_v3 }
 0x1c3   :  { %v1655_v1 = vadd.f32 %v1654_v17, %v1653_v51 }
 0x1c4   :  { %v1659_v21 = vrot.slane %v1658_v57, 2 }
 0x1c5   :  { %v6899_v56 = vpop.eup %6898  ;;  %6902 = vrcp.f32 %v1655_v1 }
 0x1c6   :  { %v1660_v49 = vadd.f32 %v1659_v21, %v1658_v57  ;;  %v1670_v32 = vsel %vm1608_vm4, %v6899_v56, 0.0  ;;  %v8062_v21 = vld [vmem:[%s9390_s0] sm:$0x7f] }
 0x1c7   :  { %v1671_v41 = vrot.slane %v1670_v32, 4 }
 0x1c8   :  { %v1661_v9 = vrot.slane %v1660_v49, 1 }
 0x1c9   :  { %v1672_v62 = vadd.f32 %v1671_v41, %v1670_v32  ;;  %v8068_v32 = vld [vmem:[%s9390_s0 + $0x8] sm:$0x7f] }
 0x1ca   :  { %v1662_v5 = vadd.f32 %v1661_v9, %v1660_v49 }
 0x1cb   :  { %v1673_v50 = vrot.slane %v1672_v62, 2 }
 0x1cc   :  { %v6901_v43 = vpop.eup %6900  ;;  %6904 = vrcp.f32 %v1662_v5 }
 0x1cd   :  { %v1674_v60 = vadd.f32 %v1673_v50, %v1672_v62  ;;  %v1663_v35 = vsel %vm1608_vm4, %v6901_v43, 0.0 }
 0x1ce   :  { %v1664_v20 = vrot.slane %v1663_v35, 4 }
 0x1cf   :  { %v1675_v37 = vrot.slane %v1674_v60, 1 }
 0x1d0   :  { %v1665_v19 = vadd.f32 %v1664_v20, %v1663_v35  ;;  %v8076_v35 = vld [vmem:[%s9390_s0 + $0x18] sm:$0x7f] }
 0x1d1   :  { %v1676_v46 = vadd.f32 %v1675_v37, %v1674_v60 }
 0x1d2   :  { %v1666_v0 = vrot.slane %v1665_v19, 2  ;;  %v6903_v59 = vpop.eup %6902 }
 0x1d3   :  { %6906 = vrcp.f32 %v1676_v46  ;;  %v1678_v6 = vmul.f32 %v6903_v59, %v6895_v42 }
 0x1d4   :  { %v1667_v51 = vadd.f32 %v1666_v0, %v1665_v19 }
 0x1d5   :  { %v1685_v49 = vmul.f32 %v8062_v21, %v1678_v6 }
 0x1d6   :  { %v1668_v3 = vrot.slane %v1667_v51, 1 }
 0x1d7   :  { %v1689_v9 = vsel %vm1595_vm3, %v1685_v49, 0.0 }
 0x1d8   :  { %v1669_v17 = vadd.f32 %v1668_v3, %v1667_v51  ;;  %v1690_v60 = vrot.slane %v1689_v9, 4 }
 0x1d9   :  { %v6905_v57 = vpop.eup %6904 }
 0x1da   :  { %v1680_v1 = vmul.f32 %v6905_v57, %v6897_v15  ;;  %6908 = vrcp.f32 %v1669_v17  ;;  %v1691_v46 = vadd.f32 %v1690_v60, %v1689_v9 }
 0x1dc   :  { %v1686_v41 = vmul.f32 %v8068_v32, %v1680_v1  ;;  %v1692_v57 = vrot.slane %v1691_v46, 2 }
 0x1de   :  { %v1696_v42 = vsel %vm1595_vm3, %v1686_v41, 0.0  ;;  %v1693_v9 = vadd.f32 %v1692_v57, %v1691_v46 }
 0x1df   :  { %v1697_v15 = vrot.slane %v1696_v42, 4 }
 0x1e0   :  { %v6907_v62 = vpop.eup %6906  ;;  %v1694_v60 = vrot.slane %v1693_v9, 1 }
 0x1e1   :  { %v1684_v5 = vmul.f32 %v6907_v62, %v6899_v56  ;;  %v1698_v50 = vadd.f32 %v1697_v15, %v1696_v42  ;;  %v8083_v56 = vld [vmem:[%s9390_s0 + $0x10] sm:$0x7f] }
 0x1e3   :  { %v1688_v20 = vmul.f32 %v8076_v35, %v1684_v5  ;;  %v1699_v37 = vrot.slane %v1698_v50, 2 }
 0x1e5   :  { %v1710_v19 = vsel %vm1595_vm3, %v1688_v20, 0.0  ;;  %v1700_v3 = vadd.f32 %v1699_v37, %v1698_v50  ;;  %v8090_v37 = vld [vmem:[%s9391_s3 + $0x4] ss:$0 sm:$0xff] }
 0x1e6   :  { %v1711_v0 = vrot.slane %v1710_v19, 4  ;;  %9465 = vst [vmem:[#allocation11_spill] sm:$0xff] %v8090_v37 }
 0x1e7   :  { %v6909_v59 = vpop.eup %6908  ;;  %v1701_v49 = vrot.slane %v1700_v3, 1 }
 0x1e8   :  { %v1682_v51 = vmul.f32 %v6909_v59, %v6901_v43  ;;  %v1712_v6 = vadd.f32 %v1711_v0, %v1710_v19 }
 0x1e9   :  { %v1702_v43 = vadd.f32 %v1701_v49, %v1700_v3 }
 0x1ea   :  { %v1687_v17 = vmul.f32 %v8083_v56, %v1682_v51  ;;  %v1713_v1 = vrot.slane %v1712_v6, 2  ;;  %v1695_v51 = vadd.f32 %v1694_v60, %v1693_v9  ;;  %v8106_v60 = vld [vmem:[%s9391_s3 + $0x2] ss:$0 sm:$0xff] }
 0x1eb   :  { %v1722_v0 = vmul.f32 %v8090_v37, %v1702_v43  ;;  %9466 = vst [vmem:[#allocation12_spill] sm:$0xff] %v8106_v60 }
 0x1ec   :  { %v1703_v41 = vsel %vm1595_vm3, %v1687_v17, 0.0  ;;  %v1714_v42 = vadd.f32 %v1713_v1, %v1712_v6  ;;  %v1721_v3 = vmul.f32 %v8090_v37, %v1695_v51 }
 0x1ed   :  { %v1704_v15 = vrot.slane %v1703_v41, 4  ;;  %v1729_v46 = vrot.slane %v1722_v0, 7  ;;  %v8112_v0 = vld [vmem:[%s9391_s3 + $0x3] ss:$0 sm:$0xff] }
 0x1ee   :  { %v1715_v62 = vrot.slane %v1714_v42, 1  ;;  %9467 = vst [vmem:[#allocation13_spill] sm:$0xff] %v8112_v0 }
 0x1ef   :  { %v1705_v5 = vadd.f32 %v1704_v15, %v1703_v41  ;;  %v1731_v41 = vsel %vm1730_vm5, %v1729_v46, %v1721_v3 }
 0x1f0   :  { %v1716_v20 = vadd.f32 %v1715_v62, %v1714_v42  ;;  %v7457_v62 = vmov 0  }
 0x1f1   :  { %v1706_v50 = vrot.slane %v1705_v5, 2  ;;  %6832 = vset.pattern.permute.xlu1 %v7457_v62  ;;  %6833 = vset.pattern.permute.xlu0 %v7457_v62 }
 0x1f2   :  { %v1724_v6 = vmul.f32 %v8090_v37, %v1716_v20 }
 0x1f3   :  { %v1707_v19 = vadd.f32 %v1706_v50, %v1705_v5  ;;  %v1743_v5 = vld [vmem:[%s9392_s1] sm:$0xf] }
 0x1f4   :  { %v1735_v1 = vrot.slane %v1724_v6, 5 }
 0x1f5   :  { %v1708_v59 = vrot.slane %v1707_v19, 1 }
 0x1f7   :  { %v1709_v17 = vadd.f32 %v1708_v59, %v1707_v19 }
 0x1f9   :  { %v1723_v57 = vmul.f32 %v8090_v37, %v1709_v17 }
 0x1fb   :  { %v1732_v49 = vrot.slane %v1723_v57, 6 }
 0x1fd   :  { %v1734_v42 = vsel %vm1733_vm6, %v1732_v49, %v1731_v41  ;;  %v7402_v41 = vld [vmem:[#allocation2] sm:$0xf] }
 0x1fe   :  { %v1737_v15 = vsel %vm1736_vm7, %v1735_v1, %v1734_v42 }
 0x1ff   :  { %v1740_v9 = vsel %vm1739_vm8, %v1737_v15, 0.0 }
 0x200   :  { %1741 = vadd.xlane.f32.xlu0 %v1740_v9 }
 0x289   :  { %v1742_v43 = vpop.xlane.xlu0 %1741 }
 0x28a   :  { %v1744_v50 = vadd.f32 %v1743_v5, %v1742_v43 }
 0x28c   :  { %1747 = vperm.xlu1 %6832, %v1744_v50  }
 0x307   :  { %v1748_v20 = vpop.permute.xlu1 %1747 }
 0x308   :  { %v1754_v19 = vmul.f32 %v8106_v60, %v1748_v20  ;;  %v8129_v20 = vld [vmem:[%s9389_s2 + $0x70] sm:$0xff] }
 0x309   :  { %9469 = vst [vmem:[#allocation15_spill] sm:$0xff] %v8129_v20 }
 0x30a   :  { %v1755_v59 = vadd.f32 %v1754_v19, %v7717_v30  ;;  %v9470_v19 = vmov 0.0  }
 0x30c   :  { %v1760_v51 = vadd.f32 %v8112_v0, %v1755_v59  ;;  %v8136_v59 = vld [vmem:[%s9389_s2 + $0x68] sm:$0xff] }
 0x30d   :  { %9471 = vst [vmem:[#allocation16_spill] sm:$0xff] %v8136_v59 }
 0x30e   :  { %6910 = vtanh.f32 %v1760_v51  ;;  %v6784_v17 = vmul.f32 -1.442695, %v1760_v51  ;;  %v8142_v51 = vld [vmem:[%s9389_s2 + $0x60] sm:$0xff] }
 0x30f   :  { %9472 = vst [vmem:[#allocation17_spill] sm:$0xff] %v8142_v51 }
 0x310   :  { %6912 = vpow2.f32 %v6784_v17  ;;  %v8154_v17 = vld [vmem:[%s9389_s2 + $0x50] sm:$0xff] }
 0x311   :  { %9474 = vst [vmem:[#allocation19_spill] sm:$0xff] %v8154_v17 }
 0x31b   :  { %v6911_v6 = vpop.eup %6910 }
 0x31c   :  { %1770 = vrot.lane.b32.xlu0 %v6911_v6, %s7458_s11  ;;  %v8148_v6 = vld [vmem:[%s9389_s2 + $0x58] sm:$0xff] }
 0x31d   :  { %v6913_v46 = vpop.eup %6912  ;;  %9473 = vst [vmem:[#allocation18_spill] sm:$0xff] %v8148_v6 }
 0x31e   :  { %v1764_v57 = vadd.f32 1.0, %v6913_v46  ;;  %v8160_v46 = vld [vmem:[%s9389_s2 + $0x48] sm:$0xff] }
 0x31f   :  { %9475 = vst [vmem:[#allocation20_spill] sm:$0xff] %v8160_v46 }
 0x320   :  { %6914 = vrcp.f32 %v1764_v57  ;;  %v8166_v57 = vld [vmem:[%s9389_s2 + $0x40] sm:$0xff] }
 0x321   :  { %9476 = vst [vmem:[#allocation21_spill] sm:$0xff] %v8166_v57 }
 0x32d   :  { %v6915_v3 = vpop.eup %6914 }
 0x32e   :  { %v1768_v42 = vmul.f32 %v7402_v41, %v6915_v3  ;;  %v8190_v41 = vld [vmem:[%s9389_s2 + $0x20] sm:$0xff] }
 0x32f   :  { %9480 = vst [vmem:[#allocation25_spill] sm:$0xff] %v8190_v41 }
 0x38e   :  { %v1771_v1 = vpop.permute.xlu0 %1770 }
 0x38f   :  { %v1773_v49 = vmul.f32 %v6915_v3, %v1771_v1  ;;  %v8178_v1 = vld [vmem:[%s9389_s2 + $0x30] sm:$0xff] }
 0x390   :  { %9478 = vst [vmem:[#allocation23_spill] sm:$0xff] %v8178_v1 }
 0x391   :  { %1775 = vrot.lane.b32.xlu1 %v1773_v49, %s7458_s11  ;;  %v8184_v49 = vld [vmem:[%s9389_s2 + $0x28] sm:$0xff] }
 0x392   :  { %9479 = vst [vmem:[#allocation24_spill] sm:$0xff] %v8184_v49 }
 0x403   :  { %v1776_v30 = vpop.permute.xlu1 %1775 }
 0x404   :  { %v1778_v15 = vadd.f32 %v1776_v30, %v1768_v42  ;;  %v8196_v42 = vld [vmem:[%s9389_s2 + $0x18] sm:$0xff]  ;;  %v8202_v30 = vld [vmem:[%s9389_s2 + $0x10] sm:$0xff] }
 0x405   :  { %9481 = vst [vmem:[#allocation26_spill] sm:$0xff] %v8196_v42  ;;  %9482 = vst [vmem:[#allocation27_spill] sm:$0xff] %v8202_v30 }
 0x406   :  { %6916 = vtanh.f32 %v1778_v15 }
 0x413   :  { %v6917_v9 = vpop.eup %6916 }
 0x414   :  { %1781 = vrot.lane.b32.xlu1 %v6917_v9, %s7458_s11  ;;  %v8214_v9 = vld [vmem:[%s9389_s2] sm:$0xff] }
 0x415   :  { %9484 = vst [vmem:[#allocation29_spill] sm:$0xff] %v8214_v9 }
 0x486   :  { %v1782_v62 = vpop.permute.xlu1 %1781 }
 0x487   :  { %v1784_v5 = vmul.f32 %v6915_v3, %v1782_v62  ;;  %v8172_v3 = vld [vmem:[%s9389_s2 + $0x38] sm:$0xff] }
 0x488   :  { %9477 = vst [vmem:[#allocation22_spill] sm:$0xff] %v8172_v3  ;;  %v8220_v62 = vld [vmem:[%s9389_s2 + $0x78] sm:$0xff] }
 0x489   :  { %1786 = vrot.lane.b32.xlu1 %v1784_v5, %s7459_s12  ;;  %9485 = vst [vmem:[#allocation30_spill] sm:$0xff] %v8220_v62 }
 0x4fb   :  { %v1787_v43 = vpop.permute.xlu1 %1786 }
 0x4fc   :  { %1789 = vst.msk [vmem:[#allocation2] sm:$0xf] %vm1739_vm8, %v1787_v43 }
 0x4fd   :  { %1791 = vst.msk [vmem:[#allocation2] sm:$0xf] %vm1790_vm9, %v1778_v15  ;;  %v8208_v15 = vld [vmem:[%s9389_s2 + $0x8] sm:$0xff] }
 0x4fe   :  { %9483 = vst [vmem:[#allocation28_spill] sm:$0xff] %v8208_v15 }
 0x504   :  { %v8122_v50 = vld [vmem:[#allocation2] sm:$0xf] }
 0x505   :  { %9468 = vst [vmem:[#allocation14_spill] sm:$0xff] %v8122_v50  ;;  %6785 = vmatmul.mubr.msk.f32.vlgmr.msra.gmra.mxu0 %vm891_vm1, %v8122_v50 }
 0x506   :  { %3459 = vmatpush1.msra.mxu0 %v8129_v20  ;;  %3506 = vmatprep.mubr.f32.mxu0 %v9470_v19 }
 0x507   :  { %3460 = vmatprep.subr.mxu0 %v8136_v59 }
 0x508   :  { %3461 = vmatpush1.msra.mxu0 %v8142_v51 }
 0x509   :  { %3462 = vmatprep.subr.mxu0 %v8148_v6 }
 0x50a   :  { %3463 = vmatpush1.msra.mxu0 %v8154_v17 }
 0x50b   :  { %3464 = vmatprep.subr.mxu0 %v8160_v46 }
 0x50c   :  { %3465 = vmatpush1.msra.mxu0 %v8166_v57 }
 0x50d   :  { %3466 = vmatprep.subr.mxu0 %v8172_v3 }
 0x50e   :  { %3467 = vmatpush1.msra.mxu0 %v8178_v1 }
 0x50f   :  { %3468 = vmatprep.subr.mxu0 %v8184_v49 }
 0x510   :  { %3469 = vmatpush1.msra.mxu0 %v8190_v41 }
 0x511   :  { %3470 = vmatprep.subr.mxu0 %v8196_v42 }
 0x512   :  { %3471 = vmatpush1.msra.mxu0 %v8202_v30 }
 0x513   :  { %3472 = vmatprep.subr.mxu0 %v8208_v15 }
 0x514   :  { %3473 = vmatpush1.msra.mxu0 %v8214_v9 }
 0x515   :  { %5104 = vmatprep.subr.mxu0 %v8220_v62 }
 0x5c5   :  { %v8223_v5 = vpop.f32.mrf.mxu0 }
 0x5c6   :  { %9486 = vst [vmem:[#allocation31_spill] sm:$0xff] %v8223_v5 }
 0x5c7   :  { %v1864_v43 = vpop.f32.mrf.mxu0 }
 0x5c8   :  { %v1874_v30 = vrot.slane %v1864_v43, %v7534_v13 }
 0x5ca   :  { %v1882_v15 = vrot.slane %v1874_v30, %v7534_v13  ;;  %v1875_v42 = vcombine.high %v1874_v30, %v1874_v30 }
 0x5cc   :  { %v1895_v41 = vrot.slane %v1882_v15, %v7720_v33  ;;  %v1889_v49 = vrot.slane %v1875_v42, %v7534_v13  ;;  %v1890_v46 = vcombine.high %v1882_v15, %v1882_v15 }
 0x5ce   :  { %v1915_v9 = vrot.slane %v1895_v41, %v7534_v13  ;;  %v1908_v1 = vcombine.high %v1895_v41, %v1895_v41  ;;  %v1899_v3 = vrot.slane %v1889_v49, %v7720_v33  ;;  %v1903_v51 = vrot.slane %v1890_v46, %v7720_v33 }
 0x5cf   :  { %v1891_v20 = vcombine.high %v1889_v49, %v1889_v49 }
 0x5d0   :  { %v1923_v57 = vcombine.high %v1915_v9, %v1915_v9  ;;  %v1922_v62 = vrot.slane %v1908_v1, %v7534_v13  ;;  %v1931_v17 = vrot.slane %v1915_v9, %v7534_v13  ;;  %v1963_v43 = vrot.slane %v1899_v3, %v7534_v13 }
 0x5d1   :  { %v1956_v30 = vcombine.high %v1899_v3, %v1899_v3  ;;  %v1907_v49 = vrot.slane %v1891_v20, %v7720_v33 }
 0x5d2   :  { %v1945_v6 = vrot.slane %v1923_v57, %v7534_v13  ;;  %v1924_v59 = vcombine.high %v1922_v62, %v1922_v62  ;;  %v1938_v42 = vrot.slane %v1922_v62, %v7534_v13  ;;  %v1953_v19 = vcombine.high %v1931_v17, %v1931_v17 }
 0x5d3   :  { %v1971_v41 = vcombine.high %v1963_v43, %v1963_v43  ;;  %v1970_v15 = vrot.slane %v1956_v30, %v7534_v13  ;;  %v2128_v1 = vadd.f32 %v1931_v17, %v7812_v4  ;;  %v1979_v0 = vrot.slane %v1963_v43, %v7534_v13 }
 0x5d4   :  { %v1955_v50 = vcombine.high %v1945_v6, %v1945_v6  ;;  %v1952_v9 = vrot.slane %v1924_v59, %v7534_v13  ;;  %v2011_v57 = vrot.slane %v1903_v51, %v7534_v13  ;;  %v2129_v3 = vadd.f32 %v1945_v6, %v7830_v2 }
 0x5d5   :  { %v1954_v46 = vcombine.high %v1938_v42, %v1938_v42  ;;  %v1993_v5 = vrot.slane %v1971_v41, %v7534_v13  ;;  %v2004_v62 = vcombine.high %v1903_v51, %v1903_v51  ;;  %v2130_v60 = vadd.f32 %v1953_v19, %v7837_v14 }
 0x5d6   :  { %v1972_v37 = vcombine.high %v1970_v15, %v1970_v15  ;;  %v2131_v30 = vadd.f32 %v1955_v50, %v7845_v29  ;;  %v1986_v17 = vrot.slane %v1970_v15, %v7534_v13  ;;  %v2132_v59 = vadd.f32 %v1938_v42, %v7833_v12 }
 0x5d7   :  { %6918 = vtanh.f32 %v2128_v1  ;;  %v2001_v43 = vcombine.high %v1979_v0, %v1979_v0  ;;  %v2019_v4 = vcombine.high %v2011_v57, %v2011_v57  ;;  %v2133_v6 = vadd.f32 %v1952_v9, %v7841_v25 }
 0x5d8   :  { %6920 = vtanh.f32 %v2129_v3  ;;  %v2003_v2 = vcombine.high %v1993_v5, %v1993_v5  ;;  %v2018_v51 = vrot.slane %v2004_v62, %v7534_v13  ;;  %v2134_v19 = vadd.f32 %v1954_v46, %v7863_v28 }
 0x5d9   :  { %6922 = vtanh.f32 %v2130_v60  ;;  %v2000_v20 = vrot.slane %v1972_v37, %v7534_v13  ;;  %v2052_v41 = vcombine.high %v1907_v49, %v1907_v49  ;;  %v2135_v50 = vadd.f32 %v1979_v0, %v7869_v10 }
 0x5da   :  { %6924 = vtanh.f32 %v2131_v30  ;;  %v2027_v42 = vrot.slane %v2011_v57, %v7534_v13  ;;  %v2059_v15 = vrot.slane %v1907_v49, %v7534_v13  ;;  %v2136_v1 = vadd.f32 %v1993_v5, %v7855_v36 }
 0x5db   :  { %6926 = vtanh.f32 %v2132_v59  ;;  %v2002_v9 = vcombine.high %v1986_v17, %v1986_v17  ;;  %v2041_v3 = vrot.slane %v2019_v4, %v7534_v13  ;;  %v2137_v62 = vadd.f32 %v2001_v43, %v7859_v39 }
 0x5dc   :  { %6928 = vtanh.f32 %v2133_v6  ;;  %v2020_v60 = vcombine.high %v2018_v51, %v2018_v51  ;;  %v2138_v37 = vadd.f32 %v2003_v2, %v7882_v61  ;;  %v2034_v0 = vrot.slane %v2018_v51, %v7534_v13 }
 0x5dd   :  { %6930 = vtanh.f32 %v2134_v19  ;;  %v2066_v46 = vrot.slane %v2052_v41, %v7534_v13  ;;  %v2139_v57 = vadd.f32 %v1986_v17, %v7886_v53  ;;  %v2049_v49 = vcombine.high %v2027_v42, %v2027_v42 }
 0x5de   :  { %6932 = vtanh.f32 %v2135_v50  ;;  %v2067_v5 = vcombine.high %v2059_v15, %v2059_v15  ;;  %v2140_v30 = vadd.f32 %v2000_v20, %v7910_v18  ;;  %v2051_v4 = vcombine.high %v2041_v3, %v2041_v3 }
 0x5df   :  { %6934 = vtanh.f32 %v2136_v1  ;;  %v2141_v59 = vadd.f32 %v2002_v9, %v7903_v7  ;;  %v2048_v43 = vrot.slane %v2020_v60, %v7534_v13  ;;  %v2075_v2 = vrot.slane %v2059_v15, %v7534_v13 }
 0x5e0   :  { %6936 = vtanh.f32 %v2137_v62  ;;  %v2142_v6 = vadd.f32 %v2027_v42, %v7945_v44  ;;  %v2068_v51 = vcombine.high %v2066_v46, %v2066_v46  ;;  %v2082_v17 = vrot.slane %v2066_v46, %v7534_v13 }
 0x5e1   :  { %6938 = vtanh.f32 %v2138_v37  ;;  %v2143_v19 = vadd.f32 %v2041_v3, %v7967_v63  ;;  %v2050_v41 = vcombine.high %v2034_v0, %v2034_v0  ;;  %v2089_v20 = vrot.slane %v2067_v5, %v7534_v13 }
 0x5e2   :  { %6940 = vtanh.f32 %v2139_v57  ;;  %v2144_v50 = vadd.f32 %v2049_v49, %v7939_v45  ;;  %v2145_v9 = vadd.f32 %v2051_v4, %v7957_v55  ;;  %v2097_v62 = vcombine.high %v2075_v2, %v2075_v2 }
 0x5e3   :  { %6942 = vtanh.f32 %v2140_v30  ;;  %v2146_v42 = vadd.f32 %v2034_v0, %v7971_v48  ;;  %v2096_v37 = vrot.slane %v2068_v51, %v7534_v13  ;;  %v2098_v3 = vcombine.high %v2082_v17, %v2082_v17 }
 0x5e4   :  { %v6919_v1 = vpop.eup %6918  ;;  %6944 = vtanh.f32 %v2141_v59  ;;  %v2147_v46 = vadd.f32 %v2048_v43, %v7980_v24  ;;  %v2099_v5 = vcombine.high %v2089_v20, %v2089_v20  ;;  %v2148_v49 = vadd.f32 %v2050_v41, %v7891_v31 }
 0x5e5   :  { %v6921_v15 = vpop.eup %6920  ;;  %6946 = vtanh.f32 %v2142_v6  ;;  %v2149_v30 = vadd.f32 %v2075_v2, %v7896_v16  ;;  %v2150_v48 = vadd.f32 %v2089_v20, %v7918_v27  ;;  %v2151_v43 = vadd.f32 %v2097_v62, %v7927_v58 }
 0x5e6   :  { %v6923_v60 = vpop.eup %6922  ;;  %6948 = vtanh.f32 %v2143_v19  ;;  %v2185_v59 = vmul.f32 %v6921_v15, %v7761_v38  ;;  %v2184_v19 = vmul.f32 %v6919_v1, %v7752_v8  ;;  %v2153_v16 = vadd.f32 %v2082_v17, %v7923_v40 }
 0x5e7   :  { %v6925_v57 = vpop.eup %6924  ;;  %6950 = vtanh.f32 %v2144_v50  ;;  %v2186_v0 = vmul.f32 %v6923_v60, %v7771_v23  ;;  %v2152_v60 = vadd.f32 %v2099_v5, %v7913_v34  ;;  %v2154_v1 = vadd.f32 %v2096_v37, %v7949_v52 }
 0x5e8   :  { %v6927_v4 = vpop.eup %6926  ;;  %6952 = vtanh.f32 %v2145_v9  ;;  %v2187_v6 = vmul.f32 %v6925_v57, %v7794_v47  ;;  %v2240_v20 = vcombine.low %v2184_v19, %v2185_v59 }
 0x5e9   :  { %v6929_v51 = vpop.eup %6928  ;;  %6954 = vtanh.f32 %v2146_v42  ;;  %v2188_v2 = vmul.f32 %v6927_v4, %v7755_v11 }
 0x5ea   :  { %v6931_v41 = vpop.eup %6930  ;;  %6956 = vtanh.f32 %v2147_v46  ;;  %v2189_v50 = vmul.f32 %v6929_v51, %v7767_v22  ;;  %v2241_v9 = vcombine.low %v2186_v0, %v2187_v6  ;;  %v2155_v0 = vadd.f32 %v2098_v3, %v7954_v54 }
 0x5eb   :  { %v6933_v15 = vpop.eup %6932  ;;  %6958 = vtanh.f32 %v2148_v49  ;;  %v2190_v5 = vmul.f32 %v6931_v41, %v7775_v26  ;;  %v2249_v6 = vrot.slane %v2240_v20, %v7534_v13 }
 0x5ec   :  { %v6935_v57 = vpop.eup %6934  ;;  %6960 = vtanh.f32 %v2149_v30  ;;  %v2242_v62 = vcombine.low %v2188_v2, %v2189_v50  ;;  %v2191_v46 = vmul.f32 %v6933_v15, %v7752_v8  ;;  %v2256_v49 = vrot.slane %v2241_v9, %v7534_v13 }
 0x5ed   :  { %v6937_v42 = vpop.eup %6936  ;;  %6962 = vtanh.f32 %v2150_v48  ;;  %v2192_v4 = vmul.f32 %v6935_v57, %v7761_v38  ;;  %v2270_v15 = vrot.slane %v2190_v5, %v7534_v13 }
 0x5ee   :  { %v6939_v51 = vpop.eup %6938  ;;  %6964 = vtanh.f32 %v2151_v43  ;;  %v2193_v30 = vmul.f32 %v6937_v42, %v7771_v23  ;;  %v2263_v19 = vrot.slane %v2242_v62, %v7534_v13  ;;  %v2271_v62 = vcombine.low %v2249_v6, %v2256_v49 }
 0x5ef   :  { %v6941_v17 = vpop.eup %6940  ;;  %6966 = vtanh.f32 %v2152_v60  ;;  %v2194_v59 = vmul.f32 %v6939_v51, %v7794_v47  ;;  %v2288_v37 = vcombine.low %v2191_v46, %v2192_v4 }
 0x5f0   :  { %v6943_v48 = vpop.eup %6942  ;;  %6968 = vtanh.f32 %v2153_v16  ;;  %v2195_v3 = vmul.f32 %v6941_v17, %v7755_v11  ;;  %v2272_v4 = vcombine.low %v2263_v19, %v2270_v15 }
 0x5f1   :  { %v6945_v2 = vpop.eup %6944  ;;  %6970 = vtanh.f32 %v2154_v1  ;;  %v2196_v43 = vmul.f32 %v6943_v48, %v7767_v22  ;;  %v2289_v41 = vcombine.low %v2193_v30, %v2194_v59  ;;  %v2297_v16 = vrot.slane %v2288_v37, %v7534_v13 }
 0x5f2   :  { %v6947_v50 = vpop.eup %6946  ;;  %6972 = vtanh.f32 %v2155_v0  ;;  %v2197_v9 = vmul.f32 %v6945_v2, %v7775_v26 }
 0x5f3   :  { %v6949_v60 = vpop.eup %6948  ;;  %v2290_v57 = vcombine.low %v2195_v3, %v2196_v43  ;;  %v2304_v20 = vrot.slane %v2289_v41, %v7534_v13  ;;  %v2198_v1 = vmul.f32 %v6947_v50, %v7752_v8  ;;  %v2279_v3 = vrot.slane %v2271_v62, %v7534_v13 }
 0x5f4   :  { %v6951_v42 = vpop.eup %6950  ;;  %v2199_v46 = vmul.f32 %v6949_v60, %v7761_v38  ;;  %v2318_v17 = vrot.slane %v2197_v9, %v7534_v13  ;;  %v2286_v9 = vrot.slane %v2272_v4, %v7534_v13 }
 0x5f5   :  { %v6953_v51 = vpop.eup %6952  ;;  %v2311_v0 = vrot.slane %v2290_v57, %v7534_v13  ;;  %v2319_v30 = vcombine.low %v2297_v16, %v2304_v20  ;;  %v2200_v59 = vmul.f32 %v6951_v42, %v7771_v23 }
 0x5f6   :  { %v6955_v5 = vpop.eup %6954  ;;  %v2201_v37 = vmul.f32 %v6953_v51, %v7794_v47  ;;  %v2336_v48 = vcombine.low %v2198_v1, %v2199_v46 }
 0x5f7   :  { %v6957_v2 = vpop.eup %6956  ;;  %v2320_v49 = vcombine.low %v2311_v0, %v2318_v17  ;;  %v2327_v6 = vrot.slane %v2319_v30, %v7534_v13  ;;  %v2202_v19 = vmul.f32 %v6955_v5, %v7755_v11 }
 0x5f8   :  { %v6959_v43 = vpop.eup %6958  ;;  %v2203_v41 = vmul.f32 %v6957_v2, %v7767_v22  ;;  %v2337_v50 = vcombine.low %v2200_v59, %v2201_v37  ;;  %v2345_v42 = vrot.slane %v2336_v48, %v7534_v13  ;;  %v2287_v59 = vcombine.low %v2279_v3, %v2286_v9 }
 0x5f9   :  { %v6961_v15 = vpop.eup %6960  ;;  %v2204_v60 = vmul.f32 %v6959_v43, %v7775_v26  ;;  %v2334_v57 = vrot.slane %v2320_v49, %v7534_v13 }
 0x5fa   :  { %v6963_v16 = vpop.eup %6962  ;;  %v2338_v20 = vcombine.low %v2202_v19, %v2203_v41  ;;  %v2352_v1 = vrot.slane %v2337_v50, %v7534_v13  ;;  %v2205_v51 = vmul.f32 %v6961_v15, %v7752_v8 }
 0x5fb   :  { %v6965_v62 = vpop.eup %6964  ;;  %v2335_v46 = vcombine.low %v2327_v6, %v2334_v57  ;;  %v2206_v0 = vmul.f32 %v6963_v16, %v7761_v38  ;;  %v2366_v30 = vrot.slane %v2204_v60, %v7534_v13  ;;  %v2436_v16 = vsel %vm1595_vm3, %v2287_v59, 0.0 }
 0x5fc   :  { %v6967_v17 = vpop.eup %6966  ;;  %v2359_v4 = vrot.slane %v2338_v20, %v7534_v13  ;;  %v2367_v5 = vcombine.low %v2345_v42, %v2352_v1  ;;  %v2207_v48 = vmul.f32 %v6965_v62, %v7771_v23 }
 0x5fd   :  { %v6969_v37 = vpop.eup %6968  ;;  %v2439_v2 = vsel %vm1595_vm3, %v2335_v46, 0.0  ;;  %v2208_v49 = vmul.f32 %v6967_v17, %v7794_v47  ;;  %v2384_v43 = vcombine.low %v2205_v51, %v2206_v0 }
 0x5fe   :  { %v6971_v6 = vpop.eup %6970  ;;  %v2368_v19 = vcombine.low %v2359_v4, %v2366_v30  ;;  %v2375_v41 = vrot.slane %v2367_v5, %v7534_v13  ;;  %2440 = vadd.xlane.f32.xlu0 %v2439_v2  ;;  %v2209_v15 = vmul.f32 %v6969_v37, %v7755_v11 }
 0x5ff   :  { %v6973_v50 = vpop.eup %6972  ;;  %v2210_v60 = vmul.f32 %v6971_v6, %v7767_v22  ;;  %v2385_v57 = vcombine.low %v2207_v48, %v2208_v49  ;;  %v2393_v42 = vrot.slane %v2384_v43, %v7534_v13 }
 0x600   :  { %v2382_v3 = vrot.slane %v2368_v19, %v7534_v13  ;;  %v2211_v9 = vmul.f32 %v6973_v50, %v7775_v26 }
 0x601   :  { %v2386_v20 = vcombine.low %v2209_v15, %v2210_v60  ;;  %v2400_v1 = vrot.slane %v2385_v57, %v7534_v13 }
 0x602   :  { %v2383_v62 = vcombine.low %v2375_v41, %v2382_v3  ;;  %2437 = vadd.xlane.f32.xlu0 %v2436_v16  ;;  %v2414_v51 = vrot.slane %v2211_v9, %v7534_v13 }
 0x603   :  { %v2407_v46 = vrot.slane %v2386_v20, %v7534_v13  ;;  %v2415_v0 = vcombine.low %v2393_v42, %v2400_v1 }
 0x604   :  { %v2442_v17 = vsel %vm1595_vm3, %v2383_v62, 0.0 }
 0x605   :  { %2443 = vadd.xlane.f32.xlu1 %v2442_v17  ;;  %v2416_v4 = vcombine.low %v2407_v46, %v2414_v51  ;;  %v2423_v30 = vrot.slane %v2415_v0, %v7534_v13 }
 0x607   :  { %v2430_v5 = vrot.slane %v2416_v4, %v7534_v13 }
 0x609   :  { %v2431_v59 = vcombine.low %v2423_v30, %v2430_v5 }
 0x60b   :  { %v2445_v37 = vsel %vm1595_vm3, %v2431_v59, 0.0 }
 0x60c   :  { %2446 = vadd.xlane.f32.xlu0 %v2445_v37 }
 0x687   :  { %v2441_v2 = vpop.xlane.xlu0 %2440 }
 0x688   :  { %v2455_v48 = vsel %vm1608_vm4, %v2441_v2, -inf }
 0x689   :  { %v2456_v49 = vrot.slane %v2455_v48, 4 }
 0x68b   :  { %v2457_v43 = vmax.f32 %v2455_v48, %v2456_v49  ;;  %v2438_v6 = vpop.xlane.xlu0 %2437 }
 0x68c   :  { %v2448_v19 = vsel %vm1608_vm4, %v2438_v6, -inf }
 0x68d   :  { %v2458_v41 = vrot.slane %v2457_v43, 2  ;;  %v2449_v50 = vrot.slane %v2448_v19, 4 }
 0x68e   :  { %v2444_v15 = vpop.xlane.xlu1 %2443 }
 0x68f   :  { %v2462_v60 = vsel %vm1608_vm4, %v2444_v15, -inf  ;;  %v2459_v57 = vmax.f32 %v2457_v43, %v2458_v41  ;;  %v2450_v3 = vmax.f32 %v2448_v19, %v2449_v50 }
 0x690   :  { %v2463_v9 = vrot.slane %v2462_v60, 4 }
 0x691   :  { %v2460_v16 = vrot.slane %v2459_v57, 1  ;;  %v2451_v20 = vrot.slane %v2450_v3, 2 }
 0x692   :  { %v2464_v42 = vmax.f32 %v2462_v60, %v2463_v9 }
 0x693   :  { %v2461_v1 = vmax.f32 %v2459_v57, %v2460_v16  ;;  %v2452_v62 = vmax.f32 %v2450_v3, %v2451_v20 }
 0x694   :  { %v2465_v46 = vrot.slane %v2464_v42, 2 }
 0x695   :  { %v2477_v51 = vsub.f32 %v2441_v2, %v2461_v1  ;;  %v2453_v0 = vrot.slane %v2452_v62, 1  ;;  %v2447_v17 = vpop.xlane.xlu0 %2446 }
 0x696   :  { %v2466_v4 = vmax.f32 %v2464_v42, %v2465_v46  ;;  %v2469_v30 = vsel %vm1608_vm4, %v2447_v17, -inf }
 0x697   :  { %v2482_v5 = vmul.f32 1.442695, %v2477_v51  ;;  %v2454_v59 = vmax.f32 %v2452_v62, %v2453_v0  ;;  %v2470_v37 = vrot.slane %v2469_v30, 4 }
 0x698   :  { %v2467_v48 = vrot.slane %v2466_v4, 1 }
 0x699   :  { %6974 = vpow2.f32 %v2482_v5  ;;  %v2476_v49 = vsub.f32 %v2438_v6, %v2454_v59  ;;  %v2471_v43 = vmax.f32 %v2469_v30, %v2470_v37 }
 0x69a   :  { %v2468_v19 = vmax.f32 %v2466_v4, %v2467_v48 }
 0x69b   :  { %v2480_v41 = vmul.f32 1.442695, %v2476_v49  ;;  %v2472_v50 = vrot.slane %v2471_v43, 2 }
 0x69c   :  { %v2478_v60 = vsub.f32 %v2444_v15, %v2468_v19 }
 0x69d   :  { %6976 = vpow2.f32 %v2480_v41  ;;  %v2473_v57 = vmax.f32 %v2471_v43, %v2472_v50 }
 0x69e   :  { %v2484_v3 = vmul.f32 1.442695, %v2478_v60 }
 0x69f   :  { %v2474_v2 = vrot.slane %v2473_v57, 1 }
 0x6a0   :  { %6978 = vpow2.f32 %v2484_v3 }
 0x6a1   :  { %v2475_v9 = vmax.f32 %v2473_v57, %v2474_v2 }
 0x6a3   :  { %v2479_v16 = vsub.f32 %v2447_v17, %v2475_v9 }
 0x6a5   :  { %v2486_v20 = vmul.f32 1.442695, %v2479_v16 }
 0x6a6   :  { %v6975_v42 = vpop.eup %6974 }
 0x6a7   :  { %v2495_v1 = vsel %vm1608_vm4, %v6975_v42, 0.0  ;;  %6980 = vpow2.f32 %v2486_v20 }
 0x6a8   :  { %v2496_v62 = vrot.slane %v2495_v1, 4 }
 0x6aa   :  { %v6977_v46 = vpop.eup %6976  ;;  %v2497_v6 = vadd.f32 %v2496_v62, %v2495_v1 }
 0x6ab   :  { %v2488_v51 = vsel %vm1608_vm4, %v6977_v46, 0.0 }
 0x6ac   :  { %v2498_v0 = vrot.slane %v2497_v6, 2  ;;  %v2489_v4 = vrot.slane %v2488_v51, 4 }
 0x6ad   :  { %v6979_v15 = vpop.eup %6978 }
 0x6ae   :  { %v2502_v30 = vsel %vm1608_vm4, %v6979_v15, 0.0  ;;  %v2499_v5 = vadd.f32 %v2498_v0, %v2497_v6  ;;  %v2490_v59 = vadd.f32 %v2489_v4, %v2488_v51 }
 0x6af   :  { %v2503_v37 = vrot.slane %v2502_v30, 4 }
 0x6b0   :  { %v2500_v48 = vrot.slane %v2499_v5, 1  ;;  %v2491_v17 = vrot.slane %v2490_v59, 2 }
 0x6b1   :  { %v2504_v49 = vadd.f32 %v2503_v37, %v2502_v30 }
 0x6b2   :  { %v2501_v43 = vadd.f32 %v2500_v48, %v2499_v5  ;;  %v2492_v19 = vadd.f32 %v2491_v17, %v2490_v59 }
 0x6b3   :  { %v2505_v41 = vrot.slane %v2504_v49, 2 }
 0x6b4   :  { %v6981_v50 = vpop.eup %6980  ;;  %6982 = vrcp.f32 %v2501_v43  ;;  %v2493_v60 = vrot.slane %v2492_v19, 1 }
 0x6b5   :  { %v2506_v57 = vadd.f32 %v2505_v41, %v2504_v49  ;;  %v2509_v3 = vsel %vm1608_vm4, %v6981_v50, 0.0 }
 0x6b6   :  { %v2494_v2 = vadd.f32 %v2493_v60, %v2492_v19  ;;  %v2510_v9 = vrot.slane %v2509_v3, 4 }
 0x6b7   :  { %v2507_v16 = vrot.slane %v2506_v57, 1 }
 0x6b8   :  { %6984 = vrcp.f32 %v2494_v2  ;;  %v2511_v20 = vadd.f32 %v2510_v9, %v2509_v3 }
 0x6b9   :  { %v2508_v1 = vadd.f32 %v2507_v16, %v2506_v57 }
 0x6ba   :  { %v2512_v62 = vrot.slane %v2511_v20, 2 }
 0x6bb   :  { %6986 = vrcp.f32 %v2508_v1 }
 0x6bc   :  { %v2513_v6 = vadd.f32 %v2512_v62, %v2511_v20 }
 0x6be   :  { %v2514_v51 = vrot.slane %v2513_v6, 1 }
 0x6c0   :  { %v2515_v0 = vadd.f32 %v2514_v51, %v2513_v6 }
 0x6c1   :  { %v6983_v4 = vpop.eup %6982 }
 0x6c2   :  { %v2519_v30 = vmul.f32 %v6983_v4, %v6975_v42  ;;  %6988 = vrcp.f32 %v2515_v0 }
 0x6c4   :  { %v2525_v5 = vmul.f32 %v8068_v32, %v2519_v30 }
 0x6c5   :  { %v6985_v59 = vpop.eup %6984 }
 0x6c6   :  { %v2517_v37 = vmul.f32 %v6985_v59, %v6977_v46  ;;  %v2535_v48 = vsel %vm1595_vm3, %v2525_v5, 0.0 }
 0x6c7   :  { %v2536_v17 = vrot.slane %v2535_v48, 4 }
 0x6c8   :  { %v6987_v49 = vpop.eup %6986  ;;  %v2524_v43 = vmul.f32 %v8062_v21, %v2517_v37 }
 0x6c9   :  { %v2521_v19 = vmul.f32 %v6987_v49, %v6979_v15  ;;  %v2537_v41 = vadd.f32 %v2536_v17, %v2535_v48 }
 0x6ca   :  { %v2528_v60 = vsel %vm1595_vm3, %v2524_v43, 0.0 }
 0x6cb   :  { %v2526_v57 = vmul.f32 %v8083_v56, %v2521_v19  ;;  %v2529_v3 = vrot.slane %v2528_v60, 4  ;;  %v2538_v2 = vrot.slane %v2537_v41, 2  ;;  %v9487_v19 = vld [vmem:[#allocation11_spill] sm:$0xff] }
 0x6cd   :  { %v2530_v42 = vadd.f32 %v2529_v3, %v2528_v60  ;;  %v2542_v9 = vsel %vm1595_vm3, %v2526_v57, 0.0  ;;  %v2539_v20 = vadd.f32 %v2538_v2, %v2537_v41 }
 0x6ce   :  { %v2543_v32 = vrot.slane %v2542_v9, 4 }
 0x6cf   :  { %v6989_v16 = vpop.eup %6988  ;;  %v2531_v46 = vrot.slane %v2530_v42, 2  ;;  %v2540_v51 = vrot.slane %v2539_v20, 1 }
 0x6d0   :  { %v2523_v1 = vmul.f32 %v6989_v16, %v6981_v50  ;;  %v2544_v62 = vadd.f32 %v2543_v32, %v2542_v9 }
 0x6d1   :  { %v2532_v6 = vadd.f32 %v2531_v46, %v2530_v42  ;;  %v2541_v59 = vadd.f32 %v2540_v51, %v2539_v20 }
 0x6d2   :  { %v2527_v21 = vmul.f32 %v8076_v35, %v2523_v1  ;;  %v2545_v15 = vrot.slane %v2544_v62, 2  ;;  %v6786_v1 = vld [vmem:[%s9392_s1 + $0x4] sm:$0xf] }
 0x6d3   :  { %v2533_v56 = vrot.slane %v2532_v6, 1  ;;  %v2557_v50 = vmul.f32 %v9487_v19, %v2541_v59 }
 0x6d4   :  { %v2546_v0 = vadd.f32 %v2545_v15, %v2544_v62  ;;  %v2549_v4 = vsel %vm1595_vm3, %v2527_v21, 0.0  ;;  %v9488_v15 = vld [vmem:[#allocation12_spill] sm:$0xff] }
 0x6d5   :  { %v2550_v30 = vrot.slane %v2549_v4, 4  ;;  %v2534_v48 = vadd.f32 %v2533_v56, %v2532_v6  ;;  %v2564_v3 = vrot.slane %v2557_v50, 7  ;;  %v9490_v56 = vld [vmem:[#allocation13_spill] sm:$0xff] }
 0x6d6   :  { %v2547_v5 = vrot.slane %v2546_v0, 1 }
 0x6d7   :  { %v2551_v37 = vadd.f32 %v2550_v30, %v2549_v4  ;;  %v2556_v60 = vmul.f32 %v9487_v19, %v2534_v48 }
 0x6d8   :  { %v2548_v49 = vadd.f32 %v2547_v5, %v2546_v0  ;;  %v9489_v0 = vld [vmem:[#allocation31_spill] sm:$0xff] }
 0x6d9   :  { %v2552_v17 = vrot.slane %v2551_v37, 2  ;;  %v2565_v42 = vsel %vm1730_vm5, %v2564_v3, %v2556_v60 }
 0x6da   :  { %v2558_v35 = vmul.f32 %v9487_v19, %v2548_v49 }
 0x6db   :  { %v2553_v43 = vadd.f32 %v2552_v17, %v2551_v37 }
 0x6dc   :  { %v2566_v9 = vrot.slane %v2558_v35, 6 }
 0x6dd   :  { %v2554_v41 = vrot.slane %v2553_v43, 1 }
 0x6de   :  { %v2567_v16 = vsel %vm1733_vm6, %v2566_v9, %v2565_v42  ;;  %v9492_v9 = vld [vmem:[#allocation15_spill] sm:$0xff] }
 0x6df   :  { %v2555_v57 = vadd.f32 %v2554_v41, %v2553_v43 }
 0x6e1   :  { %v2559_v2 = vmul.f32 %v9487_v19, %v2555_v57  ;;  %v9491_v19 = vld [vmem:[#allocation14_spill] sm:$0xff] }
 0x6e3   :  { %v2568_v32 = vrot.slane %v2559_v2, 5 }
 0x6e5   :  { %v2569_v46 = vsel %vm1736_vm7, %v2568_v32, %v2567_v16  ;;  %v9493_v32 = vmov 0.0   ;;  %v9494_v16 = vld [vmem:[#allocation16_spill] sm:$0xff] }
 0x6e6   :  { %v2571_v20 = vsel %vm1739_vm8, %v2569_v46, 0.0  ;;  %v9495_v46 = vld [vmem:[#allocation17_spill] sm:$0xff] }
 0x6e7   :  { %2572 = vadd.xlane.f32.xlu0 %v2571_v20  ;;  %v9496_v20 = vld [vmem:[#allocation18_spill] sm:$0xff] }
 0x770   :  { %v2573_v62 = vpop.xlane.xlu0 %2572 }
 0x771   :  { %v2576_v6 = vadd.f32 %v6786_v1, %v2573_v62  ;;  %v9497_v1 = vld [vmem:[#allocation19_spill] sm:$0xff]  ;;  %v9498_v62 = vld [vmem:[#allocation20_spill] sm:$0xff] }
 0x773   :  { %2579 = vperm.xlu1 %6832, %v2576_v6   ;;  %v9499_v6 = vld [vmem:[#allocation21_spill] sm:$0xff] }
 0x7ee   :  { %v2580_v21 = vpop.permute.xlu1 %2579 }
 0x7ef   :  { %v2582_v51 = vmul.f32 %v9488_v15, %v2580_v21  ;;  %v9500_v21 = vld [vmem:[#allocation22_spill] sm:$0xff]  ;;  %v9501_v15 = vld [vmem:[#allocation23_spill] sm:$0xff] }
 0x7f1   :  { %v2583_v4 = vadd.f32 %v2582_v51, %v9489_v0  ;;  %v9502_v51 = vld [vmem:[#allocation24_spill] sm:$0xff]  ;;  %v9503_v0 = vld [vmem:[#allocation25_spill] sm:$0xff] }
 0x7f3   :  { %v2584_v30 = vadd.f32 %v9490_v56, %v2583_v4  ;;  %v9504_v4 = vld [vmem:[#allocation26_spill] sm:$0xff]  ;;  %v9505_v56 = vld [vmem:[#allocation27_spill] sm:$0xff] }
 0x7f5   :  { %6990 = vtanh.f32 %v2584_v30  ;;  %v6787_v59 = vmul.f32 -1.442695, %v2584_v30  ;;  %v9506_v30 = vld [vmem:[#allocation28_spill] sm:$0xff] }
 0x7f7   :  { %6992 = vpow2.f32 %v6787_v59  ;;  %v9508_v59 = vld [vmem:[#allocation30_spill] sm:$0xff] }
 0x802   :  { %v6991_v5 = vpop.eup %6990 }
 0x803   :  { %2594 = vrot.lane.b32.xlu0 %v6991_v5, %s7458_s11  ;;  %v9507_v5 = vld [vmem:[#allocation29_spill] sm:$0xff] }
 0x804   :  { %v6993_v37 = vpop.eup %6992 }
 0x805   :  { %v2588_v48 = vadd.f32 1.0, %v6993_v37 }
 0x807   :  { %6994 = vrcp.f32 %v2588_v48 }
 0x814   :  { %v6995_v17 = vpop.eup %6994 }
 0x815   :  { %v2592_v50 = vmul.f32 %v6995_v17, %v9491_v19 }
 0x875   :  { %v2595_v49 = vpop.permute.xlu0 %2594 }
 0x876   :  { %v2597_v43 = vmul.f32 %v6995_v17, %v2595_v49 }
 0x878   :  { %2599 = vrot.lane.b32.xlu1 %v2597_v43, %s7458_s11 }
 0x8ea   :  { %v2600_v41 = vpop.permute.xlu1 %2599 }
 0x8eb   :  { %v2602_v60 = vadd.f32 %v2600_v41, %v2592_v50 }
 0x8ed   :  { %6996 = vtanh.f32 %v2602_v60 }
 0x8fa   :  { %v6997_v35 = vpop.eup %6996 }
 0x8fb   :  { %2605 = vrot.lane.b32.xlu1 %v6997_v35, %s7458_s11 }
 0x96d   :  { %v2606_v57 = vpop.permute.xlu1 %2605 }
 0x96e   :  { %v2608_v3 = vmul.f32 %v6995_v17, %v2606_v57 }
 0x970   :  { %2610 = vrot.lane.b32.xlu1 %v2608_v3, %s7459_s12 }
 0x9e2   :  { %v2611_v2 = vpop.permute.xlu1 %2610 }
 0x9e3   :  { %2613 = vst.msk [vmem:[#allocation2] sm:$0xf] %vm1739_vm8, %v2611_v2 }
 0x9e4   :  { %2614 = vst.msk [vmem:[#allocation2] sm:$0xf] %vm1790_vm9, %v2602_v60 }
 0x9eb   :  { %v8377_v42 = vld [vmem:[#allocation2] sm:$0xf] }
 0x9ec   :  { %6788 = vmatmul.mubr.msk.f32.vlgmr.msra.gmra.mxu1 %vm891_vm1, %v8377_v42 }
 0x9ed   :  { %4282 = vmatpush1.msra.mxu1 %v9492_v9  ;;  %4329 = vmatprep.mubr.f32.mxu1 %v9493_v32 }
 0x9ee   :  { %4283 = vmatprep.subr.mxu1 %v9494_v16 }
 0x9ef   :  { %4284 = vmatpush1.msra.mxu1 %v9495_v46 }
 0x9f0   :  { %4285 = vmatprep.subr.mxu1 %v9496_v20 }
 0x9f1   :  { %4286 = vmatpush1.msra.mxu1 %v9497_v1 }
 0x9f2   :  { %4287 = vmatprep.subr.mxu1 %v9498_v62 }
 0x9f3   :  { %4288 = vmatpush1.msra.mxu1 %v9499_v6 }
 0x9f4   :  { %4289 = vmatprep.subr.mxu1 %v9500_v21 }
 0x9f5   :  { %4290 = vmatpush1.msra.mxu1 %v9501_v15 }
 0x9f6   :  { %4291 = vmatprep.subr.mxu1 %v9502_v51 }
 0x9f7   :  { %4292 = vmatpush1.msra.mxu1 %v9503_v0 }
 0x9f8   :  { %4293 = vmatprep.subr.mxu1 %v9504_v4 }
 0x9f9   :  { %4294 = vmatpush1.msra.mxu1 %v9505_v56  ;;  %v9509_v56 = vld [vmem:[#allocation4_spill] sm:$0xff] }
 0x9fa   :  { %4295 = vmatprep.subr.mxu1 %v9506_v30 }
 0x9fb   :  { %4296 = vmatpush1.msra.mxu1 %v9507_v5 }
 0x9fc   :  { %5927 = vmatprep.subr.mxu1 %v9508_v59 }
 0xaac   :  { %v8398_v37 = vpop.f32.mrf.mxu1 }
 0xaae   :  { %v2687_v48 = vpop.f32.mrf.mxu1 }
 0xaaf   :  { %v2697_v17 = vrot.slane %v2687_v48, %v7534_v13 }
 0xab1   :  { %v2705_v49 = vrot.slane %v2697_v17, %v7534_v13  ;;  %v2698_v43 = vcombine.high %v2697_v17, %v2697_v17  ;;  %v9510_v17 = vld [vmem:[#allocation5_spill] sm:$0xff] }
 0xab3   :  { %v2718_v19 = vrot.slane %v2705_v49, %v7720_v33  ;;  %v2712_v50 = vrot.slane %v2698_v43, %v7534_v13  ;;  %v2713_v3 = vcombine.high %v2705_v49, %v2705_v49 }
 0xab5   :  { %v2738_v41 = vrot.slane %v2718_v19, %v7534_v13  ;;  %v2731_v60 = vcombine.high %v2718_v19, %v2718_v19  ;;  %v2722_v35 = vrot.slane %v2712_v50, %v7720_v33  ;;  %v2726_v1 = vrot.slane %v2713_v3, %v7720_v33 }
 0xab6   :  { %v2714_v51 = vcombine.high %v2712_v50, %v2712_v50 }
 0xab7   :  { %v2746_v57 = vcombine.high %v2738_v41, %v2738_v41  ;;  %v2745_v2 = vrot.slane %v2731_v60, %v7534_v13  ;;  %v2754_v9 = vrot.slane %v2738_v41, %v7534_v13  ;;  %v2786_v16 = vrot.slane %v2722_v35, %v7534_v13 }
 0xab8   :  { %v2779_v20 = vcombine.high %v2722_v35, %v2722_v35  ;;  %v2834_v48 = vrot.slane %v2726_v1, %v7534_v13  ;;  %v2827_v41 = vcombine.high %v2726_v1, %v2726_v1  ;;  %v2730_v50 = vrot.slane %v2714_v51, %v7720_v33 }
 0xab9   :  { %v2768_v46 = vrot.slane %v2746_v57, %v7534_v13  ;;  %v2747_v62 = vcombine.high %v2745_v2, %v2745_v2  ;;  %v2761_v6 = vrot.slane %v2745_v2, %v7534_v13  ;;  %v2776_v21 = vcombine.high %v2754_v9, %v2754_v9 }
 0xaba   :  { %v2794_v15 = vcombine.high %v2786_v16, %v2786_v16  ;;  %v2793_v4 = vrot.slane %v2779_v20, %v7534_v13  ;;  %v2951_v30 = vadd.f32 %v2754_v9, %v9509_v56  ;;  %v2802_v59 = vrot.slane %v2786_v16, %v7534_v13 }
 0xabb   :  { %v2778_v0 = vcombine.high %v2768_v46, %v2768_v46  ;;  %v2775_v5 = vrot.slane %v2747_v62, %v7534_v13  ;;  %v2952_v49 = vadd.f32 %v2768_v46, %v9510_v17  ;;  %v2777_v43 = vcombine.high %v2761_v6, %v2761_v6 }
 0xabc   :  { %v2816_v19 = vrot.slane %v2794_v15, %v7534_v13  ;;  %v2953_v60 = vadd.f32 %v2776_v21, %v7837_v14  ;;  %v2795_v35 = vcombine.high %v2793_v4, %v2793_v4  ;;  %v2809_v3 = vrot.slane %v2793_v4, %v7534_v13 }
 0xabd   :  { %v2954_v57 = vadd.f32 %v2778_v0, %v7845_v29  ;;  %v2955_v2 = vadd.f32 %v2761_v6, %v7833_v12  ;;  %6998 = vtanh.f32 %v2951_v30  ;;  %v2824_v9 = vcombine.high %v2802_v59, %v2802_v59 }
 0xabe   :  { %v2842_v16 = vcombine.high %v2834_v48, %v2834_v48  ;;  %v2956_v46 = vadd.f32 %v2775_v5, %v7841_v25  ;;  %7000 = vtanh.f32 %v2952_v49  ;;  %v2826_v20 = vcombine.high %v2816_v19, %v2816_v19 }
 0xabf   :  { %v2841_v1 = vrot.slane %v2827_v41, %v7534_v13  ;;  %v2957_v62 = vadd.f32 %v2777_v43, %v7863_v28  ;;  %7002 = vtanh.f32 %v2953_v60  ;;  %v2823_v21 = vrot.slane %v2795_v35, %v7534_v13 }
 0xac0   :  { %v2875_v15 = vcombine.high %v2730_v50, %v2730_v50  ;;  %v2958_v51 = vadd.f32 %v2802_v59, %v7869_v10  ;;  %7004 = vtanh.f32 %v2954_v57  ;;  %v2850_v6 = vrot.slane %v2834_v48, %v7534_v13 }
 0xac1   :  { %v2882_v0 = vrot.slane %v2730_v50, %v7534_v13  ;;  %v2959_v4 = vadd.f32 %v2816_v19, %v7855_v36  ;;  %7006 = vtanh.f32 %v2955_v2  ;;  %v2825_v30 = vcombine.high %v2809_v3, %v2809_v3 }
 0xac2   :  { %v2864_v5 = vrot.slane %v2842_v16, %v7534_v13  ;;  %v2960_v49 = vadd.f32 %v2824_v9, %v7859_v39  ;;  %7008 = vtanh.f32 %v2956_v46  ;;  %v2843_v43 = vcombine.high %v2841_v1, %v2841_v1 }
 0xac3   :  { %v2961_v41 = vadd.f32 %v2826_v20, %v7882_v61  ;;  %7010 = vtanh.f32 %v2957_v62  ;;  %v2857_v59 = vrot.slane %v2841_v1, %v7534_v13  ;;  %v2889_v60 = vrot.slane %v2875_v15, %v7534_v13 }
 0xac4   :  { %v2962_v48 = vadd.f32 %v2809_v3, %v7886_v53  ;;  %7012 = vtanh.f32 %v2958_v51  ;;  %v2872_v50 = vcombine.high %v2850_v6, %v2850_v6  ;;  %v2890_v19 = vcombine.high %v2882_v0, %v2882_v0 }
 0xac5   :  { %v2963_v35 = vadd.f32 %v2823_v21, %v7910_v18  ;;  %7014 = vtanh.f32 %v2959_v4  ;;  %v2874_v57 = vcombine.high %v2864_v5, %v2864_v5  ;;  %v2964_v2 = vadd.f32 %v2825_v30, %v7903_v7 }
 0xac6   :  { %7016 = vtanh.f32 %v2960_v49  ;;  %v2871_v9 = vrot.slane %v2843_v43, %v7534_v13  ;;  %v2898_v16 = vrot.slane %v2882_v0, %v7534_v13  ;;  %v2965_v46 = vadd.f32 %v2850_v6, %v7945_v44  ;;  %v9511_v6 = vld [vmem:[#allocation10_spill] sm:$0xff] }
 0xac7   :  { %7018 = vtanh.f32 %v2961_v41  ;;  %v2891_v20 = vcombine.high %v2889_v60, %v2889_v60  ;;  %v2905_v3 = vrot.slane %v2889_v60, %v7534_v13  ;;  %v2966_v1 = vadd.f32 %v2864_v5, %v7967_v63 }
 0xac8   :  { %7020 = vtanh.f32 %v2962_v48  ;;  %v2873_v62 = vcombine.high %v2857_v59, %v2857_v59  ;;  %v2912_v21 = vrot.slane %v2890_v19, %v7534_v13  ;;  %v2967_v15 = vadd.f32 %v2872_v50, %v7939_v45 }
 0xac9   :  { %7022 = vtanh.f32 %v2963_v35  ;;  %v2968_v4 = vadd.f32 %v2874_v57, %v7957_v55  ;;  %v2920_v30 = vcombine.high %v2898_v16, %v2898_v16  ;;  %v2969_v49 = vadd.f32 %v2857_v59, %v9511_v6  ;;  %v9512_v35 = vld [vmem:[#allocation6_spill] sm:$0xff] }
 0xaca   :  { %v6999_v51 = vpop.eup %6998  ;;  %7024 = vtanh.f32 %v2964_v2  ;;  %v2919_v41 = vrot.slane %v2891_v20, %v7534_v13  ;;  %v2921_v5 = vcombine.high %v2905_v3, %v2905_v3  ;;  %v2970_v60 = vadd.f32 %v2871_v9, %v7980_v24 }
 0xacb   :  { %v7001_v0 = vpop.eup %7000  ;;  %7026 = vtanh.f32 %v2965_v46  ;;  %v2922_v19 = vcombine.high %v2912_v21, %v2912_v21  ;;  %v2971_v50 = vadd.f32 %v2873_v62, %v7891_v31  ;;  %v2972_v45 = vadd.f32 %v2898_v16, %v9512_v35 }
 0xacc   :  { %v7003_v43 = vpop.eup %7002  ;;  %7028 = vtanh.f32 %v2966_v1  ;;  %v3008_v2 = vmul.f32 %v7001_v0, %v7761_v38  ;;  %v2973_v6 = vadd.f32 %v2912_v21, %v7918_v27  ;;  %v2974_v9 = vadd.f32 %v2920_v30, %v7927_v58 }
 0xacd   :  { %v7005_v48 = vpop.eup %7004  ;;  %7030 = vtanh.f32 %v2967_v15  ;;  %v3009_v59 = vmul.f32 %v7003_v43, %v7771_v23  ;;  %v3007_v1 = vmul.f32 %v6999_v51, %v7752_v8  ;;  %v2975_v43 = vadd.f32 %v2922_v19, %v7913_v34 }
 0xace   :  { %v7007_v57 = vpop.eup %7006  ;;  %7032 = vtanh.f32 %v2968_v4  ;;  %v3010_v46 = vmul.f32 %v7005_v48, %v7794_v47  ;;  %v2976_v35 = vadd.f32 %v2905_v3, %v7923_v40  ;;  %v2977_v51 = vadd.f32 %v2919_v41, %v7949_v52 }
 0xacf   :  { %v7009_v20 = vpop.eup %7008  ;;  %7034 = vtanh.f32 %v2969_v49  ;;  %v3011_v16 = vmul.f32 %v7007_v57, %v7755_v11  ;;  %v3063_v21 = vcombine.low %v3007_v1, %v3008_v2 }
 0xad0   :  { %v7011_v62 = vpop.eup %7010  ;;  %7036 = vtanh.f32 %v2970_v60  ;;  %v3012_v15 = vmul.f32 %v7009_v20, %v7767_v22  ;;  %v3064_v4 = vcombine.low %v3009_v59, %v3010_v46  ;;  %v2978_v59 = vadd.f32 %v2921_v5, %v7954_v54 }
 0xad1   :  { %v7013_v0 = vpop.eup %7012  ;;  %7038 = vtanh.f32 %v2971_v50  ;;  %v3013_v19 = vmul.f32 %v7011_v62, %v7775_v26  ;;  %v3072_v46 = vrot.slane %v3063_v21, %v7534_v13 }
 0xad2   :  { %v7015_v48 = vpop.eup %7014  ;;  %7040 = vtanh.f32 %v2972_v45  ;;  %v3065_v30 = vcombine.low %v3011_v16, %v3012_v15  ;;  %v3014_v60 = vmul.f32 %v7013_v0, %v7752_v8  ;;  %v3079_v50 = vrot.slane %v3064_v4, %v7534_v13 }
 0xad3   :  { %v7017_v49 = vpop.eup %7016  ;;  %7042 = vtanh.f32 %v2973_v6  ;;  %v3015_v57 = vmul.f32 %v7015_v48, %v7761_v38  ;;  %v3093_v0 = vrot.slane %v3013_v19, %v7534_v13 }
 0xad4   :  { %v7019_v20 = vpop.eup %7018  ;;  %7044 = vtanh.f32 %v2974_v9  ;;  %v3016_v45 = vmul.f32 %v7017_v49, %v7771_v23  ;;  %v3086_v1 = vrot.slane %v3065_v30, %v7534_v13  ;;  %v3094_v30 = vcombine.low %v3072_v46, %v3079_v50 }
 0xad5   :  { %v7021_v3 = vpop.eup %7020  ;;  %7046 = vtanh.f32 %v2975_v43  ;;  %v3017_v2 = vmul.f32 %v7019_v20, %v7794_v47  ;;  %v3111_v41 = vcombine.low %v3014_v60, %v3015_v57 }
 0xad6   :  { %v7023_v6 = vpop.eup %7022  ;;  %7048 = vtanh.f32 %v2976_v35  ;;  %v3018_v5 = vmul.f32 %v7021_v3, %v7755_v11  ;;  %v3095_v57 = vcombine.low %v3086_v1, %v3093_v0 }
 0xad7   :  { %v7025_v16 = vpop.eup %7024  ;;  %7050 = vtanh.f32 %v2977_v51  ;;  %v3019_v9 = vmul.f32 %v7023_v6, %v7767_v22  ;;  %v3112_v62 = vcombine.low %v3016_v45, %v3017_v2  ;;  %v3120_v35 = vrot.slane %v3111_v41, %v7534_v13 }
 0xad8   :  { %v7027_v15 = vpop.eup %7026  ;;  %7052 = vtanh.f32 %v2978_v59  ;;  %v3020_v4 = vmul.f32 %v7025_v16, %v7775_v26 }
 0xad9   :  { %v7029_v43 = vpop.eup %7028  ;;  %v3113_v48 = vcombine.low %v3018_v5, %v3019_v9  ;;  %v3127_v21 = vrot.slane %v3112_v62, %v7534_v13  ;;  %v3021_v51 = vmul.f32 %v7027_v15, %v7752_v8  ;;  %v3102_v5 = vrot.slane %v3094_v30, %v7534_v13 }
 0xada   :  { %v7031_v49 = vpop.eup %7030  ;;  %v3022_v60 = vmul.f32 %v7029_v43, %v7761_v38  ;;  %v3141_v3 = vrot.slane %v3020_v4, %v7534_v13  ;;  %v3109_v4 = vrot.slane %v3095_v57, %v7534_v13 }
 0xadb   :  { %v7033_v20 = vpop.eup %7032  ;;  %v3134_v59 = vrot.slane %v3113_v48, %v7534_v13  ;;  %v3142_v45 = vcombine.low %v3120_v35, %v3127_v21  ;;  %v3023_v2 = vmul.f32 %v7031_v49, %v7771_v23 }
 0xadc   :  { %v7035_v19 = vpop.eup %7034  ;;  %v3024_v41 = vmul.f32 %v7033_v20, %v7794_v47  ;;  %v3159_v6 = vcombine.low %v3021_v51, %v3022_v60 }
 0xadd   :  { %v7037_v16 = vpop.eup %7036  ;;  %v3143_v50 = vcombine.low %v3134_v59, %v3141_v3  ;;  %v3150_v46 = vrot.slane %v3142_v45, %v7534_v13  ;;  %v3025_v1 = vmul.f32 %v7035_v19, %v7755_v11 }
 0xade   :  { %v7039_v9 = vpop.eup %7038  ;;  %v3026_v62 = vmul.f32 %v7037_v16, %v7767_v22  ;;  %v3160_v15 = vcombine.low %v3023_v2, %v3024_v41  ;;  %v3168_v49 = vrot.slane %v3159_v6, %v7534_v13  ;;  %v3110_v2 = vcombine.low %v3102_v5, %v3109_v4 }
 0xadf   :  { %v7041_v0 = vpop.eup %7040  ;;  %v3027_v43 = vmul.f32 %v7039_v9, %v7775_v26  ;;  %v3157_v48 = vrot.slane %v3143_v50, %v7534_v13 }
 0xae0   :  { %v7043_v35 = vpop.eup %7042  ;;  %v3161_v21 = vcombine.low %v3025_v1, %v3026_v62  ;;  %v3175_v51 = vrot.slane %v3160_v15, %v7534_v13  ;;  %v3028_v20 = vmul.f32 %v7041_v0, %v7752_v8 }
 0xae1   :  { %v7045_v30 = vpop.eup %7044  ;;  %v3158_v60 = vcombine.low %v3150_v46, %v3157_v48  ;;  %v3029_v59 = vmul.f32 %v7043_v35, %v7761_v38  ;;  %v3189_v45 = vrot.slane %v3027_v43, %v7534_v13  ;;  %v3259_v35 = vsel %vm1595_vm3, %v3110_v2, 0.0 }
 0xae2   :  { %v7047_v3 = vpop.eup %7046  ;;  %v3182_v57 = vrot.slane %v3161_v21, %v7534_v13  ;;  %v3190_v19 = vcombine.low %v3168_v49, %v3175_v51  ;;  %v3030_v6 = vmul.f32 %v7045_v30, %v7771_v23 }
 0xae3   :  { %v7049_v41 = vpop.eup %7048  ;;  %v3262_v16 = vsel %vm1595_vm3, %v3158_v60, 0.0  ;;  %v3031_v50 = vmul.f32 %v7047_v3, %v7794_v47  ;;  %v3207_v9 = vcombine.low %v3028_v20, %v3029_v59 }
 0xae4   :  { %v7051_v46 = vpop.eup %7050  ;;  %v3191_v1 = vcombine.low %v3182_v57, %v3189_v45  ;;  %v3198_v62 = vrot.slane %v3190_v19, %v7534_v13  ;;  %3263 = vadd.xlane.f32.xlu0 %v3262_v16  ;;  %v3032_v0 = vmul.f32 %v7049_v41, %v7755_v11 }
 0xae5   :  { %v7053_v15 = vpop.eup %7052  ;;  %v3033_v43 = vmul.f32 %v7051_v46, %v7767_v22  ;;  %v3208_v48 = vcombine.low %v3030_v6, %v3031_v50  ;;  %v3216_v49 = vrot.slane %v3207_v9, %v7534_v13 }
 0xae6   :  { %v3205_v5 = vrot.slane %v3191_v1, %v7534_v13  ;;  %v3034_v4 = vmul.f32 %v7053_v15, %v7775_v26 }
 0xae7   :  { %v3209_v21 = vcombine.low %v3032_v0, %v3033_v43  ;;  %v3223_v51 = vrot.slane %v3208_v48, %v7534_v13 }
 0xae8   :  { %v3206_v30 = vcombine.low %v3198_v62, %v3205_v5  ;;  %3260 = vadd.xlane.f32.xlu0 %v3259_v35  ;;  %v3237_v20 = vrot.slane %v3034_v4, %v7534_v13 }
 0xae9   :  { %v3230_v60 = vrot.slane %v3209_v21, %v7534_v13  ;;  %v3238_v59 = vcombine.low %v3216_v49, %v3223_v51 }
 0xaea   :  { %v3265_v3 = vsel %vm1595_vm3, %v3206_v30, 0.0 }
 0xaeb   :  { %3266 = vadd.xlane.f32.xlu1 %v3265_v3  ;;  %v3239_v57 = vcombine.low %v3230_v60, %v3237_v20  ;;  %v3246_v45 = vrot.slane %v3238_v59, %v7534_v13 }
 0xaed   :  { %v3253_v19 = vrot.slane %v3239_v57, %v7534_v13 }
 0xaef   :  { %v3254_v2 = vcombine.low %v3246_v45, %v3253_v19 }
 0xaf1   :  { %v3268_v41 = vsel %vm1595_vm3, %v3254_v2, 0.0 }
 0xaf2   :  { %3269 = vadd.xlane.f32.xlu0 %v3268_v41 }
 0xb6d   :  { %v3264_v16 = vpop.xlane.xlu0 %3263 }
 0xb6e   :  { %v3278_v6 = vsel %vm1608_vm4, %v3264_v16, -inf }
 0xb6f   :  { %v3279_v50 = vrot.slane %v3278_v6, 4 }
 0xb71   :  { %v3280_v9 = vmax.f32 %v3278_v6, %v3279_v50  ;;  %v3261_v46 = vpop.xlane.xlu0 %3260 }
 0xb72   :  { %v3271_v1 = vsel %vm1608_vm4, %v3261_v46, -inf }
 0xb73   :  { %v3281_v62 = vrot.slane %v3280_v9, 2  ;;  %v3272_v15 = vrot.slane %v3271_v1, 4 }
 0xb74   :  { %v3267_v0 = vpop.xlane.xlu1 %3266 }
 0xb75   :  { %v3285_v43 = vsel %vm1608_vm4, %v3267_v0, -inf  ;;  %v3282_v48 = vmax.f32 %v3280_v9, %v3281_v62  ;;  %v3273_v5 = vmax.f32 %v3271_v1, %v3272_v15 }
 0xb76   :  { %v3286_v4 = vrot.slane %v3285_v43, 4 }
 0xb77   :  { %v3283_v35 = vrot.slane %v3282_v48, 1  ;;  %v3274_v21 = vrot.slane %v3273_v5, 2 }
 0xb78   :  { %v3287_v49 = vmax.f32 %v3285_v43, %v3286_v4 }
 0xb79   :  { %v3284_v51 = vmax.f32 %v3282_v48, %v3283_v35  ;;  %v3275_v30 = vmax.f32 %v3273_v5, %v3274_v21 }
 0xb7a   :  { %v3288_v60 = vrot.slane %v3287_v49, 2 }
 0xb7b   :  { %v3300_v20 = vsub.f32 %v3264_v16, %v3284_v51  ;;  %v3276_v59 = vrot.slane %v3275_v30, 1  ;;  %v3270_v3 = vpop.xlane.xlu0 %3269 }
 0xb7c   :  { %v3289_v57 = vmax.f32 %v3287_v49, %v3288_v60  ;;  %v3292_v45 = vsel %vm1608_vm4, %v3270_v3, -inf }
 0xb7d   :  { %v3305_v19 = vmul.f32 1.442695, %v3300_v20  ;;  %v3277_v2 = vmax.f32 %v3275_v30, %v3276_v59  ;;  %v3293_v41 = vrot.slane %v3292_v45, 4 }
 0xb7e   :  { %v3290_v6 = vrot.slane %v3289_v57, 1 }
 0xb7f   :  { %7054 = vpow2.f32 %v3305_v19  ;;  %v3299_v50 = vsub.f32 %v3261_v46, %v3277_v2  ;;  %v3294_v9 = vmax.f32 %v3292_v45, %v3293_v41 }
 0xb80   :  { %v3291_v1 = vmax.f32 %v3289_v57, %v3290_v6 }
 0xb81   :  { %v3303_v62 = vmul.f32 1.442695, %v3299_v50  ;;  %v3295_v15 = vrot.slane %v3294_v9, 2 }
 0xb82   :  { %v3301_v43 = vsub.f32 %v3267_v0, %v3291_v1 }
 0xb83   :  { %7056 = vpow2.f32 %v3303_v62  ;;  %v3296_v48 = vmax.f32 %v3294_v9, %v3295_v15 }
 0xb84   :  { %v3307_v5 = vmul.f32 1.442695, %v3301_v43 }
 0xb85   :  { %v3297_v16 = vrot.slane %v3296_v48, 1 }
 0xb86   :  { %7058 = vpow2.f32 %v3307_v5 }
 0xb87   :  { %v3298_v4 = vmax.f32 %v3296_v48, %v3297_v16 }
 0xb89   :  { %v3302_v35 = vsub.f32 %v3270_v3, %v3298_v4 }
 0xb8b   :  { %v3309_v21 = vmul.f32 1.442695, %v3302_v35 }
 0xb8c   :  { %v7055_v49 = vpop.eup %7054 }
 0xb8d   :  { %v3318_v51 = vsel %vm1608_vm4, %v7055_v49, 0.0  ;;  %7060 = vpow2.f32 %v3309_v21 }
 0xb8e   :  { %v3319_v30 = vrot.slane %v3318_v51, 4 }
 0xb90   :  { %v7057_v60 = vpop.eup %7056  ;;  %v3320_v46 = vadd.f32 %v3319_v30, %v3318_v51 }
 0xb91   :  { %v3311_v20 = vsel %vm1608_vm4, %v7057_v60, 0.0 }
 0xb92   :  { %v3321_v59 = vrot.slane %v3320_v46, 2  ;;  %v3312_v57 = vrot.slane %v3311_v20, 4 }
 0xb93   :  { %v7059_v0 = vpop.eup %7058 }
 0xb94   :  { %v3325_v45 = vsel %vm1608_vm4, %v7059_v0, 0.0  ;;  %v3322_v19 = vadd.f32 %v3321_v59, %v3320_v46  ;;  %v3313_v2 = vadd.f32 %v3312_v57, %v3311_v20 }
 0xb95   :  { %v3326_v41 = vrot.slane %v3325_v45, 4 }
 0xb96   :  { %v3323_v6 = vrot.slane %v3322_v19, 1  ;;  %v3314_v3 = vrot.slane %v3313_v2, 2 }
 0xb97   :  { %v3327_v50 = vadd.f32 %v3326_v41, %v3325_v45 }
 0xb98   :  { %v3324_v9 = vadd.f32 %v3323_v6, %v3322_v19  ;;  %v3315_v1 = vadd.f32 %v3314_v3, %v3313_v2  ;;  %v8526_v19 = vld [vmem:[%s9390_s0 + $0x8] sm:$0x7f] }
 0xb99   :  { %v3328_v62 = vrot.slane %v3327_v50, 2 }
 0xb9a   :  { %v7061_v15 = vpop.eup %7060  ;;  %7062 = vrcp.f32 %v3324_v9  ;;  %v3316_v43 = vrot.slane %v3315_v1, 1 }
 0xb9b   :  { %v3329_v48 = vadd.f32 %v3328_v62, %v3327_v50  ;;  %v3332_v5 = vsel %vm1608_vm4, %v7061_v15, 0.0 }
 0xb9c   :  { %v3317_v16 = vadd.f32 %v3316_v43, %v3315_v1  ;;  %v3333_v4 = vrot.slane %v3332_v5, 4  ;;  %v8533_v1 = vld [vmem:[%s9390_s0] sm:$0x7f] }
 0xb9d   :  { %v3330_v35 = vrot.slane %v3329_v48, 1 }
 0xb9e   :  { %7064 = vrcp.f32 %v3317_v16  ;;  %v3334_v21 = vadd.f32 %v3333_v4, %v3332_v5  ;;  %v8540_v5 = vld [vmem:[%s9390_s0 + $0x10] sm:$0x7f] }
 0xb9f   :  { %v3331_v51 = vadd.f32 %v3330_v35, %v3329_v48 }
 0xba0   :  { %v3335_v30 = vrot.slane %v3334_v21, 2 }
 0xba1   :  { %7066 = vrcp.f32 %v3331_v51 }
 0xba2   :  { %v3336_v46 = vadd.f32 %v3335_v30, %v3334_v21 }
 0xba4   :  { %v3337_v20 = vrot.slane %v3336_v46, 1 }
 0xba6   :  { %v3338_v59 = vadd.f32 %v3337_v20, %v3336_v46 }
 0xba7   :  { %v7063_v57 = vpop.eup %7062 }
 0xba8   :  { %v3342_v45 = vmul.f32 %v7063_v57, %v7055_v49  ;;  %7068 = vrcp.f32 %v3338_v59 }
 0xbaa   :  { %v3348_v2 = vmul.f32 %v8526_v19, %v3342_v45  ;;  %v8547_v45 = vld [vmem:[%s9390_s0 + $0x18] sm:$0x7f] }
 0xbab   :  { %v7065_v41 = vpop.eup %7064 }
 0xbac   :  { %v3340_v6 = vmul.f32 %v7065_v41, %v7057_v60  ;;  %v3358_v3 = vsel %vm1595_vm3, %v3348_v2, 0.0 }
 0xbad   :  { %v3359_v50 = vrot.slane %v3358_v3, 4 }
 0xbae   :  { %v7067_v9 = vpop.eup %7066  ;;  %v3347_v49 = vmul.f32 %v8533_v1, %v3340_v6 }
 0xbaf   :  { %v3344_v62 = vmul.f32 %v7067_v9, %v7059_v0  ;;  %v3360_v43 = vadd.f32 %v3359_v50, %v3358_v3 }
 0xbb0   :  { %v3351_v48 = vsel %vm1595_vm3, %v3347_v49, 0.0 }
 0xbb1   :  { %v3349_v60 = vmul.f32 %v8540_v5, %v3344_v62  ;;  %v3352_v16 = vrot.slane %v3351_v48, 4  ;;  %v3361_v4 = vrot.slane %v3360_v43, 2 }
 0xbb3   :  { %v3353_v35 = vadd.f32 %v3352_v16, %v3351_v48  ;;  %v3365_v21 = vsel %vm1595_vm3, %v3349_v60, 0.0  ;;  %v3362_v20 = vadd.f32 %v3361_v4, %v3360_v43 }
 0xbb4   :  { %v3366_v51 = vrot.slane %v3365_v21, 4 }
 0xbb5   :  { %v7069_v30 = vpop.eup %7068  ;;  %v3354_v46 = vrot.slane %v3353_v35, 2  ;;  %v3363_v6 = vrot.slane %v3362_v20, 1 }
 0xbb6   :  { %v3346_v0 = vmul.f32 %v7069_v30, %v7061_v15  ;;  %v3367_v59 = vadd.f32 %v3366_v51, %v3365_v21 }
 0xbb7   :  { %v3355_v57 = vadd.f32 %v3354_v46, %v3353_v35  ;;  %v3364_v48 = vadd.f32 %v3363_v6, %v3362_v20  ;;  %v8554_v35 = vld [vmem:[%s9391_s3 + $0x4] ss:$0 sm:$0xff] }
 0xbb8   :  { %v3350_v2 = vmul.f32 %v8547_v45, %v3346_v0  ;;  %v3368_v41 = vrot.slane %v3367_v59, 2 }
 0xbb9   :  { %v3356_v9 = vrot.slane %v3355_v57, 1  ;;  %v3380_v21 = vmul.f32 %v8554_v35, %v3364_v48 }
 0xbba   :  { %v3369_v3 = vadd.f32 %v3368_v41, %v3367_v59  ;;  %v3372_v50 = vsel %vm1595_vm3, %v3350_v2, 0.0 }
 0xbbb   :  { %v3373_v49 = vrot.slane %v3372_v50, 4  ;;  %v3357_v15 = vadd.f32 %v3356_v9, %v3355_v57  ;;  %v3387_v59 = vrot.slane %v3380_v21, 7  ;;  %v6789_v9 = vld [vmem:[%s9392_s1 + $0x8] sm:$0xf] }
 0xbbc   :  { %v3370_v62 = vrot.slane %v3369_v3, 1 }
 0xbbd   :  { %v3374_v43 = vadd.f32 %v3373_v49, %v3372_v50  ;;  %v3379_v30 = vmul.f32 %v8554_v35, %v3357_v15 }
 0xbbe   :  { %v3371_v16 = vadd.f32 %v3370_v62, %v3369_v3 }
 0xbbf   :  { %v3375_v60 = vrot.slane %v3374_v43, 2  ;;  %v3388_v57 = vsel %vm1730_vm5, %v3387_v59, %v3379_v30 }
 0xbc0   :  { %v3381_v46 = vmul.f32 %v8554_v35, %v3371_v16  ;;  %v8577_v16 = vld [vmem:[%s9391_s3 + $0x3] ss:$0 sm:$0xff] }
 0xbc1   :  { %v3376_v4 = vadd.f32 %v3375_v60, %v3374_v43  ;;  %v8570_v43 = vld [vmem:[%s9391_s3 + $0x2] ss:$0 sm:$0xff]  ;;  %9513 = vst [vmem:[#allocation11_spill] sm:$0xff] %v8577_v16 }
 0xbc2   :  { %v3389_v2 = vrot.slane %v3381_v46, 6 }
 0xbc3   :  { %v3377_v51 = vrot.slane %v3376_v4, 1 }
 0xbc4   :  { %v3390_v6 = vsel %vm1733_vm6, %v3389_v2, %v3388_v57 }
 0xbc5   :  { %v3378_v0 = vadd.f32 %v3377_v51, %v3376_v4 }
 0xbc7   :  { %v3382_v20 = vmul.f32 %v8554_v35, %v3378_v0 }
 0xbc9   :  { %v3391_v41 = vrot.slane %v3382_v20, 5 }
 0xbcb   :  { %v3392_v3 = vsel %vm1736_vm7, %v3391_v41, %v3390_v6 }
 0xbcc   :  { %v3394_v50 = vsel %vm1739_vm8, %v3392_v3, 0.0 }
 0xbcd   :  { %3395 = vadd.xlane.f32.xlu0 %v3394_v50 }
 0xc56   :  { %v3396_v49 = vpop.xlane.xlu0 %3395 }
 0xc57   :  { %v3399_v62 = vadd.f32 %v6789_v9, %v3396_v49  ;;  %v8601_v49 = vld [vmem:[%s9389_s2 + $0x68] sm:$0xff] }
 0xc58   :  { %9516 = vst [vmem:[#allocation13_spill] sm:$0xff] %v8601_v49 }
 0xc59   :  { %3402 = vperm.xlu1 %6832, %v3399_v62   ;;  %v8607_v62 = vld [vmem:[%s9389_s2 + $0x60] sm:$0xff] }
 0xc5a   :  { %9517 = vst [vmem:[#allocation14_spill] sm:$0xff] %v8607_v62 }
 0xcd4   :  { %v3403_v48 = vpop.permute.xlu1 %3402 }
 0xcd5   :  { %v3405_v15 = vmul.f32 %v8570_v43, %v3403_v48  ;;  %v8613_v48 = vld [vmem:[%s9389_s2 + $0x58] sm:$0xff] }
 0xcd6   :  { %9518 = vst [vmem:[#allocation15_spill] sm:$0xff] %v8613_v48 }
 0xcd7   :  { %v3406_v60 = vadd.f32 %v3405_v15, %v8398_v37  ;;  %v8619_v15 = vld [vmem:[%s9389_s2 + $0x50] sm:$0xff] }
 0xcd8   :  { %9519 = vst [vmem:[#allocation16_spill] sm:$0xff] %v8619_v15 }
 0xcd9   :  { %v3407_v4 = vadd.f32 %v8577_v16, %v3406_v60  ;;  %v8625_v60 = vld [vmem:[%s9389_s2 + $0x48] sm:$0xff] }
 0xcda   :  { %9520 = vst [vmem:[#allocation17_spill] sm:$0xff] %v8625_v60 }
 0xcdb   :  { %7070 = vtanh.f32 %v3407_v4  ;;  %v6790_v51 = vmul.f32 -1.442695, %v3407_v4  ;;  %v8631_v4 = vld [vmem:[%s9389_s2 + $0x40] sm:$0xff] }
 0xcdc   :  { %9521 = vst [vmem:[#allocation18_spill] sm:$0xff] %v8631_v4 }
 0xcdd   :  { %7072 = vpow2.f32 %v6790_v51  ;;  %v8643_v51 = vld [vmem:[%s9389_s2 + $0x30] sm:$0xff] }
 0xcde   :  { %9523 = vst [vmem:[#allocation20_spill] sm:$0xff] %v8643_v51 }
 0xce8   :  { %v7071_v21 = vpop.eup %7070 }
 0xce9   :  { %3417 = vrot.lane.b32.xlu0 %v7071_v21, %s7458_s11  ;;  %v8637_v21 = vld [vmem:[%s9389_s2 + $0x38] sm:$0xff] }
 0xcea   :  { %v7073_v30 = vpop.eup %7072  ;;  %9522 = vst [vmem:[#allocation19_spill] sm:$0xff] %v8637_v21 }
 0xceb   :  { %v3411_v46 = vadd.f32 1.0, %v7073_v30  ;;  %v8649_v30 = vld [vmem:[%s9389_s2 + $0x28] sm:$0xff] }
 0xcec   :  { %9524 = vst [vmem:[#allocation21_spill] sm:$0xff] %v8649_v30 }
 0xced   :  { %7074 = vrcp.f32 %v3411_v46  ;;  %v8655_v46 = vld [vmem:[%s9389_s2 + $0x20] sm:$0xff] }
 0xcee   :  { %9525 = vst [vmem:[#allocation22_spill] sm:$0xff] %v8655_v46 }
 0xcfa   :  { %v7075_v0 = vpop.eup %7074 }
 0xcfb   :  { %v3415_v37 = vmul.f32 %v7075_v0, %v8377_v42  ;;  %v8594_v42 = vld [vmem:[%s9389_s2 + $0x70] sm:$0xff] }
 0xcfc   :  { %9515 = vst [vmem:[#allocation31_spill] sm:$0xff] %v8594_v42 }
 0xd5b   :  { %v3418_v59 = vpop.permute.xlu0 %3417 }
 0xd5c   :  { %v3420_v20 = vmul.f32 %v7075_v0, %v3418_v59  ;;  %v8667_v59 = vld [vmem:[%s9389_s2 + $0x10] sm:$0xff] }
 0xd5d   :  { %9527 = vst [vmem:[#allocation24_spill] sm:$0xff] %v8667_v59 }
 0xd5e   :  { %3422 = vrot.lane.b32.xlu1 %v3420_v20, %s7458_s11  ;;  %v8673_v20 = vld [vmem:[%s9389_s2 + $0x8] sm:$0xff] }
 0xd5f   :  { %9528 = vst [vmem:[#allocation25_spill] sm:$0xff] %v8673_v20 }
 0xdd0   :  { %v3423_v57 = vpop.permute.xlu1 %3422 }
 0xdd1   :  { %v3425_v2 = vadd.f32 %v3423_v57, %v3415_v37  ;;  %v8679_v37 = vld [vmem:[%s9389_s2] sm:$0xff] }
 0xdd2   :  { %9529 = vst [vmem:[#allocation26_spill] sm:$0xff] %v8679_v37 }
 0xdd3   :  { %7076 = vtanh.f32 %v3425_v2 }
 0xde0   :  { %v7077_v41 = vpop.eup %7076 }
 0xde1   :  { %3428 = vrot.lane.b32.xlu1 %v7077_v41, %s7458_s11 }
 0xe53   :  { %v3429_v6 = vpop.permute.xlu1 %3428 }
 0xe54   :  { %v3431_v3 = vmul.f32 %v7075_v0, %v3429_v6  ;;  %v8661_v0 = vld [vmem:[%s9389_s2 + $0x18] sm:$0xff] }
 0xe55   :  { %9526 = vst [vmem:[#allocation23_spill] sm:$0xff] %v8661_v0 }
 0xe56   :  { %3433 = vrot.lane.b32.xlu1 %v3431_v3, %s7459_s12 }
 0xec8   :  { %v3434_v50 = vpop.permute.xlu1 %3433 }
 0xec9   :  { %3436 = vst.msk [vmem:[#allocation2] sm:$0xf] %vm1739_vm8, %v3434_v50 }
 0xeca   :  { %3437 = vst.msk [vmem:[#allocation2] sm:$0xf] %vm1790_vm9, %v3425_v2 }
 0xed1   :  { %v8587_v9 = vld [vmem:[#allocation2] sm:$0xf] }
 0xed2   :  { %9514 = vst [vmem:[#allocation12_spill] sm:$0xff] %v8587_v9  ;;  %6791 = vmatmul.mubr.msk.f32.vlgmr.msra.gmra.mxu0 %vm891_vm1, %v8587_v9 }
 0xed3   :  { %5105 = vmatpush1.msra.mxu0 %v8594_v42  ;;  %5152 = vmatprep.mubr.f32.mxu0 %v9493_v32 }
 0xed4   :  { %5106 = vmatprep.subr.mxu0 %v8601_v49 }
 0xed5   :  { %5107 = vmatpush1.msra.mxu0 %v8607_v62 }
 0xed6   :  { %5108 = vmatprep.subr.mxu0 %v8613_v48 }
 0xed7   :  { %5109 = vmatpush1.msra.mxu0 %v8619_v15 }
 0xed8   :  { %5110 = vmatprep.subr.mxu0 %v8625_v60 }
 0xed9   :  { %5111 = vmatpush1.msra.mxu0 %v8631_v4 }
 0xeda   :  { %5112 = vmatprep.subr.mxu0 %v8637_v21 }
 0xedb   :  { %5113 = vmatpush1.msra.mxu0 %v8643_v51 }
 0xedc   :  { %5114 = vmatprep.subr.mxu0 %v8649_v30 }
 0xedd   :  { %5115 = vmatpush1.msra.mxu0 %v8655_v46 }
 0xede   :  { %5116 = vmatprep.subr.mxu0 %v8661_v0 }
 0xedf   :  { %5117 = vmatpush1.msra.mxu0 %v8667_v59 }
 0xee0   :  { %5118 = vmatprep.subr.mxu0 %v8673_v20 }
 0xee1   :  { %5119 = vmatpush1.msra.mxu0 %v8679_v37 }
 0xf92   :  { %v8682_v57 = vpop.f32.mrf.mxu0 }
 0xf94   :  { %v3510_v2 = vpop.f32.mrf.mxu0 }
 0xf95   :  { %v3520_v41 = vrot.slane %v3510_v2, %v7534_v13 }
 0xf97   :  { %v3528_v6 = vrot.slane %v3520_v41, %v7534_v13  ;;  %v3521_v3 = vcombine.high %v3520_v41, %v3520_v41 }
 0xf99   :  { %v3541_v50 = vrot.slane %v3528_v6, %v7720_v33  ;;  %v3535_v59 = vrot.slane %v3521_v3, %v7534_v13  ;;  %v3536_v51 = vcombine.high %v3528_v6, %v3528_v6 }
 0xf9b   :  { %v3561_v20 = vrot.slane %v3541_v50, %v7534_v13  ;;  %v3554_v0 = vcombine.high %v3541_v50, %v3541_v50  ;;  %v3545_v46 = vrot.slane %v3535_v59, %v7720_v33  ;;  %v3549_v60 = vrot.slane %v3536_v51, %v7720_v33 }
 0xf9c   :  { %v3537_v62 = vcombine.high %v3535_v59, %v3535_v59 }
 0xf9d   :  { %v3569_v30 = vcombine.high %v3561_v20, %v3561_v20  ;;  %v3568_v37 = vrot.slane %v3554_v0, %v7534_v13  ;;  %v3577_v21 = vrot.slane %v3561_v20, %v7534_v13  ;;  %v3609_v2 = vrot.slane %v3545_v46, %v7534_v13 }
 0xf9e   :  { %v3602_v41 = vcombine.high %v3545_v46, %v3545_v46  ;;  %v3553_v59 = vrot.slane %v3537_v62, %v7720_v33 }
 0xf9f   :  { %v3591_v4 = vrot.slane %v3569_v30, %v7534_v13  ;;  %v3570_v15 = vcombine.high %v3568_v37, %v3568_v37  ;;  %v3584_v3 = vrot.slane %v3568_v37, %v7534_v13  ;;  %v3599_v48 = vcombine.high %v3577_v21, %v3577_v21 }
 0xfa0   :  { %v3617_v50 = vcombine.high %v3609_v2, %v3609_v2  ;;  %v3616_v6 = vrot.slane %v3602_v41, %v7534_v13  ;;  %v3774_v0 = vadd.f32 %v3577_v21, %v9509_v56  ;;  %v3625_v32 = vrot.slane %v3609_v2, %v7534_v13 }
 0xfa1   :  { %v3601_v49 = vcombine.high %v3591_v4, %v3591_v4  ;;  %v3598_v20 = vrot.slane %v3570_v15, %v7534_v13  ;;  %v3657_v30 = vrot.slane %v3549_v60, %v7534_v13  ;;  %v3775_v46 = vadd.f32 %v3591_v4, %v9510_v17 }
 0xfa2   :  { %v3600_v51 = vcombine.high %v3584_v3, %v3584_v3  ;;  %v3639_v42 = vrot.slane %v3617_v50, %v7534_v13  ;;  %v3650_v37 = vcombine.high %v3549_v60, %v3549_v60  ;;  %v3776_v9 = vadd.f32 %v3599_v48, %v7837_v14 }
 0xfa3   :  { %v3618_v16 = vcombine.high %v3616_v6, %v3616_v6  ;;  %v3777_v41 = vadd.f32 %v3601_v49, %v7845_v29  ;;  %v3632_v21 = vrot.slane %v3616_v6, %v7534_v13  ;;  %v3778_v15 = vadd.f32 %v3584_v3, %v7833_v12 }
 0xfa4   :  { %7078 = vtanh.f32 %v3774_v0  ;;  %v3647_v2 = vcombine.high %v3625_v32, %v3625_v32  ;;  %v3665_v56 = vcombine.high %v3657_v30, %v3657_v30  ;;  %v3779_v4 = vadd.f32 %v3598_v20, %v7841_v25 }
 0xfa5   :  { %7080 = vtanh.f32 %v3775_v46  ;;  %v3649_v17 = vcombine.high %v3639_v42, %v3639_v42  ;;  %v3664_v60 = vrot.slane %v3650_v37, %v7534_v13  ;;  %v3780_v48 = vadd.f32 %v3600_v51, %v7863_v28 }
 0xfa6   :  { %7082 = vtanh.f32 %v3776_v9  ;;  %v3646_v62 = vrot.slane %v3618_v16, %v7534_v13  ;;  %v3698_v50 = vcombine.high %v3553_v59, %v3553_v59  ;;  %v3781_v49 = vadd.f32 %v3625_v32, %v7869_v10 }
 0xfa7   :  { %7084 = vtanh.f32 %v3777_v41  ;;  %v3673_v3 = vrot.slane %v3657_v30, %v7534_v13  ;;  %v3705_v6 = vrot.slane %v3553_v59, %v7534_v13  ;;  %v3782_v0 = vadd.f32 %v3639_v42, %v7855_v36 }
 0xfa8   :  { %7086 = vtanh.f32 %v3778_v15  ;;  %v3648_v20 = vcombine.high %v3632_v21, %v3632_v21  ;;  %v3687_v46 = vrot.slane %v3665_v56, %v7534_v13  ;;  %v3783_v37 = vadd.f32 %v3647_v2, %v7859_v39 }
 0xfa9   :  { %7088 = vtanh.f32 %v3779_v4  ;;  %v3666_v9 = vcombine.high %v3664_v60, %v3664_v60  ;;  %v3784_v16 = vadd.f32 %v3649_v17, %v7882_v61  ;;  %v3680_v32 = vrot.slane %v3664_v60, %v7534_v13 }
 0xfaa   :  { %7090 = vtanh.f32 %v3780_v48  ;;  %v3712_v51 = vrot.slane %v3698_v50, %v7534_v13  ;;  %v3785_v30 = vadd.f32 %v3632_v21, %v7886_v53  ;;  %v3695_v59 = vcombine.high %v3673_v3, %v3673_v3 }
 0xfab   :  { %7092 = vtanh.f32 %v3781_v49  ;;  %v3713_v42 = vcombine.high %v3705_v6, %v3705_v6  ;;  %v3786_v41 = vadd.f32 %v3646_v62, %v7910_v18  ;;  %v3697_v56 = vcombine.high %v3687_v46, %v3687_v46  ;;  %v9530_v49 = vld [vmem:[#allocation7_spill] sm:$0xff] }
 0xfac   :  { %7094 = vtanh.f32 %v3782_v0  ;;  %v3787_v15 = vadd.f32 %v3648_v20, %v7903_v7  ;;  %v3694_v2 = vrot.slane %v3666_v9, %v7534_v13  ;;  %v3721_v17 = vrot.slane %v3705_v6, %v7534_v13 }
 0xfad   :  { %7096 = vtanh.f32 %v3783_v37  ;;  %v3788_v4 = vadd.f32 %v3673_v3, %v7945_v44  ;;  %v3714_v60 = vcombine.high %v3712_v51, %v3712_v51  ;;  %v3728_v21 = vrot.slane %v3712_v51, %v7534_v13  ;;  %v9531_v3 = vld [vmem:[#allocation10_spill] sm:$0xff] }
 0xfae   :  { %7098 = vtanh.f32 %v3784_v16  ;;  %v3789_v48 = vadd.f32 %v3687_v46, %v7967_v63  ;;  %v3696_v50 = vcombine.high %v3680_v32, %v3680_v32  ;;  %v3735_v62 = vrot.slane %v3713_v42, %v7534_v13 }
 0xfaf   :  { %7100 = vtanh.f32 %v3785_v30  ;;  %v3790_v0 = vadd.f32 %v3695_v59, %v9530_v49  ;;  %v3791_v37 = vadd.f32 %v3697_v56, %v7957_v55  ;;  %v3743_v9 = vcombine.high %v3721_v17, %v3721_v17 }
 0xfb0   :  { %7102 = vtanh.f32 %v3786_v41  ;;  %v3792_v16 = vadd.f32 %v3680_v32, %v9531_v3  ;;  %v3742_v51 = vrot.slane %v3714_v60, %v7534_v13  ;;  %v3744_v46 = vcombine.high %v3728_v21, %v3728_v21  ;;  %v9532_v41 = vld [vmem:[#allocation6_spill] sm:$0xff] }
 0xfb1   :  { %v7079_v20 = vpop.eup %7078  ;;  %7104 = vtanh.f32 %v3787_v15  ;;  %v3793_v30 = vadd.f32 %v3694_v2, %v7980_v24  ;;  %v3745_v63 = vcombine.high %v3735_v62, %v3735_v62  ;;  %v3794_v59 = vadd.f32 %v3696_v50, %v7891_v31 }
 0xfb2   :  { %v7081_v6 = vpop.eup %7080  ;;  %7106 = vtanh.f32 %v3788_v4  ;;  %v3795_v49 = vadd.f32 %v3721_v17, %v9532_v41  ;;  %v3796_v3 = vadd.f32 %v3735_v62, %v7918_v27  ;;  %v3797_v2 = vadd.f32 %v3743_v9, %v7927_v58 }
 0xfb3   :  { %v7083_v44 = vpop.eup %7082  ;;  %7108 = vtanh.f32 %v3789_v48  ;;  %v3831_v15 = vmul.f32 %v7081_v6, %v7761_v38  ;;  %v3830_v48 = vmul.f32 %v7079_v20, %v7752_v8  ;;  %v3799_v41 = vadd.f32 %v3728_v21, %v7923_v40 }
 0xfb4   :  { %v7085_v42 = vpop.eup %7084  ;;  %7110 = vtanh.f32 %v3790_v0  ;;  %v3832_v32 = vmul.f32 %v7083_v44, %v7771_v23  ;;  %v3798_v44 = vadd.f32 %v3745_v63, %v7913_v34  ;;  %v3800_v20 = vadd.f32 %v3742_v51, %v7949_v52 }
 0xfb5   :  { %v7087_v56 = vpop.eup %7086  ;;  %7112 = vtanh.f32 %v3791_v37  ;;  %v3833_v4 = vmul.f32 %v7085_v42, %v7794_v47  ;;  %v3886_v62 = vcombine.low %v3830_v48, %v3831_v15 }
 0xfb6   :  { %v7089_v60 = vpop.eup %7088  ;;  %7114 = vtanh.f32 %v3792_v16  ;;  %v3834_v17 = vmul.f32 %v7087_v56, %v7755_v11 }
 0xfb7   :  { %v7091_v50 = vpop.eup %7090  ;;  %7116 = vtanh.f32 %v3793_v30  ;;  %v3835_v0 = vmul.f32 %v7089_v60, %v7767_v22  ;;  %v3887_v37 = vcombine.low %v3832_v32, %v3833_v4  ;;  %v3801_v32 = vadd.f32 %v3744_v46, %v7954_v54 }
 0xfb8   :  { %v7093_v6 = vpop.eup %7092  ;;  %7118 = vtanh.f32 %v3794_v59  ;;  %v3836_v63 = vmul.f32 %v7091_v50, %v7775_v26  ;;  %v3895_v4 = vrot.slane %v3886_v62, %v7534_v13 }
 0xfb9   :  { %v7095_v42 = vpop.eup %7094  ;;  %7120 = vtanh.f32 %v3795_v49  ;;  %v3888_v9 = vcombine.low %v3834_v17, %v3835_v0  ;;  %v3837_v30 = vmul.f32 %v7093_v6, %v7752_v8  ;;  %v3902_v59 = vrot.slane %v3887_v37, %v7534_v13 }
 0xfba   :  { %v7097_v16 = vpop.eup %7096  ;;  %7122 = vtanh.f32 %v3796_v3  ;;  %v3838_v56 = vmul.f32 %v7095_v42, %v7761_v38  ;;  %v3916_v6 = vrot.slane %v3836_v63, %v7534_v13 }
 0xfbb   :  { %v7099_v60 = vpop.eup %7098  ;;  %7124 = vtanh.f32 %v3797_v2  ;;  %v3839_v49 = vmul.f32 %v7097_v16, %v7771_v23  ;;  %v3909_v48 = vrot.slane %v3888_v9, %v7534_v13  ;;  %v3917_v9 = vcombine.low %v3895_v4, %v3902_v59 }
 0xfbc   :  { %v7101_v21 = vpop.eup %7100  ;;  %7126 = vtanh.f32 %v3798_v44  ;;  %v3840_v15 = vmul.f32 %v7099_v60, %v7794_v47  ;;  %v3934_v51 = vcombine.low %v3837_v30, %v3838_v56 }
 0xfbd   :  { %v7103_v3 = vpop.eup %7102  ;;  %7128 = vtanh.f32 %v3799_v41  ;;  %v3841_v46 = vmul.f32 %v7101_v21, %v7755_v11  ;;  %v3918_v56 = vcombine.low %v3909_v48, %v3916_v6 }
 0xfbe   :  { %v7105_v17 = vpop.eup %7104  ;;  %7130 = vtanh.f32 %v3800_v20  ;;  %v3842_v2 = vmul.f32 %v7103_v3, %v7767_v22  ;;  %v3935_v50 = vcombine.low %v3839_v49, %v3840_v15  ;;  %v3943_v41 = vrot.slane %v3934_v51, %v7534_v13 }
 0xfbf   :  { %v7107_v0 = vpop.eup %7106  ;;  %7132 = vtanh.f32 %v3801_v32  ;;  %v3843_v37 = vmul.f32 %v7105_v17, %v7775_v26 }
 0xfc0   :  { %v7109_v44 = vpop.eup %7108  ;;  %v3936_v42 = vcombine.low %v3841_v46, %v3842_v2  ;;  %v3950_v62 = vrot.slane %v3935_v50, %v7534_v13  ;;  %v3844_v20 = vmul.f32 %v7107_v0, %v7752_v8  ;;  %v3925_v46 = vrot.slane %v3917_v9, %v7534_v13 }
 0xfc1   :  { %v7111_v16 = vpop.eup %7110  ;;  %v3845_v30 = vmul.f32 %v7109_v44, %v7761_v38  ;;  %v3964_v21 = vrot.slane %v3843_v37, %v7534_v13  ;;  %v3932_v37 = vrot.slane %v3918_v56, %v7534_v13 }
 0xfc2   :  { %v7113_v60 = vpop.eup %7112  ;;  %v3957_v32 = vrot.slane %v3936_v42, %v7534_v13  ;;  %v3965_v49 = vcombine.low %v3943_v41, %v3950_v62  ;;  %v3846_v15 = vmul.f32 %v7111_v16, %v7771_v23 }
 0xfc3   :  { %v7115_v63 = vpop.eup %7114  ;;  %v3847_v51 = vmul.f32 %v7113_v60, %v7794_v47  ;;  %v3982_v3 = vcombine.low %v3844_v20, %v3845_v30 }
 0xfc4   :  { %v7117_v17 = vpop.eup %7116  ;;  %v3966_v59 = vcombine.low %v3957_v32, %v3964_v21  ;;  %v3973_v4 = vrot.slane %v3965_v49, %v7534_v13  ;;  %v3848_v48 = vmul.f32 %v7115_v63, %v7755_v11 }
 0xfc5   :  { %v7119_v2 = vpop.eup %7118  ;;  %v3849_v50 = vmul.f32 %v7117_v17, %v7767_v22  ;;  %v3983_v0 = vcombine.low %v3846_v15, %v3847_v51  ;;  %v3991_v16 = vrot.slane %v3982_v3, %v7534_v13  ;;  %v3933_v15 = vcombine.low %v3925_v46, %v3932_v37 }
 0xfc6   :  { %v7121_v6 = vpop.eup %7120  ;;  %v3850_v44 = vmul.f32 %v7119_v2, %v7775_v26  ;;  %v3980_v42 = vrot.slane %v3966_v59, %v7534_v13 }
 0xfc7   :  { %v7123_v41 = vpop.eup %7122  ;;  %v3984_v62 = vcombine.low %v3848_v48, %v3849_v50  ;;  %v3998_v20 = vrot.slane %v3983_v0, %v7534_v13  ;;  %v3851_v60 = vmul.f32 %v7121_v6, %v7752_v8 }
 0xfc8   :  { %v7125_v9 = vpop.eup %7124  ;;  %v3981_v30 = vcombine.low %v3973_v4, %v3980_v42  ;;  %v3852_v32 = vmul.f32 %v7123_v41, %v7761_v38  ;;  %v4012_v49 = vrot.slane %v3850_v44, %v7534_v13  ;;  %v4082_v41 = vsel %vm1595_vm3, %v3933_v15, 0.0 }
 0xfc9   :  { %v7127_v21 = vpop.eup %7126  ;;  %v4005_v56 = vrot.slane %v3984_v62, %v7534_v13  ;;  %v4013_v63 = vcombine.low %v3991_v16, %v3998_v20  ;;  %v3853_v3 = vmul.f32 %v7125_v9, %v7771_v23 }
 0xfca   :  { %v7129_v51 = vpop.eup %7128  ;;  %v4085_v17 = vsel %vm1595_vm3, %v3981_v30, 0.0  ;;  %v3854_v59 = vmul.f32 %v7127_v21, %v7794_v47  ;;  %v4030_v2 = vcombine.low %v3851_v60, %v3852_v32 }
 0xfcb   :  { %v7131_v4 = vpop.eup %7130  ;;  %v4014_v48 = vcombine.low %v4005_v56, %v4012_v49  ;;  %v4021_v50 = vrot.slane %v4013_v63, %v7534_v13  ;;  %4086 = vadd.xlane.f32.xlu0 %v4085_v17  ;;  %v3855_v6 = vmul.f32 %v7129_v51, %v7755_v11 }
 0xfcc   :  { %v7133_v0 = vpop.eup %7132  ;;  %v3856_v44 = vmul.f32 %v7131_v4, %v7767_v22  ;;  %v4031_v42 = vcombine.low %v3853_v3, %v3854_v59  ;;  %v4039_v16 = vrot.slane %v4030_v2, %v7534_v13 }
 0xfcd   :  { %v4028_v46 = vrot.slane %v4014_v48, %v7534_v13  ;;  %v3857_v37 = vmul.f32 %v7133_v0, %v7775_v26 }
 0xfce   :  { %v4032_v62 = vcombine.low %v3855_v6, %v3856_v44  ;;  %v4046_v20 = vrot.slane %v4031_v42, %v7534_v13 }
 0xfcf   :  { %v4029_v9 = vcombine.low %v4021_v50, %v4028_v46  ;;  %4083 = vadd.xlane.f32.xlu0 %v4082_v41  ;;  %v4060_v60 = vrot.slane %v3857_v37, %v7534_v13 }
 0xfd0   :  { %v4053_v30 = vrot.slane %v4032_v62, %v7534_v13  ;;  %v4061_v32 = vcombine.low %v4039_v16, %v4046_v20 }
 0xfd1   :  { %v4088_v21 = vsel %vm1595_vm3, %v4029_v9, 0.0 }
 0xfd2   :  { %4089 = vadd.xlane.f32.xlu1 %v4088_v21  ;;  %v4062_v56 = vcombine.low %v4053_v30, %v4060_v60  ;;  %v4069_v49 = vrot.slane %v4061_v32, %v7534_v13 }
 0xfd4   :  { %v4076_v63 = vrot.slane %v4062_v56, %v7534_v13 }
 0xfd6   :  { %v4077_v15 = vcombine.low %v4069_v49, %v4076_v63 }
 0xfd8   :  { %v4091_v51 = vsel %vm1595_vm3, %v4077_v15, 0.0 }
 0xfd9   :  { %4092 = vadd.xlane.f32.xlu0 %v4091_v51 }
0x1054   :  { %v4087_v17 = vpop.xlane.xlu0 %4086 }
0x1055   :  { %v4101_v3 = vsel %vm1608_vm4, %v4087_v17, -inf }
0x1056   :  { %v4102_v59 = vrot.slane %v4101_v3, 4 }
0x1058   :  { %v4103_v2 = vmax.f32 %v4101_v3, %v4102_v59  ;;  %v4084_v4 = vpop.xlane.xlu0 %4083 }
0x1059   :  { %v4094_v48 = vsel %vm1608_vm4, %v4084_v4, -inf }
0x105a   :  { %v4104_v50 = vrot.slane %v4103_v2, 2  ;;  %v4095_v0 = vrot.slane %v4094_v48, 4 }
0x105b   :  { %v4090_v6 = vpop.xlane.xlu1 %4089 }
0x105c   :  { %v4108_v44 = vsel %vm1608_vm4, %v4090_v6, -inf  ;;  %v4105_v42 = vmax.f32 %v4103_v2, %v4104_v50  ;;  %v4096_v46 = vmax.f32 %v4094_v48, %v4095_v0 }
0x105d   :  { %v4109_v37 = vrot.slane %v4108_v44, 4 }
0x105e   :  { %v4106_v41 = vrot.slane %v4105_v42, 1  ;;  %v4097_v62 = vrot.slane %v4096_v46, 2 }
0x105f   :  { %v4110_v16 = vmax.f32 %v4108_v44, %v4109_v37 }
0x1060   :  { %v4107_v20 = vmax.f32 %v4105_v42, %v4106_v41  ;;  %v4098_v9 = vmax.f32 %v4096_v46, %v4097_v62 }
0x1061   :  { %v4111_v30 = vrot.slane %v4110_v16, 2 }
0x1062   :  { %v4123_v60 = vsub.f32 %v4087_v17, %v4107_v20  ;;  %v4099_v32 = vrot.slane %v4098_v9, 1  ;;  %v4093_v21 = vpop.xlane.xlu0 %4092 }
0x1063   :  { %v4112_v56 = vmax.f32 %v4110_v16, %v4111_v30  ;;  %v4115_v49 = vsel %vm1608_vm4, %v4093_v21, -inf }
0x1064   :  { %v4128_v63 = vmul.f32 1.442695, %v4123_v60  ;;  %v4100_v15 = vmax.f32 %v4098_v9, %v4099_v32  ;;  %v4116_v51 = vrot.slane %v4115_v49, 4 }
0x1065   :  { %v4113_v3 = vrot.slane %v4112_v56, 1 }
0x1066   :  { %7134 = vpow2.f32 %v4128_v63  ;;  %v4122_v59 = vsub.f32 %v4084_v4, %v4100_v15  ;;  %v4117_v2 = vmax.f32 %v4115_v49, %v4116_v51 }
0x1067   :  { %v4114_v48 = vmax.f32 %v4112_v56, %v4113_v3 }
0x1068   :  { %v4126_v50 = vmul.f32 1.442695, %v4122_v59  ;;  %v4118_v0 = vrot.slane %v4117_v2, 2 }
0x1069   :  { %v4124_v44 = vsub.f32 %v4090_v6, %v4114_v48 }
0x106a   :  { %7136 = vpow2.f32 %v4126_v50  ;;  %v4119_v42 = vmax.f32 %v4117_v2, %v4118_v0 }
0x106b   :  { %v4130_v46 = vmul.f32 1.442695, %v4124_v44 }
0x106c   :  { %v4120_v17 = vrot.slane %v4119_v42, 1 }
0x106d   :  { %7138 = vpow2.f32 %v4130_v46 }
0x106e   :  { %v4121_v37 = vmax.f32 %v4119_v42, %v4120_v17 }
0x1070   :  { %v4125_v41 = vsub.f32 %v4093_v21, %v4121_v37 }
0x1072   :  { %v4132_v62 = vmul.f32 1.442695, %v4125_v41 }
0x1073   :  { %v7135_v16 = vpop.eup %7134 }
0x1074   :  { %v4141_v20 = vsel %vm1608_vm4, %v7135_v16, 0.0  ;;  %7140 = vpow2.f32 %v4132_v62 }
0x1075   :  { %v4142_v9 = vrot.slane %v4141_v20, 4 }
0x1077   :  { %v7137_v30 = vpop.eup %7136  ;;  %v4143_v4 = vadd.f32 %v4142_v9, %v4141_v20 }
0x1078   :  { %v4134_v60 = vsel %vm1608_vm4, %v7137_v30, 0.0 }
0x1079   :  { %v4144_v32 = vrot.slane %v4143_v4, 2  ;;  %v4135_v56 = vrot.slane %v4134_v60, 4 }
0x107a   :  { %v7139_v6 = vpop.eup %7138 }
0x107b   :  { %v4148_v49 = vsel %vm1608_vm4, %v7139_v6, 0.0  ;;  %v4145_v63 = vadd.f32 %v4144_v32, %v4143_v4  ;;  %v4136_v15 = vadd.f32 %v4135_v56, %v4134_v60 }
0x107c   :  { %v4149_v51 = vrot.slane %v4148_v49, 4 }
0x107d   :  { %v4146_v3 = vrot.slane %v4145_v63, 1  ;;  %v4137_v21 = vrot.slane %v4136_v15, 2 }
0x107e   :  { %v4150_v59 = vadd.f32 %v4149_v51, %v4148_v49 }
0x107f   :  { %v4147_v2 = vadd.f32 %v4146_v3, %v4145_v63  ;;  %v4138_v48 = vadd.f32 %v4137_v21, %v4136_v15 }
0x1080   :  { %v4151_v50 = vrot.slane %v4150_v59, 2 }
0x1081   :  { %v7141_v0 = vpop.eup %7140  ;;  %7142 = vrcp.f32 %v4147_v2  ;;  %v4139_v44 = vrot.slane %v4138_v48, 1 }
0x1082   :  { %v4152_v42 = vadd.f32 %v4151_v50, %v4150_v59  ;;  %v4155_v46 = vsel %vm1608_vm4, %v7141_v0, 0.0 }
0x1083   :  { %v4140_v17 = vadd.f32 %v4139_v44, %v4138_v48  ;;  %v4156_v37 = vrot.slane %v4155_v46, 4 }
0x1084   :  { %v4153_v41 = vrot.slane %v4152_v42, 1 }
0x1085   :  { %7144 = vrcp.f32 %v4140_v17  ;;  %v4157_v62 = vadd.f32 %v4156_v37, %v4155_v46 }
0x1086   :  { %v4154_v20 = vadd.f32 %v4153_v41, %v4152_v42 }
0x1087   :  { %v4158_v9 = vrot.slane %v4157_v62, 2 }
0x1088   :  { %7146 = vrcp.f32 %v4154_v20 }
0x1089   :  { %v4159_v4 = vadd.f32 %v4158_v9, %v4157_v62 }
0x108b   :  { %v4160_v60 = vrot.slane %v4159_v4, 1 }
0x108d   :  { %v4161_v32 = vadd.f32 %v4160_v60, %v4159_v4 }
0x108e   :  { %v7143_v56 = vpop.eup %7142 }
0x108f   :  { %v4165_v49 = vmul.f32 %v7143_v56, %v7135_v16  ;;  %7148 = vrcp.f32 %v4161_v32 }
0x1091   :  { %v4171_v63 = vmul.f32 %v8526_v19, %v4165_v49 }
0x1092   :  { %v7145_v15 = vpop.eup %7144 }
0x1093   :  { %v4163_v51 = vmul.f32 %v7145_v15, %v7137_v30  ;;  %v4181_v3 = vsel %vm1595_vm3, %v4171_v63, 0.0 }
0x1094   :  { %v4182_v21 = vrot.slane %v4181_v3, 4 }
0x1095   :  { %v7147_v59 = vpop.eup %7146  ;;  %v4170_v2 = vmul.f32 %v8533_v1, %v4163_v51 }
0x1096   :  { %v4167_v48 = vmul.f32 %v7147_v59, %v7139_v6  ;;  %v4183_v50 = vadd.f32 %v4182_v21, %v4181_v3 }
0x1097   :  { %v4174_v44 = vsel %vm1595_vm3, %v4170_v2, 0.0 }
0x1098   :  { %v4172_v42 = vmul.f32 %v8540_v5, %v4167_v48  ;;  %v4175_v46 = vrot.slane %v4174_v44, 4  ;;  %v4184_v17 = vrot.slane %v4183_v50, 2 }
0x109a   :  { %v4176_v16 = vadd.f32 %v4175_v46, %v4174_v44  ;;  %v4188_v37 = vsel %vm1595_vm3, %v4172_v42, 0.0  ;;  %v4185_v62 = vadd.f32 %v4184_v17, %v4183_v50 }
0x109b   :  { %v4189_v19 = vrot.slane %v4188_v37, 4 }
0x109c   :  { %v7149_v41 = vpop.eup %7148  ;;  %v4177_v30 = vrot.slane %v4176_v16, 2  ;;  %v4186_v60 = vrot.slane %v4185_v62, 1 }
0x109d   :  { %v4169_v20 = vmul.f32 %v7149_v41, %v7141_v0  ;;  %v4190_v9 = vadd.f32 %v4189_v19, %v4188_v37 }
0x109e   :  { %v4178_v4 = vadd.f32 %v4177_v30, %v4176_v16  ;;  %v4187_v15 = vadd.f32 %v4186_v60, %v4185_v62  ;;  %v6792_v62 = vld [vmem:[%s9392_s1 + $0xc] sm:$0xf] }
0x109f   :  { %v4173_v1 = vmul.f32 %v8547_v45, %v4169_v20  ;;  %v4191_v6 = vrot.slane %v4190_v9, 2 }
0x10a0   :  { %v4179_v5 = vrot.slane %v4178_v4, 1  ;;  %v4203_v0 = vmul.f32 %v8554_v35, %v4187_v15 }
0x10a1   :  { %v4192_v32 = vadd.f32 %v4191_v6, %v4190_v9  ;;  %v4195_v56 = vsel %vm1595_vm3, %v4173_v1, 0.0  ;;  %v9533_v6 = vld [vmem:[#allocation11_spill] sm:$0xff] }
0x10a2   :  { %v4196_v49 = vrot.slane %v4195_v56, 4  ;;  %v4180_v3 = vadd.f32 %v4179_v5, %v4178_v4  ;;  %v4210_v42 = vrot.slane %v4203_v0, 7 }
0x10a3   :  { %v4193_v63 = vrot.slane %v4192_v32, 1 }
0x10a4   :  { %v4197_v51 = vadd.f32 %v4196_v49, %v4195_v56  ;;  %v4202_v50 = vmul.f32 %v8554_v35, %v4180_v3  ;;  %v9534_v3 = vld [vmem:[#allocation12_spill] sm:$0xff] }
0x10a5   :  { %v4194_v59 = vadd.f32 %v4193_v63, %v4192_v32 }
0x10a6   :  { %v4198_v21 = vrot.slane %v4197_v51, 2  ;;  %v4211_v17 = vsel %vm1730_vm5, %v4210_v42, %v4202_v50  ;;  %v9537_v42 = vld [vmem:[#allocation13_spill] sm:$0xff] }
0x10a7   :  { %v4204_v45 = vmul.f32 %v8554_v35, %v4194_v59 }
0x10a8   :  { %v4199_v2 = vadd.f32 %v4198_v21, %v4197_v51 }
0x10a9   :  { %v4212_v16 = vrot.slane %v4204_v45, 6  ;;  %v9535_v45 = vld [vmem:[#allocation31_spill] sm:$0xff] }
0x10aa   :  { %v4200_v48 = vrot.slane %v4199_v2, 1 }
0x10ab   :  { %v4213_v19 = vsel %vm1733_vm6, %v4212_v16, %v4211_v17  ;;  %v9539_v17 = vld [vmem:[#allocation15_spill] sm:$0xff]  ;;  %v9540_v16 = vld [vmem:[#allocation16_spill] sm:$0xff] }
0x10ac   :  { %v4201_v44 = vadd.f32 %v4200_v48, %v4199_v2 }
0x10ae   :  { %v4205_v46 = vmul.f32 %v8554_v35, %v4201_v44  ;;  %v9536_v44 = vmov 0.0  }
0x10b0   :  { %v4214_v37 = vrot.slane %v4205_v46, 5  ;;  %v9538_v46 = vld [vmem:[#allocation14_spill] sm:$0xff] }
0x10b2   :  { %v4215_v41 = vsel %vm1736_vm7, %v4214_v37, %v4213_v19  ;;  %v9541_v37 = vld [vmem:[#allocation17_spill] sm:$0xff]  ;;  %v9542_v19 = vld [vmem:[#allocation18_spill] sm:$0xff] }
0x10b3   :  { %v4217_v30 = vsel %vm1739_vm8, %v4215_v41, 0.0  ;;  %v9543_v41 = vld [vmem:[#allocation19_spill] sm:$0xff] }
0x10b4   :  { %4218 = vadd.xlane.f32.xlu0 %v4217_v30  ;;  %v9544_v30 = vld [vmem:[#allocation20_spill] sm:$0xff] }
0x113d   :  { %v4219_v20 = vpop.xlane.xlu0 %4218 }
0x113e   :  { %v4222_v9 = vadd.f32 %v6792_v62, %v4219_v20  ;;  %v9545_v62 = vld [vmem:[#allocation21_spill] sm:$0xff]  ;;  %v9546_v20 = vld [vmem:[#allocation22_spill] sm:$0xff] }
0x1140   :  { %4225 = vperm.xlu1 %6832, %v4222_v9   ;;  %v9547_v9 = vld [vmem:[#allocation23_spill] sm:$0xff] }
0x11bb   :  { %v4226_v4 = vpop.permute.xlu1 %4225 }
0x11bc   :  { %v4228_v35 = vmul.f32 %v8570_v43, %v4226_v4  ;;  %v9548_v4 = vld [vmem:[#allocation24_spill] sm:$0xff] }
0x11be   :  { %v4229_v1 = vadd.f32 %v4228_v35, %v8682_v57  ;;  %v9549_v35 = vld [vmem:[#allocation25_spill] sm:$0xff] }
0x11c0   :  { %v4230_v60 = vadd.f32 %v9533_v6, %v4229_v1  ;;  %v9550_v1 = vld [vmem:[#allocation26_spill] sm:$0xff] }
0x11c2   :  { %7150 = vtanh.f32 %v4230_v60  ;;  %v6793_v56 = vmul.f32 -1.442695, %v4230_v60 }
0x11c4   :  { %7152 = vpow2.f32 %v6793_v56 }
0x11cf   :  { %v7151_v32 = vpop.eup %7150 }
0x11d0   :  { %4240 = vrot.lane.b32.xlu0 %v7151_v32, %s7458_s11 }
0x11d1   :  { %v7153_v5 = vpop.eup %7152 }
0x11d2   :  { %v4234_v49 = vadd.f32 1.0, %v7153_v5 }
0x11d4   :  { %7154 = vrcp.f32 %v4234_v49 }
0x11e1   :  { %v7155_v63 = vpop.eup %7154 }
0x11e2   :  { %v4238_v43 = vmul.f32 %v7155_v63, %v9534_v3 }
0x1242   :  { %v4241_v15 = vpop.permute.xlu0 %4240 }
0x1243   :  { %v4243_v51 = vmul.f32 %v7155_v63, %v4241_v15 }
0x1245   :  { %4245 = vrot.lane.b32.xlu1 %v4243_v51, %s7458_s11 }
0x12b7   :  { %v4246_v21 = vpop.permute.xlu1 %4245 }
0x12b8   :  { %v4248_v57 = vadd.f32 %v4246_v21, %v4238_v43 }
0x12ba   :  { %7156 = vtanh.f32 %v4248_v57 }
0x12c7   :  { %v7157_v59 = vpop.eup %7156 }
0x12c8   :  { %4251 = vrot.lane.b32.xlu1 %v7157_v59, %s7458_s11 }
0x133a   :  { %v4252_v2 = vpop.permute.xlu1 %4251 }
0x133b   :  { %v4254_v0 = vmul.f32 %v7155_v63, %v4252_v2 }
0x133d   :  { %4256 = vrot.lane.b32.xlu1 %v4254_v0, %s7459_s12 }
0x13af   :  { %v4257_v48 = vpop.permute.xlu1 %4256 }
0x13b0   :  { %4259 = vst.msk [vmem:[#allocation2] sm:$0xf] %vm1739_vm8, %v4257_v48 }
0x13b1   :  { %4260 = vst.msk [vmem:[#allocation2] sm:$0xf] %vm1790_vm9, %v4248_v57 }
0x13b8   :  { %v8836_v50 = vld [vmem:[#allocation2] sm:$0xf] }
0x13b9   :  { %6794 = vmatmul.mubr.msk.f32.vlgmr.msra.gmra.mxu1 %vm891_vm1, %v8836_v50 }
0x13ba   :  { %5928 = vmatpush1.msra.mxu1 %v9535_v45  ;;  %5975 = vmatprep.mubr.f32.mxu1 %v9536_v44 }
0x13bb   :  { %5929 = vmatprep.subr.mxu1 %v9537_v42 }
0x13bc   :  { %5930 = vmatpush1.msra.mxu1 %v9538_v46 }
0x13bd   :  { %5931 = vmatprep.subr.mxu1 %v9539_v17 }
0x13be   :  { %5932 = vmatpush1.msra.mxu1 %v9540_v16 }
0x13bf   :  { %5933 = vmatprep.subr.mxu1 %v9541_v37 }
0x13c0   :  { %5934 = vmatpush1.msra.mxu1 %v9542_v19 }
0x13c1   :  { %5935 = vmatprep.subr.mxu1 %v9543_v41  ;;  %v9551_v41 = vld [vmem:[#allocation4_spill] sm:$0xff] }
0x13c2   :  { %5936 = vmatpush1.msra.mxu1 %v9544_v30 }
0x13c3   :  { %5937 = vmatprep.subr.mxu1 %v9545_v62 }
0x13c4   :  { %5938 = vmatpush1.msra.mxu1 %v9546_v20 }
0x13c5   :  { %5939 = vmatprep.subr.mxu1 %v9547_v9 }
0x13c6   :  { %5940 = vmatpush1.msra.mxu1 %v9548_v4  ;;  %v9552_v4 = vld [vmem:[#allocation5_spill] sm:$0xff] }
0x13c7   :  { %5941 = vmatprep.subr.mxu1 %v9549_v35 }
0x13c8   :  { %5942 = vmatpush1.msra.mxu1 %v9550_v1 }
0x1479   :  { %v8856_v6 = vpop.f32.mrf.mxu1 }
0x147b   :  { %v4333_v60 = vpop.f32.mrf.mxu1 }
0x147c   :  { %v4343_v32 = vrot.slane %v4333_v60, %v7534_v13 }
0x147e   :  { %v4351_v56 = vrot.slane %v4343_v32, %v7534_v13  ;;  %v4344_v5 = vcombine.high %v4343_v32, %v4343_v32 }
0x1480   :  { %v4364_v49 = vrot.slane %v4351_v56, %v7720_v33  ;;  %v4358_v63 = vrot.slane %v4344_v5, %v7534_v13  ;;  %v4359_v21 = vcombine.high %v4351_v56, %v4351_v56 }
0x1482   :  { %v4384_v15 = vrot.slane %v4364_v49, %v7534_v13  ;;  %v4377_v51 = vcombine.high %v4364_v49, %v4364_v49  ;;  %v4368_v3 = vrot.slane %v4358_v63, %v7720_v33  ;;  %v4372_v45 = vrot.slane %v4359_v21, %v7720_v33 }
0x1483   :  { %v4360_v16 = vcombine.high %v4358_v63, %v4358_v63 }
0x1484   :  { %v4392_v43 = vcombine.high %v4384_v15, %v4384_v15  ;;  %v4391_v57 = vrot.slane %v4377_v51, %v7534_v13  ;;  %v4400_v59 = vrot.slane %v4384_v15, %v7534_v13  ;;  %v4432_v2 = vrot.slane %v4368_v3, %v7534_v13 }
0x1485   :  { %v4425_v48 = vcombine.high %v4368_v3, %v4368_v3  ;;  %v4480_v9 = vrot.slane %v4372_v45, %v7534_v13  ;;  %v4473_v32 = vcombine.high %v4372_v45, %v4372_v45  ;;  %v4376_v5 = vrot.slane %v4360_v16, %v7720_v33 }
0x1486   :  { %v4414_v0 = vrot.slane %v4392_v43, %v7534_v13  ;;  %v4393_v44 = vcombine.high %v4391_v57, %v4391_v57  ;;  %v4407_v42 = vrot.slane %v4391_v57, %v7534_v13  ;;  %v4422_v46 = vcombine.high %v4400_v59, %v4400_v59 }
0x1487   :  { %v4440_v17 = vcombine.high %v4432_v2, %v4432_v2  ;;  %v4439_v19 = vrot.slane %v4425_v48, %v7534_v13  ;;  %v4597_v30 = vadd.f32 %v4400_v59, %v9551_v41  ;;  %v4448_v20 = vrot.slane %v4432_v2, %v7534_v13 }
0x1488   :  { %v4424_v37 = vcombine.high %v4414_v0, %v4414_v0  ;;  %v4421_v62 = vrot.slane %v4393_v44, %v7534_v13  ;;  %v4598_v35 = vadd.f32 %v4414_v0, %v9552_v4  ;;  %v4423_v1 = vcombine.high %v4407_v42, %v4407_v42 }
0x1489   :  { %v4462_v60 = vrot.slane %v4440_v17, %v7534_v13  ;;  %v4599_v56 = vadd.f32 %v4422_v46, %v7837_v14  ;;  %v4441_v49 = vcombine.high %v4439_v19, %v4439_v19  ;;  %v4455_v15 = vrot.slane %v4439_v19, %v7534_v13 }
0x148a   :  { %v4600_v63 = vadd.f32 %v4424_v37, %v7845_v29  ;;  %v4601_v51 = vadd.f32 %v4407_v42, %v7833_v12  ;;  %7158 = vtanh.f32 %v4597_v30  ;;  %v4470_v3 = vcombine.high %v4448_v20, %v4448_v20 }
0x148b   :  { %v4488_v43 = vcombine.high %v4480_v9, %v4480_v9  ;;  %v4602_v21 = vadd.f32 %v4421_v62, %v7841_v25  ;;  %7160 = vtanh.f32 %v4598_v35  ;;  %v4472_v57 = vcombine.high %v4462_v60, %v4462_v60 }
0x148c   :  { %v4487_v59 = vrot.slane %v4473_v32, %v7534_v13  ;;  %v4603_v2 = vadd.f32 %v4423_v1, %v7863_v28  ;;  %7162 = vtanh.f32 %v4599_v56  ;;  %v4469_v0 = vrot.slane %v4441_v49, %v7534_v13 }
0x148d   :  { %v4521_v48 = vcombine.high %v4376_v5, %v4376_v5  ;;  %v4604_v45 = vadd.f32 %v4448_v20, %v7869_v10  ;;  %7164 = vtanh.f32 %v4600_v63  ;;  %v4496_v44 = vrot.slane %v4480_v9, %v7534_v13  ;;  %v9553_v63 = vld [vmem:[#allocation8_spill] sm:$0xff] }
0x148e   :  { %v4528_v42 = vrot.slane %v4376_v5, %v7534_v13  ;;  %v4605_v46 = vadd.f32 %v4462_v60, %v7855_v36  ;;  %7166 = vtanh.f32 %v4601_v51  ;;  %v4471_v17 = vcombine.high %v4455_v15, %v4455_v15 }
0x148f   :  { %v4510_v16 = vrot.slane %v4488_v43, %v7534_v13  ;;  %v4606_v37 = vadd.f32 %v4470_v3, %v7859_v39  ;;  %7168 = vtanh.f32 %v4602_v21  ;;  %v4489_v19 = vcombine.high %v4487_v59, %v4487_v59  ;;  %v9554_v43 = vld [vmem:[#allocation9_spill] sm:$0xff] }
0x1490   :  { %v4607_v30 = vadd.f32 %v4472_v57, %v7882_v61  ;;  %7170 = vtanh.f32 %v4603_v2  ;;  %v4503_v62 = vrot.slane %v4487_v59, %v7534_v13  ;;  %v4535_v20 = vrot.slane %v4521_v48, %v7534_v13  ;;  %v9555_v2 = vld [vmem:[#allocation7_spill] sm:$0xff] }
0x1491   :  { %v4608_v9 = vadd.f32 %v4455_v15, %v7886_v53  ;;  %7172 = vtanh.f32 %v4604_v45  ;;  %v4518_v35 = vcombine.high %v4496_v44, %v4496_v44  ;;  %v4536_v1 = vcombine.high %v4528_v42, %v4528_v42 }
0x1492   :  { %v4609_v60 = vadd.f32 %v4469_v0, %v7910_v18  ;;  %7174 = vtanh.f32 %v4605_v46  ;;  %v4520_v32 = vcombine.high %v4510_v16, %v4510_v16  ;;  %v4610_v56 = vadd.f32 %v4471_v17, %v7903_v7 }
0x1493   :  { %7176 = vtanh.f32 %v4606_v37  ;;  %v4517_v5 = vrot.slane %v4489_v19, %v7534_v13  ;;  %v4544_v49 = vrot.slane %v4528_v42, %v7534_v13  ;;  %v4611_v51 = vadd.f32 %v4496_v44, %v9553_v63  ;;  %v9556_v44 = vld [vmem:[#allocation10_spill] sm:$0xff] }
0x1494   :  { %7178 = vtanh.f32 %v4607_v30  ;;  %v4537_v3 = vcombine.high %v4535_v20, %v4535_v20  ;;  %v4551_v15 = vrot.slane %v4535_v20, %v7534_v13  ;;  %v4612_v21 = vadd.f32 %v4510_v16, %v9554_v43 }
0x1495   :  { %7180 = vtanh.f32 %v4608_v9  ;;  %v4519_v57 = vcombine.high %v4503_v62, %v4503_v62  ;;  %v4558_v59 = vrot.slane %v4536_v1, %v7534_v13  ;;  %v4613_v0 = vadd.f32 %v4518_v35, %v9555_v2  ;;  %v9557_v1 = vld [vmem:[#allocation6_spill] sm:$0xff] }
0x1496   :  { %7182 = vtanh.f32 %v4609_v60  ;;  %v4614_v45 = vadd.f32 %v4520_v32, %v7957_v55  ;;  %v4566_v46 = vcombine.high %v4544_v49, %v4544_v49  ;;  %v4615_v17 = vadd.f32 %v4503_v62, %v9556_v44 }
0x1497   :  { %v7159_v48 = vpop.eup %7158  ;;  %7184 = vtanh.f32 %v4610_v56  ;;  %v4565_v19 = vrot.slane %v4537_v3, %v7534_v13  ;;  %v4567_v16 = vcombine.high %v4551_v15, %v4551_v15  ;;  %v4616_v30 = vadd.f32 %v4517_v5, %v7980_v24 }
0x1498   :  { %v7161_v42 = vpop.eup %7160  ;;  %7186 = vtanh.f32 %v4611_v51  ;;  %v4568_v9 = vcombine.high %v4558_v59, %v4558_v59  ;;  %v4617_v35 = vadd.f32 %v4519_v57, %v7891_v31  ;;  %v4618_v60 = vadd.f32 %v4544_v49, %v9557_v1 }
0x1499   :  { %v7163_v37 = vpop.eup %7162  ;;  %7188 = vtanh.f32 %v4612_v21  ;;  %v4654_v56 = vmul.f32 %v7161_v42, %v7761_v38  ;;  %v4619_v44 = vadd.f32 %v4558_v59, %v7918_v27  ;;  %v4620_v5 = vadd.f32 %v4566_v46, %v7927_v58 }
0x149a   :  { %v7165_v20 = vpop.eup %7164  ;;  %7190 = vtanh.f32 %v4613_v0  ;;  %v4655_v62 = vmul.f32 %v7163_v37, %v7771_v23  ;;  %v4653_v21 = vmul.f32 %v7159_v48, %v7752_v8  ;;  %v4621_v37 = vadd.f32 %v4568_v9, %v7913_v34 }
0x149b   :  { %v7167_v32 = vpop.eup %7166  ;;  %7192 = vtanh.f32 %v4614_v45  ;;  %v4656_v51 = vmul.f32 %v7165_v20, %v7794_v47  ;;  %v4622_v1 = vadd.f32 %v4551_v15, %v7923_v40  ;;  %v4623_v48 = vadd.f32 %v4565_v19, %v7949_v52 }
0x149c   :  { %v7169_v3 = vpop.eup %7168  ;;  %7194 = vtanh.f32 %v4615_v17  ;;  %v4657_v49 = vmul.f32 %v7167_v32, %v7755_v11  ;;  %v4709_v59 = vcombine.low %v4653_v21, %v4654_v56 }
0x149d   :  { %v7171_v57 = vpop.eup %7170  ;;  %7196 = vtanh.f32 %v4616_v30  ;;  %v4658_v0 = vmul.f32 %v7169_v3, %v7767_v22  ;;  %v4710_v45 = vcombine.low %v4655_v62, %v4656_v51  ;;  %v4624_v62 = vadd.f32 %v4567_v16, %v7954_v54 }
0x149e   :  { %v7173_v42 = vpop.eup %7172  ;;  %7198 = vtanh.f32 %v4617_v35  ;;  %v4659_v9 = vmul.f32 %v7171_v57, %v7775_v26  ;;  %v4718_v51 = vrot.slane %v4709_v59, %v7534_v13 }
0x149f   :  { %v7175_v20 = vpop.eup %7174  ;;  %7200 = vtanh.f32 %v4618_v60  ;;  %v4711_v46 = vcombine.low %v4657_v49, %v4658_v0  ;;  %v4660_v30 = vmul.f32 %v7173_v42, %v7752_v8  ;;  %v4725_v35 = vrot.slane %v4710_v45, %v7534_v13 }
0x14a0   :  { %v7177_v17 = vpop.eup %7176  ;;  %7202 = vtanh.f32 %v4619_v44  ;;  %v4661_v32 = vmul.f32 %v7175_v20, %v7761_v38  ;;  %v4739_v42 = vrot.slane %v4659_v9, %v7534_v13 }
0x14a1   :  { %v7179_v3 = vpop.eup %7178  ;;  %7204 = vtanh.f32 %v4620_v5  ;;  %v4662_v60 = vmul.f32 %v7177_v17, %v7771_v23  ;;  %v4732_v21 = vrot.slane %v4711_v46, %v7534_v13  ;;  %v4740_v46 = vcombine.low %v4718_v51, %v4725_v35 }
0x14a2   :  { %v7181_v15 = vpop.eup %7180  ;;  %7206 = vtanh.f32 %v4621_v37  ;;  %v4663_v56 = vmul.f32 %v7179_v3, %v7794_v47  ;;  %v4757_v19 = vcombine.low %v4660_v30, %v4661_v32 }
0x14a3   :  { %v7183_v44 = vpop.eup %7182  ;;  %7208 = vtanh.f32 %v4622_v1  ;;  %v4664_v16 = vmul.f32 %v7181_v15, %v7755_v11  ;;  %v4741_v32 = vcombine.low %v4732_v21, %v4739_v42 }
0x14a4   :  { %v7185_v49 = vpop.eup %7184  ;;  %7210 = vtanh.f32 %v4623_v48  ;;  %v4665_v5 = vmul.f32 %v7183_v44, %v7767_v22  ;;  %v4758_v57 = vcombine.low %v4662_v60, %v4663_v56  ;;  %v4766_v1 = vrot.slane %v4757_v19, %v7534_v13 }
0x14a5   :  { %v7187_v0 = vpop.eup %7186  ;;  %7212 = vtanh.f32 %v4624_v62  ;;  %v4666_v45 = vmul.f32 %v7185_v49, %v7775_v26 }
0x14a6   :  { %v7189_v37 = vpop.eup %7188  ;;  %v4759_v20 = vcombine.low %v4664_v16, %v4665_v5  ;;  %v4773_v59 = vrot.slane %v4758_v57, %v7534_v13  ;;  %v4667_v48 = vmul.f32 %v7187_v0, %v7752_v8  ;;  %v4748_v16 = vrot.slane %v4740_v46, %v7534_v13 }
0x14a7   :  { %v7191_v17 = vpop.eup %7190  ;;  %v4668_v30 = vmul.f32 %v7189_v37, %v7761_v38  ;;  %v4787_v15 = vrot.slane %v4666_v45, %v7534_v13  ;;  %v4755_v45 = vrot.slane %v4741_v32, %v7534_v13 }
0x14a8   :  { %v7193_v3 = vpop.eup %7192  ;;  %v4780_v62 = vrot.slane %v4759_v20, %v7534_v13  ;;  %v4788_v60 = vcombine.low %v4766_v1, %v4773_v59  ;;  %v4669_v56 = vmul.f32 %v7191_v17, %v7771_v23 }
0x14a9   :  { %v7195_v9 = vpop.eup %7194  ;;  %v4670_v19 = vmul.f32 %v7193_v3, %v7794_v47  ;;  %v4805_v44 = vcombine.low %v4667_v48, %v4668_v30 }
0x14aa   :  { %v7197_v49 = vpop.eup %7196  ;;  %v4789_v35 = vcombine.low %v4780_v62, %v4787_v15  ;;  %v4796_v51 = vrot.slane %v4788_v60, %v7534_v13  ;;  %v4671_v21 = vmul.f32 %v7195_v9, %v7755_v11 }
0x14ab   :  { %v7199_v5 = vpop.eup %7198  ;;  %v4672_v57 = vmul.f32 %v7197_v49, %v7767_v22  ;;  %v4806_v0 = vcombine.low %v4669_v56, %v4670_v19  ;;  %v4814_v17 = vrot.slane %v4805_v44, %v7534_v13  ;;  %v4756_v56 = vcombine.low %v4748_v16, %v4755_v45 }
0x14ac   :  { %v7201_v42 = vpop.eup %7200  ;;  %v4673_v37 = vmul.f32 %v7199_v5, %v7775_v26  ;;  %v4803_v20 = vrot.slane %v4789_v35, %v7534_v13 }
0x14ad   :  { %v7203_v1 = vpop.eup %7202  ;;  %v4807_v59 = vcombine.low %v4671_v21, %v4672_v57  ;;  %v4821_v48 = vrot.slane %v4806_v0, %v7534_v13  ;;  %v4674_v3 = vmul.f32 %v7201_v42, %v7752_v8 }
0x14ae   :  { %v7205_v46 = vpop.eup %7204  ;;  %v4804_v30 = vcombine.low %v4796_v51, %v4803_v20  ;;  %v4675_v62 = vmul.f32 %v7203_v1, %v7761_v38  ;;  %v4835_v60 = vrot.slane %v4673_v37, %v7534_v13  ;;  %v4905_v1 = vsel %vm1595_vm3, %v4756_v56, 0.0 }
0x14af   :  { %v7207_v15 = vpop.eup %7206  ;;  %v4828_v32 = vrot.slane %v4807_v59, %v7534_v13  ;;  %v4836_v9 = vcombine.low %v4814_v17, %v4821_v48  ;;  %v4676_v44 = vmul.f32 %v7205_v46, %v7771_v23 }
0x14b0   :  { %v7209_v19 = vpop.eup %7208  ;;  %v4908_v49 = vsel %vm1595_vm3, %v4804_v30, 0.0  ;;  %v4677_v35 = vmul.f32 %v7207_v15, %v7794_v47  ;;  %v4853_v5 = vcombine.low %v4674_v3, %v4675_v62 }
0x14b1   :  { %v7211_v51 = vpop.eup %7210  ;;  %v4837_v21 = vcombine.low %v4828_v32, %v4835_v60  ;;  %v4844_v57 = vrot.slane %v4836_v9, %v7534_v13  ;;  %4909 = vadd.xlane.f32.xlu0 %v4908_v49  ;;  %v4678_v42 = vmul.f32 %v7209_v19, %v7755_v11 }
0x14b2   :  { %v7213_v0 = vpop.eup %7212  ;;  %v4679_v37 = vmul.f32 %v7211_v51, %v7767_v22  ;;  %v4854_v20 = vcombine.low %v4676_v44, %v4677_v35  ;;  %v4862_v17 = vrot.slane %v4853_v5, %v7534_v13 }
0x14b3   :  { %v4851_v16 = vrot.slane %v4837_v21, %v7534_v13  ;;  %v4680_v45 = vmul.f32 %v7213_v0, %v7775_v26 }
0x14b4   :  { %v4855_v59 = vcombine.low %v4678_v42, %v4679_v37  ;;  %v4869_v48 = vrot.slane %v4854_v20, %v7534_v13 }
0x14b5   :  { %v4852_v46 = vcombine.low %v4844_v57, %v4851_v16  ;;  %4906 = vadd.xlane.f32.xlu0 %v4905_v1  ;;  %v4883_v3 = vrot.slane %v4680_v45, %v7534_v13 }
0x14b6   :  { %v4876_v30 = vrot.slane %v4855_v59, %v7534_v13  ;;  %v4884_v62 = vcombine.low %v4862_v17, %v4869_v48 }
0x14b7   :  { %v4911_v15 = vsel %vm1595_vm3, %v4852_v46, 0.0 }
0x14b8   :  { %4912 = vadd.xlane.f32.xlu1 %v4911_v15  ;;  %v4885_v32 = vcombine.low %v4876_v30, %v4883_v3  ;;  %v4892_v60 = vrot.slane %v4884_v62, %v7534_v13 }
0x14ba   :  { %v4899_v9 = vrot.slane %v4885_v32, %v7534_v13 }
0x14bc   :  { %v4900_v56 = vcombine.low %v4892_v60, %v4899_v9 }
0x14be   :  { %v4914_v19 = vsel %vm1595_vm3, %v4900_v56, 0.0 }
0x14bf   :  { %4915 = vadd.xlane.f32.xlu0 %v4914_v19 }
0x153a   :  { %v4910_v49 = vpop.xlane.xlu0 %4909 }
0x153b   :  { %v4924_v44 = vsel %vm1608_vm4, %v4910_v49, -inf }
0x153c   :  { %v4925_v35 = vrot.slane %v4924_v44, 4 }
0x153e   :  { %v4926_v5 = vmax.f32 %v4924_v44, %v4925_v35  ;;  %v4907_v51 = vpop.xlane.xlu0 %4906 }
0x153f   :  { %v4917_v21 = vsel %vm1608_vm4, %v4907_v51, -inf }
0x1540   :  { %v4927_v57 = vrot.slane %v4926_v5, 2  ;;  %v4918_v0 = vrot.slane %v4917_v21, 4 }
0x1541   :  { %v4913_v42 = vpop.xlane.xlu1 %4912 }
0x1542   :  { %v4931_v37 = vsel %vm1608_vm4, %v4913_v42, -inf  ;;  %v4928_v20 = vmax.f32 %v4926_v5, %v4927_v57  ;;  %v4919_v16 = vmax.f32 %v4917_v21, %v4918_v0 }
0x1543   :  { %v4932_v45 = vrot.slane %v4931_v37, 4 }
0x1544   :  { %v4929_v1 = vrot.slane %v4928_v20, 1  ;;  %v4920_v59 = vrot.slane %v4919_v16, 2 }
0x1545   :  { %v4933_v17 = vmax.f32 %v4931_v37, %v4932_v45 }
0x1546   :  { %v4930_v48 = vmax.f32 %v4928_v20, %v4929_v1  ;;  %v4921_v46 = vmax.f32 %v4919_v16, %v4920_v59 }
0x1547   :  { %v4934_v30 = vrot.slane %v4933_v17, 2 }
0x1548   :  { %v4946_v3 = vsub.f32 %v4910_v49, %v4930_v48  ;;  %v4922_v62 = vrot.slane %v4921_v46, 1  ;;  %v4916_v15 = vpop.xlane.xlu0 %4915 }
0x1549   :  { %v4935_v32 = vmax.f32 %v4933_v17, %v4934_v30  ;;  %v4938_v60 = vsel %vm1608_vm4, %v4916_v15, -inf }
0x154a   :  { %v4951_v9 = vmul.f32 1.442695, %v4946_v3  ;;  %v4923_v56 = vmax.f32 %v4921_v46, %v4922_v62  ;;  %v4939_v19 = vrot.slane %v4938_v60, 4 }
0x154b   :  { %v4936_v44 = vrot.slane %v4935_v32, 1 }
0x154c   :  { %7214 = vpow2.f32 %v4951_v9  ;;  %v4945_v35 = vsub.f32 %v4907_v51, %v4923_v56  ;;  %v4940_v5 = vmax.f32 %v4938_v60, %v4939_v19 }
0x154d   :  { %v4937_v21 = vmax.f32 %v4935_v32, %v4936_v44 }
0x154e   :  { %v4949_v57 = vmul.f32 1.442695, %v4945_v35  ;;  %v4941_v0 = vrot.slane %v4940_v5, 2 }
0x154f   :  { %v4947_v37 = vsub.f32 %v4913_v42, %v4937_v21 }
0x1550   :  { %7216 = vpow2.f32 %v4949_v57  ;;  %v4942_v20 = vmax.f32 %v4940_v5, %v4941_v0 }
0x1551   :  { %v4953_v16 = vmul.f32 1.442695, %v4947_v37 }
0x1552   :  { %v4943_v49 = vrot.slane %v4942_v20, 1 }
0x1553   :  { %7218 = vpow2.f32 %v4953_v16 }
0x1554   :  { %v4944_v45 = vmax.f32 %v4942_v20, %v4943_v49 }
0x1556   :  { %v4948_v1 = vsub.f32 %v4916_v15, %v4944_v45 }
0x1558   :  { %v4955_v59 = vmul.f32 1.442695, %v4948_v1 }
0x1559   :  { %v7215_v17 = vpop.eup %7214 }
0x155a   :  { %v4964_v48 = vsel %vm1608_vm4, %v7215_v17, 0.0  ;;  %7220 = vpow2.f32 %v4955_v59 }
0x155b   :  { %v4965_v46 = vrot.slane %v4964_v48, 4 }
0x155d   :  { %v7217_v30 = vpop.eup %7216  ;;  %v4966_v51 = vadd.f32 %v4965_v46, %v4964_v48 }
0x155e   :  { %v4957_v3 = vsel %vm1608_vm4, %v7217_v30, 0.0 }
0x155f   :  { %v4967_v62 = vrot.slane %v4966_v51, 2  ;;  %v4958_v32 = vrot.slane %v4957_v3, 4 }
0x1560   :  { %v7219_v42 = vpop.eup %7218 }
0x1561   :  { %v4971_v60 = vsel %vm1608_vm4, %v7219_v42, 0.0  ;;  %v4968_v9 = vadd.f32 %v4967_v62, %v4966_v51  ;;  %v4959_v56 = vadd.f32 %v4958_v32, %v4957_v3 }
0x1562   :  { %v4972_v19 = vrot.slane %v4971_v60, 4 }
0x1563   :  { %v4969_v44 = vrot.slane %v4968_v9, 1  ;;  %v4960_v15 = vrot.slane %v4959_v56, 2 }
0x1564   :  { %v4973_v35 = vadd.f32 %v4972_v19, %v4971_v60 }
0x1565   :  { %v4970_v5 = vadd.f32 %v4969_v44, %v4968_v9  ;;  %v4961_v21 = vadd.f32 %v4960_v15, %v4959_v56  ;;  %v8984_v9 = vld [vmem:[%s9390_s0 + $0x8] sm:$0x7f] }
0x1566   :  { %v4974_v57 = vrot.slane %v4973_v35, 2 }
0x1567   :  { %v7221_v0 = vpop.eup %7220  ;;  %7222 = vrcp.f32 %v4970_v5  ;;  %v4962_v37 = vrot.slane %v4961_v21, 1 }
0x1568   :  { %v4975_v20 = vadd.f32 %v4974_v57, %v4973_v35  ;;  %v4978_v16 = vsel %vm1608_vm4, %v7221_v0, 0.0 }
0x1569   :  { %v4963_v49 = vadd.f32 %v4962_v37, %v4961_v21  ;;  %v4979_v45 = vrot.slane %v4978_v16, 4  ;;  %v8991_v21 = vld [vmem:[%s9390_s0] sm:$0x7f] }
0x156a   :  { %v4976_v1 = vrot.slane %v4975_v20, 1 }
0x156b   :  { %7224 = vrcp.f32 %v4963_v49  ;;  %v4980_v59 = vadd.f32 %v4979_v45, %v4978_v16  ;;  %v8998_v16 = vld [vmem:[%s9390_s0 + $0x10] sm:$0x7f] }
0x156c   :  { %v4977_v48 = vadd.f32 %v4976_v1, %v4975_v20 }
0x156d   :  { %v4981_v46 = vrot.slane %v4980_v59, 2 }
0x156e   :  { %7226 = vrcp.f32 %v4977_v48 }
0x156f   :  { %v4982_v51 = vadd.f32 %v4981_v46, %v4980_v59 }
0x1571   :  { %v4983_v3 = vrot.slane %v4982_v51, 1 }
0x1573   :  { %v4984_v62 = vadd.f32 %v4983_v3, %v4982_v51 }
0x1574   :  { %v7223_v32 = vpop.eup %7222 }
0x1575   :  { %v4988_v60 = vmul.f32 %v7223_v32, %v7215_v17  ;;  %7228 = vrcp.f32 %v4984_v62 }
0x1577   :  { %v4994_v56 = vmul.f32 %v8984_v9, %v4988_v60  ;;  %v9005_v60 = vld [vmem:[%s9390_s0 + $0x18] sm:$0x7f] }
0x1578   :  { %v7225_v19 = vpop.eup %7224 }
0x1579   :  { %v4986_v44 = vmul.f32 %v7225_v19, %v7217_v30  ;;  %v5004_v15 = vsel %vm1595_vm3, %v4994_v56, 0.0 }
0x157a   :  { %v5005_v35 = vrot.slane %v5004_v15, 4 }
0x157b   :  { %v7227_v5 = vpop.eup %7226  ;;  %v4993_v17 = vmul.f32 %v8991_v21, %v4986_v44 }
0x157c   :  { %v4990_v57 = vmul.f32 %v7227_v5, %v7219_v42  ;;  %v5006_v37 = vadd.f32 %v5005_v35, %v5004_v15 }
0x157d   :  { %v4997_v20 = vsel %vm1595_vm3, %v4993_v17, 0.0 }
0x157e   :  { %v4995_v30 = vmul.f32 %v8998_v16, %v4990_v57  ;;  %v4998_v49 = vrot.slane %v4997_v20, 4  ;;  %v5007_v45 = vrot.slane %v5006_v37, 2 }
0x1580   :  { %v4999_v1 = vadd.f32 %v4998_v49, %v4997_v20  ;;  %v5011_v59 = vsel %vm1595_vm3, %v4995_v30, 0.0  ;;  %v5008_v3 = vadd.f32 %v5007_v45, %v5006_v37 }
0x1581   :  { %v5012_v48 = vrot.slane %v5011_v59, 4 }
0x1582   :  { %v7229_v46 = vpop.eup %7228  ;;  %v5000_v51 = vrot.slane %v4999_v1, 2  ;;  %v5009_v44 = vrot.slane %v5008_v3, 1 }
0x1583   :  { %v4992_v42 = vmul.f32 %v7229_v46, %v7221_v0  ;;  %v5013_v62 = vadd.f32 %v5012_v48, %v5011_v59 }
0x1584   :  { %v5001_v32 = vadd.f32 %v5000_v51, %v4999_v1  ;;  %v5010_v20 = vadd.f32 %v5009_v44, %v5008_v3  ;;  %v9012_v1 = vld [vmem:[%s9391_s3 + $0x4] ss:$0 sm:$0xff] }
0x1585   :  { %v4996_v56 = vmul.f32 %v9005_v60, %v4992_v42  ;;  %v5014_v19 = vrot.slane %v5013_v62, 2 }
0x1586   :  { %v5002_v5 = vrot.slane %v5001_v32, 1  ;;  %v5026_v59 = vmul.f32 %v9012_v1, %v5010_v20 }
0x1587   :  { %v5015_v15 = vadd.f32 %v5014_v19, %v5013_v62  ;;  %v5018_v35 = vsel %vm1595_vm3, %v4996_v56, 0.0 }
0x1588   :  { %v5019_v17 = vrot.slane %v5018_v35, 4  ;;  %v5003_v0 = vadd.f32 %v5002_v5, %v5001_v32  ;;  %v5033_v62 = vrot.slane %v5026_v59, 7  ;;  %v6795_v5 = vld [vmem:[%s9392_s1 + $0x10] sm:$0xf] }
0x1589   :  { %v5016_v57 = vrot.slane %v5015_v15, 1 }
0x158a   :  { %v5020_v37 = vadd.f32 %v5019_v17, %v5018_v35  ;;  %v5025_v46 = vmul.f32 %v9012_v1, %v5003_v0 }
0x158b   :  { %v5017_v49 = vadd.f32 %v5016_v57, %v5015_v15 }
0x158c   :  { %v5021_v30 = vrot.slane %v5020_v37, 2  ;;  %v5034_v32 = vsel %vm1730_vm5, %v5033_v62, %v5025_v46 }
0x158d   :  { %v5027_v51 = vmul.f32 %v9012_v1, %v5017_v49  ;;  %v9035_v49 = vld [vmem:[%s9391_s3 + $0x3] ss:$0 sm:$0xff] }
0x158e   :  { %v5022_v45 = vadd.f32 %v5021_v30, %v5020_v37  ;;  %v9028_v37 = vld [vmem:[%s9391_s3 + $0x2] ss:$0 sm:$0xff]  ;;  %9558 = vst [vmem:[#allocation27_spill] sm:$0xff] %v9035_v49 }
0x158f   :  { %v5035_v56 = vrot.slane %v5027_v51, 6 }
0x1590   :  { %v5023_v48 = vrot.slane %v5022_v45, 1 }
0x1591   :  { %v5036_v44 = vsel %vm1733_vm6, %v5035_v56, %v5034_v32 }
0x1592   :  { %v5024_v42 = vadd.f32 %v5023_v48, %v5022_v45 }
0x1594   :  { %v5028_v3 = vmul.f32 %v9012_v1, %v5024_v42 }
0x1596   :  { %v5037_v19 = vrot.slane %v5028_v3, 5 }
0x1598   :  { %v5038_v15 = vsel %vm1736_vm7, %v5037_v19, %v5036_v44 }
0x1599   :  { %v5040_v35 = vsel %vm1739_vm8, %v5038_v15, 0.0 }
0x159a   :  { %5041 = vadd.xlane.f32.xlu0 %v5040_v35 }
0x1623   :  { %v5042_v17 = vpop.xlane.xlu0 %5041 }
0x1624   :  { %v5045_v57 = vadd.f32 %v6795_v5, %v5042_v17 }
0x1626   :  { %5048 = vperm.xlu1 %6832, %v5045_v57  }
0x16a1   :  { %v5049_v20 = vpop.permute.xlu1 %5048 }
0x16a2   :  { %v5051_v0 = vmul.f32 %v9028_v37, %v5049_v20 }
0x16a4   :  { %v5052_v30 = vadd.f32 %v5051_v0, %v8856_v6 }
0x16a6   :  { %v5053_v45 = vadd.f32 %v9035_v49, %v5052_v30 }
0x16a8   :  { %7230 = vtanh.f32 %v5053_v45  ;;  %v6796_v48 = vmul.f32 -1.442695, %v5053_v45 }
0x16aa   :  { %7232 = vpow2.f32 %v6796_v48 }
0x16b5   :  { %v7231_v59 = vpop.eup %7230 }
0x16b6   :  { %5063 = vrot.lane.b32.xlu0 %v7231_v59, %s7458_s11 }
0x16b7   :  { %v7233_v46 = vpop.eup %7232 }
0x16b8   :  { %v5057_v51 = vadd.f32 1.0, %v7233_v46 }
0x16ba   :  { %7234 = vrcp.f32 %v5057_v51 }
0x16c7   :  { %v7235_v42 = vpop.eup %7234 }
0x16c8   :  { %v5061_v6 = vmul.f32 %v7235_v42, %v8836_v50 }
0x1728   :  { %v5064_v62 = vpop.permute.xlu0 %5063 }
0x1729   :  { %v5066_v3 = vmul.f32 %v7235_v42, %v5064_v62 }
0x172b   :  { %5068 = vrot.lane.b32.xlu1 %v5066_v3, %s7458_s11 }
0x179d   :  { %v5069_v32 = vpop.permute.xlu1 %5068 }
0x179e   :  { %v5071_v56 = vadd.f32 %v5069_v32, %v5061_v6 }
0x17a0   :  { %7236 = vtanh.f32 %v5071_v56 }
0x17ad   :  { %v7237_v19 = vpop.eup %7236 }
0x17ae   :  { %5074 = vrot.lane.b32.xlu1 %v7237_v19, %s7458_s11 }
0x1820   :  { %v5075_v44 = vpop.permute.xlu1 %5074 }
0x1821   :  { %v5077_v15 = vmul.f32 %v7235_v42, %v5075_v44 }
0x1823   :  { %5079 = vrot.lane.b32.xlu1 %v5077_v15, %s7459_s12 }
0x1895   :  { %v5080_v35 = vpop.permute.xlu1 %5079 }
0x1896   :  { %5082 = vst.msk [vmem:[#allocation2] sm:$0xf] %vm1739_vm8, %v5080_v35 }
0x1897   :  { %5083 = vst.msk [vmem:[#allocation2] sm:$0xf] %vm1790_vm9, %v5071_v56 }
0x189e   :  { %v9045_v5 = vld [vmem:[#allocation2] sm:$0xf] }
0x189f   :  { %9559 = vst [vmem:[#allocation28_spill] sm:$0xff] %v9045_v5  ;;  %6797 = vmatmul.mubr.msk.f32.vlgmr.msra.gmra.mxu0 %vm891_vm1, %v9045_v5 }
0x195f   :  { %v9049_v50 = vpop.f32.mrf.mxu0 }
0x1960   :  { %9560 = vst [vmem:[#allocation29_spill] sm:$0xff] %v9049_v50 }
0x1961   :  { %v5156_v17 = vpop.f32.mrf.mxu0 }
0x1962   :  { %v5166_v57 = vrot.slane %v5156_v17, %v7534_v13 }
0x1964   :  { %v5174_v20 = vrot.slane %v5166_v57, %v7534_v13  ;;  %v5167_v0 = vcombine.high %v5166_v57, %v5166_v57 }
0x1966   :  { %v5187_v30 = vrot.slane %v5174_v20, %v7720_v33  ;;  %v5181_v45 = vrot.slane %v5167_v0, %v7534_v13  ;;  %v5182_v42 = vcombine.high %v5174_v20, %v5174_v20 }
0x1968   :  { %v5207_v59 = vrot.slane %v5187_v30, %v7534_v13  ;;  %v5200_v48 = vcombine.high %v5187_v30, %v5187_v30  ;;  %v5191_v46 = vrot.slane %v5181_v45, %v7720_v33  ;;  %v5195_v19 = vrot.slane %v5182_v42, %v7720_v33 }
0x1969   :  { %v5183_v57 = vcombine.high %v5181_v45, %v5181_v45 }
0x196a   :  { %v5215_v51 = vcombine.high %v5207_v59, %v5207_v59  ;;  %v5214_v62 = vrot.slane %v5200_v48, %v7534_v13  ;;  %v5223_v3 = vrot.slane %v5207_v59, %v7534_v13  ;;  %v5255_v6 = vrot.slane %v5191_v46, %v7534_v13 }
0x196b   :  { %v5248_v56 = vcombine.high %v5191_v46, %v5191_v46  ;;  %v5199_v45 = vrot.slane %v5183_v57, %v7720_v33 }
0x196c   :  { %v5237_v32 = vrot.slane %v5215_v51, %v7534_v13  ;;  %v5216_v44 = vcombine.high %v5214_v62, %v5214_v62  ;;  %v5230_v15 = vrot.slane %v5214_v62, %v7534_v13  ;;  %v5245_v35 = vcombine.high %v5223_v3, %v5223_v3 }
0x196d   :  { %v5263_v17 = vcombine.high %v5255_v6, %v5255_v6  ;;  %v5262_v20 = vrot.slane %v5248_v56, %v7534_v13  ;;  %v5420_v30 = vadd.f32 %v5223_v3, %v9551_v41  ;;  %v5271_v48 = vrot.slane %v5255_v6, %v7534_v13 }
0x196e   :  { %v5247_v0 = vcombine.high %v5237_v32, %v5237_v32  ;;  %v5244_v59 = vrot.slane %v5216_v44, %v7534_v13  ;;  %v5303_v51 = vrot.slane %v5195_v19, %v7534_v13  ;;  %v5421_v46 = vadd.f32 %v5237_v32, %v9552_v4 }
0x196f   :  { %v5246_v42 = vcombine.high %v5230_v15, %v5230_v15  ;;  %v5285_v5 = vrot.slane %v5263_v17, %v7534_v13  ;;  %v5296_v62 = vcombine.high %v5195_v19, %v5195_v19  ;;  %v5422_v49 = vadd.f32 %v5245_v35, %v7837_v14 }
0x1970   :  { %v5264_v50 = vcombine.high %v5262_v20, %v5262_v20  ;;  %v5423_v56 = vadd.f32 %v5247_v0, %v7845_v29  ;;  %v5278_v3 = vrot.slane %v5262_v20, %v7534_v13  ;;  %v5424_v44 = vadd.f32 %v5230_v15, %v7833_v12 }
0x1971   :  { %7238 = vtanh.f32 %v5420_v30  ;;  %v5293_v6 = vcombine.high %v5271_v48, %v5271_v48  ;;  %v5311_v41 = vcombine.high %v5303_v51, %v5303_v51  ;;  %v5425_v32 = vadd.f32 %v5244_v59, %v7841_v25 }
0x1972   :  { %7240 = vtanh.f32 %v5421_v46  ;;  %v5295_v4 = vcombine.high %v5285_v5, %v5285_v5  ;;  %v5310_v19 = vrot.slane %v5296_v62, %v7534_v13  ;;  %v5426_v35 = vadd.f32 %v5246_v42, %v7863_v28 }
0x1973   :  { %7242 = vtanh.f32 %v5422_v49  ;;  %v5292_v17 = vrot.slane %v5264_v50, %v7534_v13  ;;  %v5344_v57 = vcombine.high %v5199_v45, %v5199_v45  ;;  %v5427_v0 = vadd.f32 %v5271_v48, %v7869_v10 }
0x1974   :  { %7244 = vtanh.f32 %v5423_v56  ;;  %v5319_v15 = vrot.slane %v5303_v51, %v7534_v13  ;;  %v5351_v20 = vrot.slane %v5199_v45, %v7534_v13  ;;  %v5428_v30 = vadd.f32 %v5285_v5, %v7855_v36 }
0x1975   :  { %7246 = vtanh.f32 %v5424_v44  ;;  %v5294_v59 = vcombine.high %v5278_v3, %v5278_v3  ;;  %v5333_v46 = vrot.slane %v5311_v41, %v7534_v13  ;;  %v5429_v62 = vadd.f32 %v5293_v6, %v7859_v39 }
0x1976   :  { %7248 = vtanh.f32 %v5425_v32  ;;  %v5312_v49 = vcombine.high %v5310_v19, %v5310_v19  ;;  %v5430_v50 = vadd.f32 %v5295_v4, %v7882_v61  ;;  %v5326_v48 = vrot.slane %v5310_v19, %v7534_v13 }
0x1977   :  { %7250 = vtanh.f32 %v5426_v35  ;;  %v5358_v42 = vrot.slane %v5344_v57, %v7534_v13  ;;  %v5431_v51 = vadd.f32 %v5278_v3, %v7886_v53  ;;  %v5341_v45 = vcombine.high %v5319_v15, %v5319_v15 }
0x1978   :  { %7252 = vtanh.f32 %v5427_v0  ;;  %v5359_v5 = vcombine.high %v5351_v20, %v5351_v20  ;;  %v5432_v56 = vadd.f32 %v5292_v17, %v7910_v18  ;;  %v5343_v41 = vcombine.high %v5333_v46, %v5333_v46 }
0x1979   :  { %7254 = vtanh.f32 %v5428_v30  ;;  %v5433_v44 = vadd.f32 %v5294_v59, %v7903_v7  ;;  %v5340_v6 = vrot.slane %v5312_v49, %v7534_v13  ;;  %v5367_v4 = vrot.slane %v5351_v20, %v7534_v13 }
0x197a   :  { %7256 = vtanh.f32 %v5429_v62  ;;  %v5434_v32 = vadd.f32 %v5319_v15, %v9553_v63  ;;  %v5360_v19 = vcombine.high %v5358_v42, %v5358_v42  ;;  %v5374_v3 = vrot.slane %v5358_v42, %v7534_v13  ;;  %v9561_v15 = vld [vmem:[#allocation10_spill] sm:$0xff] }
0x197b   :  { %7258 = vtanh.f32 %v5430_v50  ;;  %v5435_v35 = vadd.f32 %v5333_v46, %v9554_v43  ;;  %v5342_v57 = vcombine.high %v5326_v48, %v5326_v48  ;;  %v5381_v17 = vrot.slane %v5359_v5, %v7534_v13 }
0x197c   :  { %7260 = vtanh.f32 %v5431_v51  ;;  %v5436_v0 = vadd.f32 %v5341_v45, %v9555_v2  ;;  %v5437_v59 = vadd.f32 %v5343_v41, %v7957_v55  ;;  %v5389_v62 = vcombine.high %v5367_v4, %v5367_v4 }
0x197d   :  { %7262 = vtanh.f32 %v5432_v56  ;;  %v5438_v49 = vadd.f32 %v5326_v48, %v9561_v15  ;;  %v5388_v42 = vrot.slane %v5360_v19, %v7534_v13  ;;  %v5390_v46 = vcombine.high %v5374_v3, %v5374_v3  ;;  %v9562_v56 = vld [vmem:[#allocation6_spill] sm:$0xff] }
0x197e   :  { %v7239_v30 = vpop.eup %7238  ;;  %7264 = vtanh.f32 %v5433_v44  ;;  %v5439_v51 = vadd.f32 %v5340_v6, %v7980_v24  ;;  %v5391_v43 = vcombine.high %v5381_v17, %v5381_v17  ;;  %v5440_v45 = vadd.f32 %v5342_v57, %v7891_v31 }
0x197f   :  { %v7241_v20 = vpop.eup %7240  ;;  %7266 = vtanh.f32 %v5434_v32  ;;  %v5441_v2 = vadd.f32 %v5367_v4, %v9562_v56  ;;  %v5442_v15 = vadd.f32 %v5381_v17, %v7918_v27  ;;  %v5443_v6 = vadd.f32 %v5389_v62, %v7927_v58 }
0x1980   :  { %v7243_v50 = vpop.eup %7242  ;;  %7268 = vtanh.f32 %v5435_v35  ;;  %v5477_v44 = vmul.f32 %v7241_v20, %v7761_v38  ;;  %v5476_v35 = vmul.f32 %v7239_v30, %v7752_v8  ;;  %v5445_v56 = vadd.f32 %v5374_v3, %v7923_v40 }
0x1981   :  { %v7245_v5 = vpop.eup %7244  ;;  %7270 = vtanh.f32 %v5436_v0  ;;  %v5478_v48 = vmul.f32 %v7243_v50, %v7771_v23  ;;  %v5444_v50 = vadd.f32 %v5391_v43, %v7913_v34  ;;  %v5446_v30 = vadd.f32 %v5388_v42, %v7949_v52 }
0x1982   :  { %v7247_v41 = vpop.eup %7246  ;;  %7272 = vtanh.f32 %v5437_v59  ;;  %v5479_v32 = vmul.f32 %v7245_v5, %v7794_v47  ;;  %v5532_v17 = vcombine.low %v5476_v35, %v5477_v44 }
0x1983   :  { %v7249_v19 = vpop.eup %7248  ;;  %7274 = vtanh.f32 %v5438_v49  ;;  %v5480_v4 = vmul.f32 %v7247_v41, %v7755_v11 }
0x1984   :  { %v7251_v57 = vpop.eup %7250  ;;  %7276 = vtanh.f32 %v5439_v51  ;;  %v5481_v0 = vmul.f32 %v7249_v19, %v7767_v22  ;;  %v5533_v59 = vcombine.low %v5478_v48, %v5479_v32  ;;  %v5447_v48 = vadd.f32 %v5390_v46, %v7954_v54 }
0x1985   :  { %v7253_v20 = vpop.eup %7252  ;;  %7278 = vtanh.f32 %v5440_v45  ;;  %v5482_v43 = vmul.f32 %v7251_v57, %v7775_v26  ;;  %v5541_v32 = vrot.slane %v5532_v17, %v7534_v13 }
0x1986   :  { %v7255_v5 = vpop.eup %7254  ;;  %7280 = vtanh.f32 %v5441_v2  ;;  %v5534_v62 = vcombine.low %v5480_v4, %v5481_v0  ;;  %v5483_v51 = vmul.f32 %v7253_v20, %v7752_v8  ;;  %v5548_v45 = vrot.slane %v5533_v59, %v7534_v13 }
0x1987   :  { %v7257_v49 = vpop.eup %7256  ;;  %7282 = vtanh.f32 %v5442_v15  ;;  %v5484_v41 = vmul.f32 %v7255_v5, %v7761_v38  ;;  %v5562_v20 = vrot.slane %v5482_v43, %v7534_v13 }
0x1988   :  { %v7259_v19 = vpop.eup %7258  ;;  %7284 = vtanh.f32 %v5443_v6  ;;  %v5485_v2 = vmul.f32 %v7257_v49, %v7771_v23  ;;  %v5555_v35 = vrot.slane %v5534_v62, %v7534_v13  ;;  %v5563_v62 = vcombine.low %v5541_v32, %v5548_v45 }
0x1989   :  { %v7261_v3 = vpop.eup %7260  ;;  %7286 = vtanh.f32 %v5444_v50  ;;  %v5486_v44 = vmul.f32 %v7259_v19, %v7794_v47  ;;  %v5580_v42 = vcombine.low %v5483_v51, %v5484_v41 }
0x198a   :  { %v7263_v15 = vpop.eup %7262  ;;  %7288 = vtanh.f32 %v5445_v56  ;;  %v5487_v46 = vmul.f32 %v7261_v3, %v7755_v11  ;;  %v5564_v41 = vcombine.low %v5555_v35, %v5562_v20 }
0x198b   :  { %v7265_v4 = vpop.eup %7264  ;;  %7290 = vtanh.f32 %v5446_v30  ;;  %v5488_v6 = vmul.f32 %v7263_v15, %v7767_v22  ;;  %v5581_v57 = vcombine.low %v5485_v2, %v5486_v44  ;;  %v5589_v56 = vrot.slane %v5580_v42, %v7534_v13 }
0x198c   :  { %v7267_v0 = vpop.eup %7266  ;;  %7292 = vtanh.f32 %v5447_v48  ;;  %v5489_v59 = vmul.f32 %v7265_v4, %v7775_v26 }
0x198d   :  { %v7269_v50 = vpop.eup %7268  ;;  %v5582_v5 = vcombine.low %v5487_v46, %v5488_v6  ;;  %v5596_v17 = vrot.slane %v5581_v57, %v7534_v13  ;;  %v5490_v30 = vmul.f32 %v7267_v0, %v7752_v8  ;;  %v5571_v46 = vrot.slane %v5563_v62, %v7534_v13 }
0x198e   :  { %v7271_v49 = vpop.eup %7270  ;;  %v5491_v51 = vmul.f32 %v7269_v50, %v7761_v38  ;;  %v5610_v3 = vrot.slane %v5489_v59, %v7534_v13  ;;  %v5578_v59 = vrot.slane %v5564_v41, %v7534_v13 }
0x198f   :  { %v7273_v19 = vpop.eup %7272  ;;  %v5603_v48 = vrot.slane %v5582_v5, %v7534_v13  ;;  %v5611_v2 = vcombine.low %v5589_v56, %v5596_v17  ;;  %v5492_v44 = vmul.f32 %v7271_v49, %v7771_v23 }
0x1990   :  { %v7275_v43 = vpop.eup %7274  ;;  %v5493_v42 = vmul.f32 %v7273_v19, %v7794_v47  ;;  %v5628_v15 = vcombine.low %v5490_v30, %v5491_v51 }
0x1991   :  { %v7277_v4 = vpop.eup %7276  ;;  %v5612_v45 = vcombine.low %v5603_v48, %v5610_v3  ;;  %v5619_v32 = vrot.slane %v5611_v2, %v7534_v13  ;;  %v5494_v35 = vmul.f32 %v7275_v43, %v7755_v11 }
0x1992   :  { %v7279_v6 = vpop.eup %7278  ;;  %v5495_v57 = vmul.f32 %v7277_v4, %v7767_v22  ;;  %v5629_v0 = vcombine.low %v5492_v44, %v5493_v42  ;;  %v5637_v49 = vrot.slane %v5628_v15, %v7534_v13  ;;  %v5579_v44 = vcombine.low %v5571_v46, %v5578_v59 }
0x1993   :  { %v7281_v20 = vpop.eup %7280  ;;  %v5496_v50 = vmul.f32 %v7279_v6, %v7775_v26  ;;  %v5626_v5 = vrot.slane %v5612_v45, %v7534_v13 }
0x1994   :  { %v7283_v56 = vpop.eup %7282  ;;  %v5630_v17 = vcombine.low %v5494_v35, %v5495_v57  ;;  %v5644_v30 = vrot.slane %v5629_v0, %v7534_v13  ;;  %v5497_v19 = vmul.f32 %v7281_v20, %v7752_v8 }
0x1995   :  { %v7285_v62 = vpop.eup %7284  ;;  %v5627_v51 = vcombine.low %v5619_v32, %v5626_v5  ;;  %v5498_v48 = vmul.f32 %v7283_v56, %v7761_v38  ;;  %v5658_v2 = vrot.slane %v5496_v50, %v7534_v13  ;;  %v5728_v56 = vsel %vm1595_vm3, %v5579_v44, 0.0 }
0x1996   :  { %v7287_v3 = vpop.eup %7286  ;;  %v5651_v41 = vrot.slane %v5630_v17, %v7534_v13  ;;  %v5659_v43 = vcombine.low %v5637_v49, %v5644_v30  ;;  %v5499_v15 = vmul.f32 %v7285_v62, %v7771_v23 }
0x1997   :  { %v7289_v42 = vpop.eup %7288  ;;  %v5731_v4 = vsel %vm1595_vm3, %v5627_v51, 0.0  ;;  %v5500_v45 = vmul.f32 %v7287_v3, %v7794_v47  ;;  %v5676_v6 = vcombine.low %v5497_v19, %v5498_v48 }
0x1998   :  { %v7291_v32 = vpop.eup %7290  ;;  %v5660_v35 = vcombine.low %v5651_v41, %v5658_v2  ;;  %v5667_v57 = vrot.slane %v5659_v43, %v7534_v13  ;;  %5732 = vadd.xlane.f32.xlu0 %v5731_v4  ;;  %v5501_v20 = vmul.f32 %v7289_v42, %v7755_v11 }
0x1999   :  { %v7293_v0 = vpop.eup %7292  ;;  %v5502_v50 = vmul.f32 %v7291_v32, %v7767_v22  ;;  %v5677_v5 = vcombine.low %v5499_v15, %v5500_v45  ;;  %v5685_v49 = vrot.slane %v5676_v6, %v7534_v13 }
0x199a   :  { %v5674_v46 = vrot.slane %v5660_v35, %v7534_v13  ;;  %v5503_v59 = vmul.f32 %v7293_v0, %v7775_v26 }
0x199b   :  { %v5678_v17 = vcombine.low %v5501_v20, %v5502_v50  ;;  %v5692_v30 = vrot.slane %v5677_v5, %v7534_v13 }
0x199c   :  { %v5675_v62 = vcombine.low %v5667_v57, %v5674_v46  ;;  %5729 = vadd.xlane.f32.xlu0 %v5728_v56  ;;  %v5706_v19 = vrot.slane %v5503_v59, %v7534_v13 }
0x199d   :  { %v5699_v51 = vrot.slane %v5678_v17, %v7534_v13  ;;  %v5707_v48 = vcombine.low %v5685_v49, %v5692_v30 }
0x199e   :  { %v5734_v3 = vsel %vm1595_vm3, %v5675_v62, 0.0 }
0x199f   :  { %5735 = vadd.xlane.f32.xlu1 %v5734_v3  ;;  %v5708_v41 = vcombine.low %v5699_v51, %v5706_v19  ;;  %v5715_v2 = vrot.slane %v5707_v48, %v7534_v13 }
0x19a1   :  { %v5722_v43 = vrot.slane %v5708_v41, %v7534_v13 }
0x19a3   :  { %v5723_v44 = vcombine.low %v5715_v2, %v5722_v43 }
0x19a5   :  { %v5737_v42 = vsel %vm1595_vm3, %v5723_v44, 0.0 }
0x19a6   :  { %5738 = vadd.xlane.f32.xlu0 %v5737_v42 }
0x1a21   :  { %v5733_v4 = vpop.xlane.xlu0 %5732 }
0x1a22   :  { %v5747_v15 = vsel %vm1608_vm4, %v5733_v4, -inf }
0x1a23   :  { %v5748_v45 = vrot.slane %v5747_v15, 4 }
0x1a25   :  { %v5749_v6 = vmax.f32 %v5747_v15, %v5748_v45  ;;  %v5730_v32 = vpop.xlane.xlu0 %5729 }
0x1a26   :  { %v5740_v35 = vsel %vm1608_vm4, %v5730_v32, -inf }
0x1a27   :  { %v5750_v57 = vrot.slane %v5749_v6, 2  ;;  %v5741_v0 = vrot.slane %v5740_v35, 4 }
0x1a28   :  { %v5736_v20 = vpop.xlane.xlu1 %5735 }
0x1a29   :  { %v5754_v50 = vsel %vm1608_vm4, %v5736_v20, -inf  ;;  %v5751_v5 = vmax.f32 %v5749_v6, %v5750_v57  ;;  %v5742_v46 = vmax.f32 %v5740_v35, %v5741_v0 }
0x1a2a   :  { %v5755_v59 = vrot.slane %v5754_v50, 4 }
0x1a2b   :  { %v5752_v56 = vrot.slane %v5751_v5, 1  ;;  %v5743_v17 = vrot.slane %v5742_v46, 2 }
0x1a2c   :  { %v5756_v49 = vmax.f32 %v5754_v50, %v5755_v59 }
0x1a2d   :  { %v5753_v30 = vmax.f32 %v5751_v5, %v5752_v56  ;;  %v5744_v62 = vmax.f32 %v5742_v46, %v5743_v17 }
0x1a2e   :  { %v5757_v51 = vrot.slane %v5756_v49, 2 }
0x1a2f   :  { %v5769_v19 = vsub.f32 %v5733_v4, %v5753_v30  ;;  %v5745_v48 = vrot.slane %v5744_v62, 1  ;;  %v5739_v3 = vpop.xlane.xlu0 %5738 }
0x1a30   :  { %v5758_v41 = vmax.f32 %v5756_v49, %v5757_v51  ;;  %v5761_v2 = vsel %vm1608_vm4, %v5739_v3, -inf }
0x1a31   :  { %v5774_v43 = vmul.f32 1.442695, %v5769_v19  ;;  %v5746_v44 = vmax.f32 %v5744_v62, %v5745_v48  ;;  %v5762_v42 = vrot.slane %v5761_v2, 4 }
0x1a32   :  { %v5759_v15 = vrot.slane %v5758_v41, 1 }
0x1a33   :  { %7294 = vpow2.f32 %v5774_v43  ;;  %v5768_v45 = vsub.f32 %v5730_v32, %v5746_v44  ;;  %v5763_v6 = vmax.f32 %v5761_v2, %v5762_v42 }
0x1a34   :  { %v5760_v35 = vmax.f32 %v5758_v41, %v5759_v15 }
0x1a35   :  { %v5772_v57 = vmul.f32 1.442695, %v5768_v45  ;;  %v5764_v0 = vrot.slane %v5763_v6, 2 }
0x1a36   :  { %v5770_v50 = vsub.f32 %v5736_v20, %v5760_v35 }
0x1a37   :  { %7296 = vpow2.f32 %v5772_v57  ;;  %v5765_v5 = vmax.f32 %v5763_v6, %v5764_v0 }
0x1a38   :  { %v5776_v46 = vmul.f32 1.442695, %v5770_v50 }
0x1a39   :  { %v5766_v4 = vrot.slane %v5765_v5, 1 }
0x1a3a   :  { %7298 = vpow2.f32 %v5776_v46 }
0x1a3b   :  { %v5767_v59 = vmax.f32 %v5765_v5, %v5766_v4 }
0x1a3d   :  { %v5771_v56 = vsub.f32 %v5739_v3, %v5767_v59 }
0x1a3f   :  { %v5778_v17 = vmul.f32 1.442695, %v5771_v56 }
0x1a40   :  { %v7295_v49 = vpop.eup %7294 }
0x1a41   :  { %v5787_v30 = vsel %vm1608_vm4, %v7295_v49, 0.0  ;;  %7300 = vpow2.f32 %v5778_v17 }
0x1a42   :  { %v5788_v62 = vrot.slane %v5787_v30, 4 }
0x1a44   :  { %v7297_v51 = vpop.eup %7296  ;;  %v5789_v32 = vadd.f32 %v5788_v62, %v5787_v30 }
0x1a45   :  { %v5780_v19 = vsel %vm1608_vm4, %v7297_v51, 0.0 }
0x1a46   :  { %v5790_v48 = vrot.slane %v5789_v32, 2  ;;  %v5781_v41 = vrot.slane %v5780_v19, 4 }
0x1a47   :  { %v7299_v20 = vpop.eup %7298 }
0x1a48   :  { %v5794_v2 = vsel %vm1608_vm4, %v7299_v20, 0.0  ;;  %v5791_v43 = vadd.f32 %v5790_v48, %v5789_v32  ;;  %v5782_v44 = vadd.f32 %v5781_v41, %v5780_v19 }
0x1a49   :  { %v5795_v42 = vrot.slane %v5794_v2, 4 }
0x1a4a   :  { %v5792_v15 = vrot.slane %v5791_v43, 1  ;;  %v5783_v3 = vrot.slane %v5782_v44, 2 }
0x1a4b   :  { %v5796_v45 = vadd.f32 %v5795_v42, %v5794_v2 }
0x1a4c   :  { %v5793_v6 = vadd.f32 %v5792_v15, %v5791_v43  ;;  %v5784_v35 = vadd.f32 %v5783_v3, %v5782_v44 }
0x1a4d   :  { %v5797_v57 = vrot.slane %v5796_v45, 2 }
0x1a4e   :  { %v7301_v0 = vpop.eup %7300  ;;  %7302 = vrcp.f32 %v5793_v6  ;;  %v5785_v50 = vrot.slane %v5784_v35, 1 }
0x1a4f   :  { %v5798_v5 = vadd.f32 %v5797_v57, %v5796_v45  ;;  %v5801_v46 = vsel %vm1608_vm4, %v7301_v0, 0.0 }
0x1a50   :  { %v5786_v4 = vadd.f32 %v5785_v50, %v5784_v35  ;;  %v5802_v59 = vrot.slane %v5801_v46, 4 }
0x1a51   :  { %v5799_v56 = vrot.slane %v5798_v5, 1 }
0x1a52   :  { %7304 = vrcp.f32 %v5786_v4  ;;  %v5803_v17 = vadd.f32 %v5802_v59, %v5801_v46 }
0x1a53   :  { %v5800_v30 = vadd.f32 %v5799_v56, %v5798_v5 }
0x1a54   :  { %v5804_v62 = vrot.slane %v5803_v17, 2 }
0x1a55   :  { %7306 = vrcp.f32 %v5800_v30 }
0x1a56   :  { %v5805_v32 = vadd.f32 %v5804_v62, %v5803_v17 }
0x1a58   :  { %v5806_v19 = vrot.slane %v5805_v32, 1 }
0x1a5a   :  { %v5807_v48 = vadd.f32 %v5806_v19, %v5805_v32 }
0x1a5b   :  { %v7303_v41 = vpop.eup %7302 }
0x1a5c   :  { %v5811_v2 = vmul.f32 %v7303_v41, %v7295_v49  ;;  %7308 = vrcp.f32 %v5807_v48 }
0x1a5e   :  { %v5817_v43 = vmul.f32 %v8984_v9, %v5811_v2 }
0x1a5f   :  { %v7305_v44 = vpop.eup %7304 }
0x1a60   :  { %v5809_v42 = vmul.f32 %v7305_v44, %v7297_v51  ;;  %v5827_v15 = vsel %vm1595_vm3, %v5817_v43, 0.0 }
0x1a61   :  { %v5828_v3 = vrot.slane %v5827_v15, 4 }
0x1a62   :  { %v7307_v45 = vpop.eup %7306  ;;  %v5816_v6 = vmul.f32 %v8991_v21, %v5809_v42 }
0x1a63   :  { %v5813_v35 = vmul.f32 %v7307_v45, %v7299_v20  ;;  %v5829_v57 = vadd.f32 %v5828_v3, %v5827_v15 }
0x1a64   :  { %v5820_v50 = vsel %vm1595_vm3, %v5816_v6, 0.0 }
0x1a65   :  { %v5818_v5 = vmul.f32 %v8998_v16, %v5813_v35  ;;  %v5821_v46 = vrot.slane %v5820_v50, 4  ;;  %v5830_v4 = vrot.slane %v5829_v57, 2 }
0x1a67   :  { %v5822_v49 = vadd.f32 %v5821_v46, %v5820_v50  ;;  %v5834_v59 = vsel %vm1595_vm3, %v5818_v5, 0.0  ;;  %v5831_v17 = vadd.f32 %v5830_v4, %v5829_v57 }
0x1a68   :  { %v5835_v9 = vrot.slane %v5834_v59, 4 }
0x1a69   :  { %v7309_v56 = vpop.eup %7308  ;;  %v5823_v51 = vrot.slane %v5822_v49, 2  ;;  %v5832_v19 = vrot.slane %v5831_v17, 1 }
0x1a6a   :  { %v5815_v30 = vmul.f32 %v7309_v56, %v7301_v0  ;;  %v5836_v62 = vadd.f32 %v5835_v9, %v5834_v59 }
0x1a6b   :  { %v5824_v32 = vadd.f32 %v5823_v51, %v5822_v49  ;;  %v5833_v44 = vadd.f32 %v5832_v19, %v5831_v17  ;;  %v6798_v17 = vld [vmem:[%s9392_s1 + $0x14] sm:$0xf]  ;;  %v9564_v19 = vld [vmem:[#allocation27_spill] sm:$0xff] }
0x1a6c   :  { %v5819_v21 = vmul.f32 %v9005_v60, %v5815_v30  ;;  %v5837_v20 = vrot.slane %v5836_v62, 2 }
0x1a6d   :  { %v5825_v16 = vrot.slane %v5824_v32, 1  ;;  %v5849_v0 = vmul.f32 %v9012_v1, %v5833_v44 }
0x1a6e   :  { %v5838_v48 = vadd.f32 %v5837_v20, %v5836_v62  ;;  %v5841_v41 = vsel %vm1595_vm3, %v5819_v21, 0.0  ;;  %v9563_v21 = vld [vmem:[#allocation29_spill] sm:$0xff] }
0x1a6f   :  { %v5842_v2 = vrot.slane %v5841_v41, 4  ;;  %v5826_v15 = vadd.f32 %v5825_v16, %v5824_v32  ;;  %v5856_v5 = vrot.slane %v5849_v0, 7 }
0x1a70   :  { %v5839_v43 = vrot.slane %v5838_v48, 1 }
0x1a71   :  { %v5843_v42 = vadd.f32 %v5842_v2, %v5841_v41  ;;  %v5848_v57 = vmul.f32 %v9012_v1, %v5826_v15 }
0x1a72   :  { %v5840_v45 = vadd.f32 %v5839_v43, %v5838_v48 }
0x1a73   :  { %v5844_v3 = vrot.slane %v5843_v42, 2  ;;  %v5857_v4 = vsel %vm1730_vm5, %v5856_v5, %v5848_v57 }
0x1a74   :  { %v5850_v60 = vmul.f32 %v9012_v1, %v5840_v45 }
0x1a75   :  { %v5845_v6 = vadd.f32 %v5844_v3, %v5843_v42  ;;  %v9565_v3 = vld [vmem:[#allocation28_spill] sm:$0xff] }
0x1a76   :  { %v5858_v49 = vrot.slane %v5850_v60, 6 }
0x1a77   :  { %v5846_v35 = vrot.slane %v5845_v6, 1 }
0x1a78   :  { %v5859_v9 = vsel %vm1733_vm6, %v5858_v49, %v5857_v4 }
0x1a79   :  { %v5847_v50 = vadd.f32 %v5846_v35, %v5845_v6 }
0x1a7b   :  { %v5851_v46 = vmul.f32 %v9012_v1, %v5847_v50 }
0x1a7d   :  { %v5860_v59 = vrot.slane %v5851_v46, 5 }
0x1a7f   :  { %v5861_v56 = vsel %vm1736_vm7, %v5860_v59, %v5859_v9 }
0x1a80   :  { %v5863_v51 = vsel %vm1739_vm8, %v5861_v56, 0.0 }
0x1a81   :  { %5864 = vadd.xlane.f32.xlu0 %v5863_v51 }
0x1b0a   :  { %v5865_v30 = vpop.xlane.xlu0 %5864 }
0x1b0b   :  { %v5868_v62 = vadd.f32 %v6798_v17, %v5865_v30 }
0x1b0d   :  { %5871 = vperm.xlu1 %6832, %v5868_v62  }
0x1b88   :  { %v5872_v32 = vpop.permute.xlu1 %5871 }
0x1b89   :  { %v5874_v1 = vmul.f32 %v9028_v37, %v5872_v32 }
0x1b8b   :  { %v5875_v20 = vadd.f32 %v5874_v1, %v9563_v21 }
0x1b8d   :  { %v5876_v48 = vadd.f32 %v9564_v19, %v5875_v20 }
0x1b8f   :  { %7310 = vtanh.f32 %v5876_v48  ;;  %v6799_v16 = vmul.f32 -1.442695, %v5876_v48 }
0x1b91   :  { %7312 = vpow2.f32 %v6799_v16 }
0x1b9c   :  { %v7311_v41 = vpop.eup %7310 }
0x1b9d   :  { %5886 = vrot.lane.b32.xlu0 %v7311_v41, %s7458_s11 }
0x1b9e   :  { %v7313_v2 = vpop.eup %7312 }
0x1b9f   :  { %v5880_v43 = vadd.f32 1.0, %v7313_v2 }
0x1ba1   :  { %7314 = vrcp.f32 %v5880_v43 }
0x1bae   :  { %v7315_v44 = vpop.eup %7314 }
0x1baf   :  { %v5884_v37 = vmul.f32 %v7315_v44, %v9565_v3 }
0x1c0f   :  { %v5887_v42 = vpop.permute.xlu0 %5886 }
0x1c10   :  { %v5889_v15 = vmul.f32 %v7315_v44, %v5887_v42 }
0x1c12   :  { %5891 = vrot.lane.b32.xlu1 %v5889_v15, %s7458_s11 }
0x1c84   :  { %v5892_v45 = vpop.permute.xlu1 %5891 }
0x1c85   :  { %v5894_v6 = vadd.f32 %v5892_v45, %v5884_v37  ;;  %v9566_v37 = vld [vmem:[#allocation4_spill] sm:$0xff] }
0x1c87   :  { %7316 = vtanh.f32 %v5894_v6 }
0x1c94   :  { %v7317_v0 = vpop.eup %7316 }
0x1c95   :  { %5897 = vrot.lane.b32.xlu1 %v7317_v0, %s7458_s11 }
0x1d07   :  { %v5898_v35 = vpop.permute.xlu1 %5897 }
0x1d08   :  { %v5900_v57 = vmul.f32 %v7315_v44, %v5898_v35 }
0x1d0a   :  { %5902 = vrot.lane.b32.xlu1 %v5900_v57, %s7459_s12  ;;  %v9567_v57 = vld [vmem:[#allocation5_spill] sm:$0xff] }
0x1d7c   :  { %v5903_v60 = vpop.permute.xlu1 %5902 }
0x1d7d   :  { %5905 = vst.msk [vmem:[#allocation2] sm:$0xf] %vm1739_vm8, %v5903_v60 }
0x1d7e   :  { %5906 = vst.msk [vmem:[#allocation2] sm:$0xf] %vm1790_vm9, %v5894_v6 }
0x1d85   :  { %v9203_v50 = vld [vmem:[#allocation2] sm:$0xf] }
0x1d86   :  { %6800 = vmatmul.mubr.msk.f32.vlgmr.msra.gmra.mxu1 %vm891_vm1, %v9203_v50 }
0x1e46   :  { %v9207_v5 = vpop.f32.mrf.mxu1 }
0x1e48   :  { %v5979_v46 = vpop.f32.mrf.mxu1 }
0x1e49   :  { %v5989_v4 = vrot.slane %v5979_v46, %v7534_v13 }
0x1e4b   :  { %v5997_v49 = vrot.slane %v5989_v4, %v7534_v13  ;;  %v5990_v59 = vcombine.high %v5989_v4, %v5989_v4 }
0x1e4d   :  { %v6010_v9 = vrot.slane %v5997_v49, %v7720_v33  ;;  %v6004_v56 = vrot.slane %v5990_v59, %v7534_v13  ;;  %v6005_v32 = vcombine.high %v5997_v49, %v5997_v49 }
0x1e4f   :  { %v6030_v51 = vrot.slane %v6010_v9, %v7534_v13  ;;  %v6023_v17 = vcombine.high %v6010_v9, %v6010_v9  ;;  %v6014_v30 = vrot.slane %v6004_v56, %v7720_v33  ;;  %v6018_v41 = vrot.slane %v6005_v32, %v7720_v33 }
0x1e50   :  { %v6006_v42 = vcombine.high %v6004_v56, %v6004_v56 }
0x1e51   :  { %v6038_v62 = vcombine.high %v6030_v51, %v6030_v51  ;;  %v6037_v1 = vrot.slane %v6023_v17, %v7534_v13  ;;  %v6046_v21 = vrot.slane %v6030_v51, %v7534_v13  ;;  %v6078_v20 = vrot.slane %v6014_v30, %v7534_v13 }
0x1e52   :  { %v6071_v48 = vcombine.high %v6014_v30, %v6014_v30  ;;  %v6126_v35 = vrot.slane %v6018_v41, %v7534_v13  ;;  %v6119_v49 = vcombine.high %v6018_v41, %v6018_v41  ;;  %v6022_v9 = vrot.slane %v6006_v42, %v7720_v33 }
0x1e53   :  { %v6060_v19 = vrot.slane %v6038_v62, %v7534_v13  ;;  %v6039_v16 = vcombine.high %v6037_v1, %v6037_v1  ;;  %v6053_v2 = vrot.slane %v6037_v1, %v7534_v13  ;;  %v6068_v43 = vcombine.high %v6046_v21, %v6046_v21 }
0x1e54   :  { %v6086_v44 = vcombine.high %v6078_v20, %v6078_v20  ;;  %v6085_v3 = vrot.slane %v6071_v48, %v7534_v13  ;;  %v6243_v45 = vadd.f32 %v6046_v21, %v9566_v37  ;;  %v6094_v0 = vrot.slane %v6078_v20, %v7534_v13 }
0x1e55   :  { %v6070_v15 = vcombine.high %v6060_v19, %v6060_v19  ;;  %v6067_v6 = vrot.slane %v6039_v16, %v7534_v13  ;;  %v6244_v60 = vadd.f32 %v6060_v19, %v9567_v57  ;;  %v6069_v46 = vcombine.high %v6053_v2, %v6053_v2 }
0x1e56   :  { %v6108_v4 = vrot.slane %v6086_v44, %v7534_v13  ;;  %v6245_v59 = vadd.f32 %v6068_v43, %v7837_v14  ;;  %v6087_v56 = vcombine.high %v6085_v3, %v6085_v3  ;;  %v6101_v17 = vrot.slane %v6085_v3, %v7534_v13 }
0x1e57   :  { %v6246_v51 = vadd.f32 %v6070_v15, %v7845_v29  ;;  %v6247_v30 = vadd.f32 %v6053_v2, %v7833_v12  ;;  %7318 = vtanh.f32 %v6243_v45  ;;  %v6116_v62 = vcombine.high %v6094_v0, %v6094_v0 }
0x1e58   :  { %v6134_v32 = vcombine.high %v6126_v35, %v6126_v35  ;;  %v6248_v1 = vadd.f32 %v6067_v6, %v7841_v25  ;;  %7320 = vtanh.f32 %v6244_v60  ;;  %v6118_v21 = vcombine.high %v6108_v4, %v6108_v4 }
0x1e59   :  { %v6133_v20 = vrot.slane %v6119_v49, %v7534_v13  ;;  %v6249_v14 = vadd.f32 %v6069_v46, %v7863_v28  ;;  %7322 = vtanh.f32 %v6245_v59  ;;  %v6115_v33 = vrot.slane %v6087_v56, %v7534_v13  ;;  %v9569_v46 = vld [vmem:[#allocation7_spill] sm:$0xff] }
0x1e5a   :  { %v6167_v19 = vcombine.high %v6022_v9, %v6022_v9  ;;  %v6250_v29 = vadd.f32 %v6094_v0, %v7869_v10  ;;  %7324 = vtanh.f32 %v6246_v51  ;;  %v6142_v12 = vrot.slane %v6126_v35, %v7534_v13  ;;  %v9568_v35 = vld [vmem:[#allocation9_spill] sm:$0xff] }
0x1e5b   :  { %v6174_v48 = vrot.slane %v6022_v9, %v7534_v13  ;;  %v6251_v41 = vadd.f32 %v6108_v4, %v7855_v36  ;;  %7326 = vtanh.f32 %v6247_v30  ;;  %v6117_v25 = vcombine.high %v6101_v17, %v6101_v17 }
0x1e5c   :  { %v6156_v16 = vrot.slane %v6134_v32, %v7534_v13  ;;  %v6252_v2 = vadd.f32 %v6116_v62, %v7859_v39  ;;  %7328 = vtanh.f32 %v6248_v1  ;;  %v6135_v28 = vcombine.high %v6133_v20, %v6133_v20 }
0x1e5d   :  { %v6253_v43 = vadd.f32 %v6118_v21, %v7882_v61  ;;  %7330 = vtanh.f32 %v6249_v14  ;;  %v6149_v10 = vrot.slane %v6133_v20, %v7534_v13  ;;  %v6181_v44 = vrot.slane %v6167_v19, %v7534_v13  ;;  %v9571_v20 = vld [vmem:[#allocation6_spill] sm:$0xff] }
0x1e5e   :  { %v6254_v42 = vadd.f32 %v6101_v17, %v7886_v53  ;;  %7332 = vtanh.f32 %v6250_v29  ;;  %v6164_v15 = vcombine.high %v6142_v12, %v6142_v12  ;;  %v6182_v36 = vcombine.high %v6174_v48, %v6174_v48 }
0x1e5f   :  { %v6255_v3 = vadd.f32 %v6115_v33, %v7910_v18  ;;  %7334 = vtanh.f32 %v6251_v41  ;;  %v6166_v37 = vcombine.high %v6156_v16, %v6156_v16  ;;  %v6256_v39 = vadd.f32 %v6117_v25, %v7903_v7 }
0x1e60   :  { %7336 = vtanh.f32 %v6252_v2  ;;  %v6163_v45 = vrot.slane %v6135_v28, %v7534_v13  ;;  %v6190_v61 = vrot.slane %v6174_v48, %v7534_v13  ;;  %v6257_v6 = vadd.f32 %v6142_v12, %v9553_v63  ;;  %v9570_v63 = vld [vmem:[#allocation10_spill] sm:$0xff] }
0x1e61   :  { %7338 = vtanh.f32 %v6253_v43  ;;  %v6183_v0 = vcombine.high %v6181_v44, %v6181_v44  ;;  %v6197_v53 = vrot.slane %v6181_v44, %v7534_v13  ;;  %v6258_v57 = vadd.f32 %v6156_v16, %v9568_v35 }
0x1e62   :  { %7340 = vtanh.f32 %v6254_v42  ;;  %v6165_v60 = vcombine.high %v6149_v10, %v6149_v10  ;;  %v6204_v18 = vrot.slane %v6182_v36, %v7534_v13  ;;  %v6259_v4 = vadd.f32 %v6164_v15, %v9569_v46 }
0x1e63   :  { %7342 = vtanh.f32 %v6255_v3  ;;  %v6260_v49 = vadd.f32 %v6166_v37, %v7957_v55  ;;  %v6212_v9 = vcombine.high %v6190_v61, %v6190_v61  ;;  %v6261_v56 = vadd.f32 %v6149_v10, %v9570_v63 }
0x1e64   :  { %v7319_v7 = vpop.eup %7318  ;;  %7344 = vtanh.f32 %v6256_v39  ;;  %v6211_v17 = vrot.slane %v6183_v0, %v7534_v13  ;;  %v6213_v30 = vcombine.high %v6197_v53, %v6197_v53  ;;  %v6262_v62 = vadd.f32 %v6163_v45, %v7980_v24 }
0x1e65   :  { %v7321_v59 = vpop.eup %7320  ;;  %7346 = vtanh.f32 %v6257_v6  ;;  %v6214_v1 = vcombine.high %v6204_v18, %v6204_v18  ;;  %v6263_v21 = vadd.f32 %v6165_v60, %v7891_v31  ;;  %v6264_v14 = vadd.f32 %v6190_v61, %v9571_v20 }
0x1e66   :  { %v7323_v51 = vpop.eup %7322  ;;  %7348 = vtanh.f32 %v6258_v57  ;;  %v6300_v33 = vmul.f32 %v7321_v59, %v7761_v38  ;;  %v6265_v48 = vadd.f32 %v6204_v18, %v7918_v27  ;;  %v6266_v24 = vadd.f32 %v6212_v9, %v7927_v58 }
0x1e67   :  { %v7325_v32 = vpop.eup %7324  ;;  %7350 = vtanh.f32 %v6259_v4  ;;  %v6301_v19 = vmul.f32 %v7323_v51, %v7771_v23  ;;  %v6299_v41 = vmul.f32 %v7319_v7, %v7752_v8  ;;  %v6267_v43 = vadd.f32 %v6214_v1, %v7913_v34 }
0x1e68   :  { %v7327_v55 = vpop.eup %7326  ;;  %7352 = vtanh.f32 %v6260_v49  ;;  %v6302_v29 = vmul.f32 %v7325_v32, %v7794_v47  ;;  %v6268_v44 = vadd.f32 %v6197_v53, %v7923_v40  ;;  %v6269_v15 = vadd.f32 %v6211_v17, %v7949_v52 }
0x1e69   :  { %v7329_v12 = vpop.eup %7328  ;;  %7354 = vtanh.f32 %v6261_v56  ;;  %v6303_v25 = vmul.f32 %v7327_v55, %v7755_v11  ;;  %v6355_v27 = vcombine.low %v6299_v41, %v6300_v33  ;;  %v6270_v39 = vadd.f32 %v6213_v30, %v7954_v54 }
0x1e6a   :  { %v7331_v31 = vpop.eup %7330  ;;  %7356 = vtanh.f32 %v6262_v62  ;;  %v6304_v16 = vmul.f32 %v7329_v12, %v7767_v22  ;;  %v6356_v2 = vcombine.low %v6301_v19, %v6302_v29 }
0x1e6b   :  { %v7333_v28 = vpop.eup %7332  ;;  %7358 = vtanh.f32 %v6263_v21  ;;  %v6305_v34 = vmul.f32 %v7331_v31, %v7775_v26  ;;  %v6364_v53 = vrot.slane %v6355_v27, %v7534_v13 }
0x1e6c   :  { %v7335_v10 = vpop.eup %7334  ;;  %7360 = vtanh.f32 %v6264_v14  ;;  %v6357_v58 = vcombine.low %v6303_v25, %v6304_v16  ;;  %v6306_v36 = vmul.f32 %v7333_v28, %v7752_v8  ;;  %v6371_v45 = vrot.slane %v6356_v2, %v7534_v13 }
0x1e6d   :  { %v7337_v42 = vpop.eup %7336  ;;  %7362 = vtanh.f32 %v6265_v48  ;;  %v6307_v3 = vmul.f32 %v7335_v10, %v7761_v38  ;;  %v6385_v7 = vrot.slane %v6305_v34, %v7534_v13 }
0x1e6e   :  { %v7339_v37 = vpop.eup %7338  ;;  %7364 = vtanh.f32 %v6266_v24  ;;  %v6308_v61 = vmul.f32 %v7337_v42, %v7771_v23  ;;  %v6378_v35 = vrot.slane %v6357_v58, %v7534_v13  ;;  %v6386_v56 = vcombine.low %v6364_v53, %v6371_v45 }
0x1e6f   :  { %v7341_v40 = vpop.eup %7340  ;;  %7366 = vtanh.f32 %v6267_v43  ;;  %v6309_v6 = vmul.f32 %v7339_v37, %v7794_v47  ;;  %v6403_v52 = vcombine.low %v6306_v36, %v6307_v3 }
0x1e70   :  { %v7343_v0 = vpop.eup %7342  ;;  %7368 = vtanh.f32 %v6268_v44  ;;  %v6310_v54 = vmul.f32 %v7341_v40, %v7755_v11  ;;  %v6387_v62 = vcombine.low %v6378_v35, %v6385_v7  ;;  %v6394_v24 = vrot.slane %v6386_v56, %v7534_v13 }
0x1e71   :  { %v7345_v57 = vpop.eup %7344  ;;  %7370 = vtanh.f32 %v6269_v15  ;;  %v6311_v60 = vmul.f32 %v7343_v0, %v7767_v22  ;;  %v6404_v18 = vcombine.low %v6308_v61, %v6309_v6  ;;  %v6412_v9 = vrot.slane %v6403_v52, %v7534_v13 }
0x1e72   :  { %v7347_v46 = vpop.eup %7346  ;;  %7372 = vtanh.f32 %v6270_v39  ;;  %v6312_v4 = vmul.f32 %v7345_v57, %v7775_v26  ;;  %v6401_v2 = vrot.slane %v6387_v62, %v7534_v13 }
0x1e73   :  { %v7349_v49 = vpop.eup %7348  ;;  %v6405_v59 = vcombine.low %v6310_v54, %v6311_v60  ;;  %v6419_v63 = vrot.slane %v6404_v18, %v7534_v13  ;;  %v6313_v17 = vmul.f32 %v7347_v46, %v7752_v8 }
0x1e74   :  { %v7351_v51 = vpop.eup %7350  ;;  %v6314_v30 = vmul.f32 %v7349_v49, %v7761_v38  ;;  %v6433_v21 = vrot.slane %v6312_v4, %v7534_v13  ;;  %v6402_v61 = vcombine.low %v6394_v24, %v6401_v2 }
0x1e75   :  { %v7353_v32 = vpop.eup %7352  ;;  %v6426_v1 = vrot.slane %v6405_v59, %v7534_v13  ;;  %v6434_v20 = vcombine.low %v6412_v9, %v6419_v63  ;;  %v6315_v55 = vmul.f32 %v7351_v51, %v7771_v23 }
0x1e76   :  { %v7355_v14 = vpop.eup %7354  ;;  %v6316_v33 = vmul.f32 %v7353_v32, %v7794_v47  ;;  %v6451_v19 = vcombine.low %v6313_v17, %v6314_v30 }
0x1e77   :  { %v7357_v29 = vpop.eup %7356  ;;  %v6435_v12 = vcombine.low %v6426_v1, %v6433_v21  ;;  %v6442_v48 = vrot.slane %v6434_v20, %v7534_v13  ;;  %v6317_v31 = vmul.f32 %v7355_v14, %v7755_v11 }
0x1e78   :  { %v7359_v41 = vpop.eup %7358  ;;  %v6318_v25 = vmul.f32 %v7357_v29, %v7767_v22  ;;  %v6452_v16 = vcombine.low %v6315_v55, %v6316_v33  ;;  %v6460_v58 = vrot.slane %v6451_v19, %v7534_v13 }
0x1e79   :  { %v7361_v28 = vpop.eup %7360  ;;  %v6319_v43 = vmul.f32 %v7359_v41, %v7775_v26  ;;  %v6449_v10 = vrot.slane %v6435_v12, %v7534_v13 }
0x1e7a   :  { %v7363_v44 = vpop.eup %7362  ;;  %v6453_v27 = vcombine.low %v6317_v31, %v6318_v25  ;;  %v6467_v42 = vrot.slane %v6452_v16, %v7534_v13  ;;  %v6320_v3 = vmul.f32 %v7361_v28, %v7752_v8 }
0x1e7b   :  { %v7365_v15 = vpop.eup %7364  ;;  %v6450_v36 = vcombine.low %v6442_v48, %v6449_v10  ;;  %v6321_v37 = vmul.f32 %v7363_v44, %v7761_v38  ;;  %v6481_v45 = vrot.slane %v6319_v43, %v7534_v13 }
0x1e7c   :  { %v7367_v39 = vpop.eup %7366  ;;  %v6474_v34 = vrot.slane %v6453_v27, %v7534_v13  ;;  %v6482_v40 = vcombine.low %v6460_v58, %v6467_v42  ;;  %v6322_v0 = vmul.f32 %v7365_v15, %v7771_v23  ;;  %v6551_v23 = vsel %vm1595_vm3, %v6402_v61, 0.0 }
0x1e7d   :  { %v7369_v6 = vpop.eup %7368  ;;  %v6554_v52 = vsel %vm1595_vm3, %v6450_v36, 0.0  ;;  %v6323_v53 = vmul.f32 %v7367_v39, %v7794_v47  ;;  %v6499_v35 = vcombine.low %v6320_v3, %v6321_v37 }
0x1e7e   :  { %v7371_v57 = vpop.eup %7370  ;;  %v6483_v54 = vcombine.low %v6474_v34, %v6481_v45  ;;  %v6490_v8 = vrot.slane %v6482_v40, %v7534_v13  ;;  %6555 = vadd.xlane.f32.xlu0 %v6554_v52  ;;  %v6324_v60 = vmul.f32 %v7369_v6, %v7755_v11 }
0x1e7f   :  { %v7373_v38 = vpop.eup %7372  ;;  %v6325_v18 = vmul.f32 %v7371_v57, %v7767_v22  ;;  %v6500_v46 = vcombine.low %v6322_v0, %v6323_v53  ;;  %v6508_v47 = vrot.slane %v6499_v35, %v7534_v13 }
0x1e80   :  { %v6497_v4 = vrot.slane %v6483_v54, %v7534_v13  ;;  %v6326_v7 = vmul.f32 %v7373_v38, %v7775_v26 }
0x1e81   :  { %v6501_v49 = vcombine.low %v6324_v60, %v6325_v18  ;;  %v6515_v59 = vrot.slane %v6500_v46, %v7534_v13 }
0x1e82   :  { %v6498_v9 = vcombine.low %v6490_v8, %v6497_v4  ;;  %6552 = vadd.xlane.f32.xlu0 %v6551_v23  ;;  %v6529_v11 = vrot.slane %v6326_v7, %v7534_v13 }
0x1e83   :  { %v6522_v63 = vrot.slane %v6501_v49, %v7534_v13  ;;  %v6530_v56 = vcombine.low %v6508_v47, %v6515_v59 }
0x1e84   :  { %v6557_v22 = vsel %vm1595_vm3, %v6498_v9, 0.0 }
0x1e85   :  { %6558 = vadd.xlane.f32.xlu1 %v6557_v22  ;;  %v6531_v51 = vcombine.low %v6522_v63, %v6529_v11  ;;  %v6538_v26 = vrot.slane %v6530_v56, %v7534_v13 }
0x1e87   :  { %v6545_v17 = vrot.slane %v6531_v51, %v7534_v13 }
0x1e89   :  { %v6546_v30 = vcombine.low %v6538_v26, %v6545_v17 }
0x1e8b   :  { %v6560_v62 = vsel %vm1595_vm3, %v6546_v30, 0.0 }
0x1e8c   :  { %6561 = vadd.xlane.f32.xlu0 %v6560_v62 }
0x1f07   :  { %v6556_v32 = vpop.xlane.xlu0 %6555 }
0x1f08   :  { %v6570_v1 = vsel %vm1608_vm4, %v6556_v32, -inf }
0x1f09   :  { %v6571_v21 = vrot.slane %v6570_v1, 4 }
0x1f0b   :  { %v6572_v20 = vmax.f32 %v6570_v1, %v6571_v21  ;;  %v6553_v14 = vpop.xlane.xlu0 %6552 }
0x1f0c   :  { %v6563_v55 = vsel %vm1608_vm4, %v6553_v14, -inf }
0x1f0d   :  { %v6573_v33 = vrot.slane %v6572_v20, 2  ;;  %v6564_v19 = vrot.slane %v6563_v55, 4 }
0x1f0e   :  { %v6559_v29 = vpop.xlane.xlu1 %6558 }
0x1f0f   :  { %v6577_v12 = vsel %vm1608_vm4, %v6559_v29, -inf  ;;  %v6574_v48 = vmax.f32 %v6572_v20, %v6573_v33  ;;  %v6565_v24 = vmax.f32 %v6563_v55, %v6564_v19 }
0x1f10   :  { %v6578_v13 = vrot.slane %v6577_v12, 4 }
0x1f11   :  { %v6575_v41 = vrot.slane %v6574_v48, 1  ;;  %v6566_v31 = vrot.slane %v6565_v24, 2 }
0x1f12   :  { %v6579_v25 = vmax.f32 %v6577_v12, %v6578_v13  ;;  %v7448_v13 = vld [vmem:[%s9390_s0 + $0x8] sm:$0x7f] }
0x1f13   :  { %v6576_v16 = vmax.f32 %v6574_v48, %v6575_v41  ;;  %v6567_v2 = vmax.f32 %v6565_v24, %v6566_v31 }
0x1f14   :  { %v6580_v28 = vrot.slane %v6579_v25, 2 }
0x1f15   :  { %v6592_v43 = vsub.f32 %v6556_v32, %v6576_v16  ;;  %v6568_v10 = vrot.slane %v6567_v2, 1  ;;  %v6562_v44 = vpop.xlane.xlu0 %6561 }
0x1f16   :  { %v6581_v27 = vmax.f32 %v6579_v25, %v6580_v28  ;;  %v6584_v58 = vsel %vm1608_vm4, %v6562_v44, -inf }
0x1f17   :  { %v6597_v42 = vmul.f32 1.442695, %v6592_v43  ;;  %v6569_v15 = vmax.f32 %v6567_v2, %v6568_v10  ;;  %v6585_v36 = vrot.slane %v6584_v58, 4  ;;  %v7449_v43 = vld [vmem:[%s9390_s0] sm:$0x7f] }
0x1f18   :  { %v6582_v3 = vrot.slane %v6581_v27, 1 }
0x1f19   :  { %7374 = vpow2.f32 %v6597_v42  ;;  %v6591_v37 = vsub.f32 %v6553_v14, %v6569_v15  ;;  %v6586_v39 = vmax.f32 %v6584_v58, %v6585_v36  ;;  %v7450_v42 = vld [vmem:[%s9390_s0 + $0x10] sm:$0x7f] }
0x1f1a   :  { %v6583_v34 = vmax.f32 %v6581_v27, %v6582_v3 }
0x1f1b   :  { %v6595_v45 = vmul.f32 1.442695, %v6591_v37  ;;  %v6587_v40 = vrot.slane %v6586_v39, 2 }
0x1f1c   :  { %v6593_v61 = vsub.f32 %v6559_v29, %v6583_v34 }
0x1f1d   :  { %7376 = vpow2.f32 %v6595_v45  ;;  %v6588_v6 = vmax.f32 %v6586_v39, %v6587_v40 }
0x1f1e   :  { %v6599_v52 = vmul.f32 1.442695, %v6593_v61 }
0x1f1f   :  { %v6589_v0 = vrot.slane %v6588_v6, 1 }
0x1f20   :  { %7378 = vpow2.f32 %v6599_v52 }
0x1f21   :  { %v6590_v53 = vmax.f32 %v6588_v6, %v6589_v0 }
0x1f23   :  { %v6594_v35 = vsub.f32 %v6562_v44, %v6590_v53  ;;  %v6804_v53 = vld [vmem:[%s9391_s3 + $0x6] ss:$0 sm:$0xff] }
0x1f25   :  { %v6601_v57 = vmul.f32 1.442695, %v6594_v35 }
0x1f26   :  { %v7375_v54 = vpop.eup %7374 }
0x1f27   :  { %v6610_v8 = vsel %vm1608_vm4, %v7375_v54, 0.0  ;;  %7380 = vpow2.f32 %v6601_v57 }
0x1f28   :  { %v6611_v38 = vrot.slane %v6610_v8, 4 }
0x1f2a   :  { %v7377_v60 = vpop.eup %7376  ;;  %v6612_v18 = vadd.f32 %v6611_v38, %v6610_v8 }
0x1f2b   :  { %v6603_v46 = vsel %vm1608_vm4, %v7377_v60, 0.0 }
0x1f2c   :  { %v6613_v4 = vrot.slane %v6612_v18, 2  ;;  %v6604_v7 = vrot.slane %v6603_v46, 4 }
0x1f2d   :  { %v7379_v23 = vpop.eup %7378 }
0x1f2e   :  { %v6617_v49 = vsel %vm1608_vm4, %v7379_v23, 0.0  ;;  %v6614_v47 = vadd.f32 %v6613_v4, %v6612_v18  ;;  %v6605_v59 = vadd.f32 %v6604_v7, %v6603_v46 }
0x1f2f   :  { %v6618_v9 = vrot.slane %v6617_v49, 4 }
0x1f30   :  { %v6615_v63 = vrot.slane %v6614_v47, 1  ;;  %v6606_v11 = vrot.slane %v6605_v59, 2 }
0x1f31   :  { %v6619_v56 = vadd.f32 %v6618_v9, %v6617_v49 }
0x1f32   :  { %v6616_v22 = vadd.f32 %v6615_v63, %v6614_v47  ;;  %v6607_v51 = vadd.f32 %v6606_v11, %v6605_v59 }
0x1f33   :  { %v6620_v26 = vrot.slane %v6619_v56, 2 }
0x1f34   :  { %v7381_v17 = vpop.eup %7380  ;;  %7382 = vrcp.f32 %v6616_v22  ;;  %v6608_v30 = vrot.slane %v6607_v51, 1 }
0x1f35   :  { %v6621_v62 = vadd.f32 %v6620_v26, %v6619_v56  ;;  %v6624_v32 = vsel %vm1608_vm4, %v7381_v17, 0.0  ;;  %v7452_v26 = vld [vmem:[%s9391_s3 + $0x4] ss:$0 sm:$0xff] }
0x1f36   :  { %v6609_v1 = vadd.f32 %v6608_v30, %v6607_v51  ;;  %v6625_v21 = vrot.slane %v6624_v32, 4 }
0x1f37   :  { %v6622_v20 = vrot.slane %v6621_v62, 1 }
0x1f38   :  { %7384 = vrcp.f32 %v6609_v1  ;;  %v6626_v14 = vadd.f32 %v6625_v21, %v6624_v32 }
0x1f39   :  { %v6623_v55 = vadd.f32 %v6622_v20, %v6621_v62 }
0x1f3a   :  { %v6627_v33 = vrot.slane %v6626_v14, 2 }
0x1f3b   :  { %7386 = vrcp.f32 %v6623_v55 }
0x1f3c   :  { %v6628_v19 = vadd.f32 %v6627_v33, %v6626_v14 }
0x1f3e   :  { %v6629_v29 = vrot.slane %v6628_v19, 1 }
0x1f40   :  { %v6630_v12 = vadd.f32 %v6629_v29, %v6628_v19 }
0x1f41   :  { %v7383_v48 = vpop.eup %7382 }
0x1f42   :  { %v6634_v24 = vmul.f32 %v7383_v48, %v7375_v54  ;;  %7388 = vrcp.f32 %v6630_v12  ;;  %v7451_v54 = vld [vmem:[%s9390_s0 + $0x18] sm:$0x7f] }
0x1f44   :  { %v6640_v41 = vmul.f32 %v7448_v13, %v6634_v24 }
0x1f45   :  { %v7385_v31 = vpop.eup %7384 }
0x1f46   :  { %v6632_v25 = vmul.f32 %v7385_v31, %v7377_v60  ;;  %v6650_v16 = vsel %vm1595_vm3, %v6640_v41, 0.0 }
0x1f47   :  { %v6651_v2 = vrot.slane %v6650_v16, 4 }
0x1f48   :  { %v7387_v28 = vpop.eup %7386  ;;  %v6639_v10 = vmul.f32 %v7449_v43, %v6632_v25  ;;  %v6801_v25 = vld [vmem:[%s9392_s1 + $0x18] sm:$0xf]  ;;  %v7453_v43 = vld [vmem:[%s9391_s3 + $0x2] ss:$0 sm:$0xff] }
0x1f49   :  { %v6636_v44 = vmul.f32 %v7387_v28, %v7379_v23  ;;  %v6652_v27 = vadd.f32 %v6651_v2, %v6650_v16 }
0x1f4a   :  { %v6643_v58 = vsel %vm1595_vm3, %v6639_v10, 0.0 }
0x1f4b   :  { %v6641_v15 = vmul.f32 %v7450_v42, %v6636_v44  ;;  %v6644_v36 = vrot.slane %v6643_v58, 4  ;;  %v6653_v3 = vrot.slane %v6652_v27, 2 }
0x1f4d   :  { %v6645_v37 = vadd.f32 %v6644_v36, %v6643_v58  ;;  %v6654_v39 = vadd.f32 %v6653_v3, %v6652_v27  ;;  %v6657_v34 = vsel %vm1595_vm3, %v6641_v15, 0.0  ;;  %v7454_v27 = vld [vmem:[%s9391_s3 + $0x3] ss:$0 sm:$0xff] }
0x1f4e   :  { %v6658_v45 = vrot.slane %v6657_v34, 4 }
0x1f4f   :  { %v7389_v40 = vpop.eup %7388  ;;  %v6646_v61 = vrot.slane %v6645_v37, 2  ;;  %v6655_v6 = vrot.slane %v6654_v39, 1 }
0x1f50   :  { %v6638_v52 = vmul.f32 %v7389_v40, %v7381_v17  ;;  %v6659_v0 = vadd.f32 %v6658_v45, %v6657_v34 }
0x1f51   :  { %v6647_v35 = vadd.f32 %v6646_v61, %v6645_v37  ;;  %v6656_v57 = vadd.f32 %v6655_v6, %v6654_v39 }
0x1f52   :  { %v6642_v8 = vmul.f32 %v7451_v54, %v6638_v52  ;;  %v6660_v38 = vrot.slane %v6659_v0, 2 }
0x1f53   :  { %v6648_v60 = vrot.slane %v6647_v35, 1  ;;  %v6744_v18 = vmul.f32 %v6804_v53, %v6656_v57  ;;  %v6672_v17 = vmul.f32 %v7452_v26, %v6656_v57 }
0x1f54   :  { %v6661_v46 = vadd.f32 %v6660_v38, %v6659_v0  ;;  %v6664_v4 = vsel %vm1595_vm3, %v6642_v8, 0.0  ;;  %v6763_v38 = vstv %s9393_s4 }
0x1f55   :  { %v6649_v7 = vadd.f32 %v6648_v60, %v6647_v35  ;;  %v6665_v23 = vrot.slane %v6664_v4, 4  ;;  %v6751_v9 = vrot.slane %v6744_v18, 7  ;;  %v6679_v14 = vrot.slane %v6672_v17, 7 }
0x1f56   :  { %v6662_v49 = vrot.slane %v6661_v46, 1 }
0x1f57   :  { %v6666_v47 = vadd.f32 %v6665_v23, %v6664_v4  ;;  %v6743_v59 = vmul.f32 %v6804_v53, %v6649_v7  ;;  %v6671_v32 = vmul.f32 %v7452_v26, %v6649_v7 }
0x1f58   :  { %v6663_v63 = vadd.f32 %v6662_v49, %v6661_v46 }
0x1f59   :  { %v6667_v11 = vrot.slane %v6666_v47, 2  ;;  %v6752_v56 = vsel %vm1730_vm5, %v6751_v9, %v6743_v59  ;;  %v6680_v33 = vsel %vm1730_vm5, %v6679_v14, %v6671_v32 }
0x1f5a   :  { %v6745_v22 = vmul.f32 %v6804_v53, %v6663_v63  ;;  %v6673_v1 = vmul.f32 %v7452_v26, %v6663_v63 }
0x1f5b   :  { %v6668_v51 = vadd.f32 %v6667_v11, %v6666_v47 }
0x1f5c   :  { %v6753_v30 = vrot.slane %v6745_v22, 6  ;;  %v6681_v29 = vrot.slane %v6673_v1, 6 }
0x1f5d   :  { %v6669_v62 = vrot.slane %v6668_v51, 1 }
0x1f5e   :  { %v6754_v21 = vsel %vm1733_vm6, %v6753_v30, %v6752_v56  ;;  %v6682_v24 = vsel %vm1733_vm6, %v6681_v29, %v6680_v33 }
0x1f5f   :  { %v6670_v20 = vadd.f32 %v6669_v62, %v6668_v51 }
0x1f61   :  { %v6674_v55 = vmul.f32 %v7452_v26, %v6670_v20  ;;  %v6746_v19 = vmul.f32 %v6804_v53, %v6670_v20 }
0x1f63   :  { %v6683_v12 = vrot.slane %v6674_v55, 5  ;;  %v6755_v48 = vrot.slane %v6746_v19, 5 }
0x1f65   :  { %v6684_v13 = vsel %vm1736_vm7, %v6683_v12, %v6682_v24  ;;  %v6756_v41 = vsel %vm1736_vm7, %v6755_v48, %v6754_v21 }
0x1f66   :  { %v6686_v31 = vsel %vm1739_vm8, %v6684_v13, 0.0  ;;  %v6758_v0 = vsel %vm1739_vm8, %v6756_v41, 0.0 }
0x1f67   :  { %6687 = vadd.xlane.f32.xlu0 %v6686_v31 }
0x1ff0   :  { %v6688_v16 = vpop.xlane.xlu0 %6687 }
0x1ff1   :  { %v6691_v2 = vadd.f32 %v6801_v25, %v6688_v16 }
0x1ff3   :  { %6694 = vperm.xlu1 %6832, %v6691_v2  }
0x206e   :  { %v6695_v28 = vpop.permute.xlu1 %6694 }
0x206f   :  { %v6697_v10 = vmul.f32 %v7453_v43, %v6695_v28 }
0x2071   :  { %v6698_v44 = vadd.f32 %v6697_v10, %v9207_v5 }
0x2073   :  { %v6699_v58 = vadd.f32 %v7454_v27, %v6698_v44 }
0x2075   :  { %7390 = vtanh.f32 %v6699_v58  ;;  %v6802_v15 = vmul.f32 -1.442695, %v6699_v58 }
0x2077   :  { %7392 = vpow2.f32 %v6802_v15 }
0x2082   :  { %v7391_v42 = vpop.eup %7390 }
0x2083   :  { %6709 = vrot.lane.b32.xlu0 %v7391_v42, %s7458_s11 }
0x2084   :  { %v7393_v36 = vpop.eup %7392 }
0x2085   :  { %v6703_v3 = vadd.f32 1.0, %v7393_v36 }
0x2087   :  { %7394 = vrcp.f32 %v6703_v3 }
0x2094   :  { %v7395_v37 = vpop.eup %7394 }
0x2095   :  { %v6707_v5 = vmul.f32 %v7395_v37, %v9203_v50  ;;  %v6803_v50 = vld [vmem:[%s9391_s3 + $0x5] ss:$0 sm:$0xff] }
0x20f5   :  { %v6710_v39 = vpop.permute.xlu0 %6709 }
0x20f6   :  { %v6712_v34 = vmul.f32 %v7395_v37, %v6710_v39 }
0x20f8   :  { %6714 = vrot.lane.b32.xlu1 %v6712_v34, %s7458_s11 }
0x216a   :  { %v6715_v45 = vpop.permute.xlu1 %6714 }
0x216b   :  { %v6717_v40 = vadd.f32 %v6715_v45, %v6707_v5 }
0x216d   :  { %7396 = vtanh.f32 %v6717_v40 }
0x217a   :  { %v7397_v61 = vpop.eup %7396 }
0x217b   :  { %6720 = vrot.lane.b32.xlu1 %v7397_v61, %s7458_s11 }
0x21ed   :  { %v6721_v6 = vpop.permute.xlu1 %6720 }
0x21ee   :  { %v6723_v52 = vmul.f32 %v7395_v37, %v6721_v6 }
0x21f0   :  { %6725 = vrot.lane.b32.xlu1 %v6723_v52, %s7459_s12 }
0x2214   :  { %6759 = vadd.xlane.f32.xlu1 %v6758_v0 }
0x2262   :  { %v6726_v53 = vpop.permute.xlu1 %6725 }
0x2263   :  { %6728 = vst.msk [vmem:[#allocation2] sm:$0xf] %vm1739_vm8, %v6726_v53 }
0x2264   :  { %6729 = vst.msk [vmem:[#allocation2] sm:$0xf] %vm1790_vm9, %v6717_v40 }
0x226b   :  { %v6730_v35 = vld [vmem:[#allocation2] sm:$0xf] }
0x226c   :  { %v6735_v57 = vmul.f32 %v6803_v50, %v6730_v35 }
0x226e   :  { %v6736_v54 = vsel %vm1739_vm8, %v6735_v57, 0.0 }
0x226f   :  { %6737 = vadd.xlane.f32.xlu0 %v6736_v54 }
0x229d   :  { %v6760_v8 = vpop.xlane.xlu1 %6759 }
0x22f8   :  { %v6738_v60 = vpop.xlane.xlu0 %6737 }
0x22f9   :  { %v6761_v18 = vadd.f32 %v6760_v8, %v6738_v60 }
0x22fb   :  { %v6764_v46 = vadd.f32 %v6763_v38, %v6761_v18 }
0x22fd   :  { %6766 = vst.msk [vmem:[%s9394_s5] sm:$0xf] %vm6765_vm10, %v6764_v46 }

</bundles_post_ra>
